<compile_context>
chip_gen: v6e
topology: v6e:2x2x1
jax: 0.10.0
libtpu: 0.0.40
codegen_flags: <defaults>
</compile_context>

<pallas_src>
import math

import numpy as np
import jax
import jax.numpy as jnp
from jax.experimental import pallas as pl
from jax.experimental.pallas import tpu as pltpu


# ----------------------------------------------------------------------------
# in-kernel helpers (element-wise math kept in f32)
# ----------------------------------------------------------------------------
def _layernorm(x, w, b, eps=1e-5):
    # x: (T, C) f32 ; w, b: (1, C) f32   (matches torch.nn.LayerNorm(eps=1e-5))
    mu = jnp.mean(x, axis=-1, keepdims=True)
    var = jnp.mean(jnp.square(x - mu), axis=-1, keepdims=True)
    return (x - mu) * jax.lax.rsqrt(var + eps) * w + b


def _gelu_exact(x):
    # torch.nn.GELU default = exact erf formulation
    return 0.5 * x * (1.0 + jax.lax.erf(x * jnp.float32(1.0 / math.sqrt(2.0))))


# ----------------------------------------------------------------------------
# fused Block kernel
# ----------------------------------------------------------------------------
def block_kernel(x_ref, ln1w_ref, ln1b_ref,
                 wq_ref, wk_ref, wv_ref, wproj_ref, bproj_ref,
                 ln2w_ref, ln2b_ref, w1_ref, b1_ref, w2_ref, b2_ref,
                 o_ref):
    bt, n, c = x_ref.shape
    num_heads, _, head_dim = wq_ref.shape        # (H, C, hd)
    t = bt * n
    mxu_dtype = wq_ref.dtype                     # bf16 operands, f32 accumulate

    x = x_ref[...].reshape(t, c)                 # residual stream (f32)

    # --- attention branch: x + proj(softmax(q k^T) v) ------------------------
    xn = _layernorm(x, ln1w_ref[...], ln1b_ref[...]).astype(mxu_dtype)

    attn_out = jnp.zeros((t, c), jnp.float32)
    for h in range(num_heads):   # static unroll; weights pre-sliced per head in
        # the wrapper -> no activation lane-slicing, no lane-axis head concat.
        qh = jnp.dot(xn, wq_ref[h], preferred_element_type=jnp.float32)  # scale folded
        kh = jnp.dot(xn, wk_ref[h], preferred_element_type=jnp.float32)
        vh = jnp.dot(xn, wv_ref[h], preferred_element_type=jnp.float32)
        q3 = qh.reshape(bt, n, head_dim).astype(mxu_dtype)
        k3 = kh.reshape(bt, n, head_dim).astype(mxu_dtype)
        v3 = vh.reshape(bt, n, head_dim).astype(mxu_dtype)
        s = jnp.einsum('bnd,bmd->bnm', q3, k3,
                       preferred_element_type=jnp.float32)               # (bt,n,n)
        s = s - jnp.max(s, axis=-1, keepdims=True)
        e = jnp.exp(s)
        p = e * pl.reciprocal(jnp.sum(e, axis=-1, keepdims=True), approx=True)
        oh = jnp.einsum('bnm,bmd->bnd', p.astype(mxu_dtype), v3,
                        preferred_element_type=jnp.float32)              # (bt,n,hd)
        # head-wise row-slab of the proj matrix accumulates into (T, C)
        attn_out = attn_out + jnp.dot(
            oh.reshape(t, head_dim).astype(mxu_dtype), wproj_ref[h],
            preferred_element_type=jnp.float32)

    x = x + attn_out + bproj_ref[...]

    # --- MLP branch: x + fc2(GELU(fc1(LN2(x)))) -------------------------------
    # NOTE: at real ViT sizes (C=768, hidden=3072) w1/w2 and the (T, hidden)
    # intermediate should be K-tiled over the hidden dim to respect v7x's
    # 64 MiB VMEM; at these demo sizes everything fits comfortably.
    xn2 = _layernorm(x, ln2w_ref[...], ln2b_ref[...]).astype(mxu_dtype)
    h1 = jnp.dot(xn2, w1_ref[...], preferred_element_type=jnp.float32) + b1_ref[...]
    h1 = _gelu_exact(h1)
    h2 = jnp.dot(h1.astype(mxu_dtype), w2_ref[...],
                 preferred_element_type=jnp.float32) + b2_ref[...]

    o_ref[...] = (x + h2).reshape(bt, n, c).astype(o_ref.dtype)


# ----------------------------------------------------------------------------
# wrapper
# ----------------------------------------------------------------------------
def block_forward(x, prepared_params, *, b_tile=8):
    B, N, C = x.shape
    b_tile = min(b_tile, B)
    grid = (pl.cdiv(B, b_tile),)
    # Grid-invariant weights: fully VMEM-resident for the whole call, no
    # per-step re-DMA and no double-buffering.
    weight_specs = [pl.BlockSpec(memory_space=pltpu.MemorySpace.VMEM)
                    for _ in prepared_params]
    return pl.pallas_call(
        block_kernel,
        out_shape=jax.ShapeDtypeStruct((B, N, C), jnp.float32),
        grid=grid,
        in_specs=[pl.BlockSpec((b_tile, N, C), lambda b: (b, 0, 0))] + weight_specs,
        out_specs=pl.BlockSpec((b_tile, N, C), lambda b: (b, 0, 0)),
        compiler_params=pltpu.CompilerParams(
            dimension_semantics=("parallel",),
            vmem_limit_bytes=64 * 1024 * 1024,
        ),
    )(x, *prepared_params)


# ----------------------------------------------------------------------------
# parameters (deterministic, synthetic) + static preprocessing
# ----------------------------------------------------------------------------
def init_block_params(key, dim, num_heads, mlp_ratio):
    C = dim
    hidden = int(C * mlp_ratio)
    k1, k2, k3, k4, k5, k6, k7 = jax.random.split(key, 7)
    ln1w = jnp.ones((1, C), jnp.float32)
    ln1b = jnp.zeros((1, C), jnp.float32)
    wqkv = 0.02 * jax.random.normal(k1, (C, 3 * C), jnp.float32)   # qkv_bias=False
    wproj = 0.02 * jax.random.normal(k2, (C, C), jnp.float32)
    bproj = 0.02 * jax.random.normal(k5, (1, C), jnp.float32)
    ln2w = jnp.ones((1, C), jnp.float32)
    ln2b = jnp.zeros((1, C), jnp.float32)
    w1 = 0.02 * jax.random.normal(k3, (C, hidden), jnp.float32)
    b1 = 0.02 * jax.random.normal(k6, (1, hidden), jnp.float32)
    w2 = 0.02 * jax.random.normal(k4, (hidden, C), jnp.float32)
    b2 = 0.02 * jax.random.normal(k7, (1, C), jnp.float32)
    return (ln1w, ln1b, wqkv, wproj, bproj, ln2w, ln2b, w1, b1, w2, b2)


def prepare_block_params(raw_params, num_heads, compute_dtype=jnp.bfloat16):
    """Static weight preprocessing done once in the wrapper (free at runtime):
    split qkv/proj into per-head slabs, fold the qk-scale into Q, and cast the
    matmul weights to the MXU operand dtype (bf16 recommended; float32 gives
    bit-near parity with the PyTorch reference)."""
    (ln1w, ln1b, wqkv, wproj, bproj, ln2w, ln2b, w1, b1, w2, b2) = raw_params
    C = wqkv.shape[0]
    hd = C // num_heads
    scale = hd ** (-0.5)
    wq = wqkv[:, 0 * C:1 * C] * scale          # fold attention scale into Q
    wk = wqkv[:, 1 * C:2 * C]
    wv = wqkv[:, 2 * C:3 * C]
    # heads on the leading (major) axis: (H, C, hd) / (H, hd, C)
    wq_h = wq.reshape(C, num_heads, hd).transpose(1, 0, 2)
    wk_h = wk.reshape(C, num_heads, hd).transpose(1, 0, 2)
    wv_h = wv.reshape(C, num_heads, hd).transpose(1, 0, 2)
    wp_h = wproj.reshape(num_heads, hd, C)
    cast = lambda a: a.astype(compute_dtype)
    return (ln1w, ln1b,
            cast(wq_h), cast(wk_h), cast(wv_h), cast(wp_h), bproj,
            ln2w, ln2b, cast(w1), b1, cast(w2), b2)


# ----------------------------------------------------------------------------
# pure-JAX f32 reference of the PyTorch Block.forward (eval mode)
# ----------------------------------------------------------------------------
def block_reference(x, raw_params, num_heads):
    (ln1w, ln1b, wqkv, wproj, bproj, ln2w, ln2b, w1, b1, w2, b2) = raw_params
    B, N, C = x.shape
    hd = C // num_heads
    scale = hd ** (-0.5)

    def ln(y, w, b, eps=1e-5):
        mu = y.mean(-1, keepdims=True)
        var = ((y - mu) ** 2).mean(-1, keepdims=True)
        return (y - mu) / jnp.sqrt(var + eps) * w + b

    with jax.default_matmul_precision("highest"):
        xn = ln(x, ln1w, ln1b)
        qkv = (xn @ wqkv).reshape(B, N, 3, num_heads, hd).transpose(2, 0, 3, 1, 4)
        q, k, v = qkv[0], qkv[1], qkv[2]                         # (B, H, N, hd)
        attn = (q @ jnp.swapaxes(k, -2, -1)) * scale
        attn = jax.nn.softmax(attn, axis=-1)
        y = (attn @ v).transpose(0, 2, 1, 3).reshape(B, N, C)
        y = y @ wproj + bproj
        x = x + y
        xn2 = ln(x, ln2w, ln2b)
        h = jax.nn.gelu(xn2 @ w1 + b1, approximate=False)
        return x + (h @ w2 + b2)


# ----------------------------------------------------------------------------
# main
# ----------------------------------------------------------------------------
if __name__ == "__main__":
    B, N, C = 4, 32, 128            # batch, tokens, embed_dim (C lane-aligned)
    num_heads, mlp_ratio = 4, 4.0

    key = jax.random.PRNGKey(0)
    kx, kp = jax.random.split(key)
    x = jax.random.normal(kx, (B, N, C), dtype=jnp.float32)

    raw_params = init_block_params(kp, C, num_heads, mlp_ratio)
    params = prepare_block_params(raw_params, num_heads, compute_dtype=jnp.bfloat16)

    out = block_forward(x, params, b_tile=8)
    out = jax.block_until_ready(out)
    assert out.shape == (B, N, C) and out.dtype == jnp.float32

    ref = block_reference(x, raw_params, num_heads)
    np.testing.assert_allclose(np.asarray(out), np.asarray(ref),
                               rtol=2e-2, atol=2e-2)
    print("KERNEL_OK")
</pallas_src>

<mosaic_0001>
module attributes {stable_mosaic.version = 11 : i64} {
  func.func @block_kernel(%arg0: i32, %arg1: memref<4x32x128xf32, #tpu.memory_space<vmem>>, %arg2: memref<1x128xf32, #tpu.memory_space<vmem>>, %arg3: memref<1x128xf32, #tpu.memory_space<vmem>>, %arg4: memref<4x128x32xbf16, #tpu.memory_space<vmem>>, %arg5: memref<4x128x32xbf16, #tpu.memory_space<vmem>>, %arg6: memref<4x128x32xbf16, #tpu.memory_space<vmem>>, %arg7: memref<4x32x128xbf16, #tpu.memory_space<vmem>>, %arg8: memref<1x128xf32, #tpu.memory_space<vmem>>, %arg9: memref<1x128xf32, #tpu.memory_space<vmem>>, %arg10: memref<1x128xf32, #tpu.memory_space<vmem>>, %arg11: memref<128x512xbf16, #tpu.memory_space<vmem>>, %arg12: memref<1x512xf32, #tpu.memory_space<vmem>>, %arg13: memref<512x128xbf16, #tpu.memory_space<vmem>>, %arg14: memref<1x128xf32, #tpu.memory_space<vmem>>, %arg15: memref<4x32x128xf32, #tpu.memory_space<vmem>>) attributes {dimension_semantics = [#tpu.dimension_semantics<parallel>], iteration_bounds = array<i64: 1>, scalar_prefetch = 0 : i64, scratch_operands = 0 : i64, tpu.core_type = #tpu.core_type<tc>, window_params = [{transform_indices = @transform_0, window_bounds = array<i64: 4, 32, 128>}, {pipeline_mode = #tpu.pipeline_mode<synchronous>, transform_indices = @transform_1, window_bounds = array<i64: 1, 128>}, {pipeline_mode = #tpu.pipeline_mode<synchronous>, transform_indices = @transform_2, window_bounds = array<i64: 1, 128>}, {pipeline_mode = #tpu.pipeline_mode<synchronous>, transform_indices = @transform_3, window_bounds = array<i64: 4, 128, 32>}, {pipeline_mode = #tpu.pipeline_mode<synchronous>, transform_indices = @transform_4, window_bounds = array<i64: 4, 128, 32>}, {pipeline_mode = #tpu.pipeline_mode<synchronous>, transform_indices = @transform_5, window_bounds = array<i64: 4, 128, 32>}, {pipeline_mode = #tpu.pipeline_mode<synchronous>, transform_indices = @transform_6, window_bounds = array<i64: 4, 32, 128>}, {pipeline_mode = #tpu.pipeline_mode<synchronous>, transform_indices = @transform_7, window_bounds = array<i64: 1, 128>}, {pipeline_mode = #tpu.pipeline_mode<synchronous>, transform_indices = @transform_8, window_bounds = array<i64: 1, 128>}, {pipeline_mode = #tpu.pipeline_mode<synchronous>, transform_indices = @transform_9, window_bounds = array<i64: 1, 128>}, {pipeline_mode = #tpu.pipeline_mode<synchronous>, transform_indices = @transform_10, window_bounds = array<i64: 128, 512>}, {pipeline_mode = #tpu.pipeline_mode<synchronous>, transform_indices = @transform_11, window_bounds = array<i64: 1, 512>}, {pipeline_mode = #tpu.pipeline_mode<synchronous>, transform_indices = @transform_12, window_bounds = array<i64: 512, 128>}, {pipeline_mode = #tpu.pipeline_mode<synchronous>, transform_indices = @transform_13, window_bounds = array<i64: 1, 128>}, {transform_indices = @transform_14, window_bounds = array<i64: 4, 32, 128>}]} {
    %c0 = arith.constant 0 : index
    %c0_0 = arith.constant 0 : index
    %c0_1 = arith.constant 0 : index
    %0 = vector.load %arg1[%c0, %c0_0, %c0_1] : memref<4x32x128xf32, #tpu.memory_space<vmem>>, vector<4x32x128xf32>
    %1 = vector.shape_cast %0 : vector<4x32x128xf32> to vector<128x128xf32>
    %c0_2 = arith.constant 0 : index
    %c0_3 = arith.constant 0 : index
    %2 = vector.load %arg2[%c0_2, %c0_3] : memref<1x128xf32, #tpu.memory_space<vmem>>, vector<1x128xf32>
    %c0_4 = arith.constant 0 : index
    %c0_5 = arith.constant 0 : index
    %3 = vector.load %arg3[%c0_4, %c0_5] : memref<1x128xf32, #tpu.memory_space<vmem>>, vector<1x128xf32>
    %cst = arith.constant dense<0.000000e+00> : vector<128xf32>
    %4 = vector.multi_reduction <add>, %1, %cst [1] : vector<128x128xf32> to vector<128xf32>
    %5 = vector.shape_cast %4 : vector<128xf32> to vector<128x1xf32>
    %cst_6 = arith.constant 1.280000e+02 : f32
    %6 = vector.broadcast %cst_6 : f32 to vector<128x1xf32>
    %7 = arith.divf %5, %6 : vector<128x1xf32>
    %8 = vector.broadcast %7 : vector<128x1xf32> to vector<128x128xf32>
    %9 = arith.subf %1, %8 : vector<128x128xf32>
    %10 = arith.mulf %9, %9 : vector<128x128xf32>
    %cst_7 = arith.constant dense<0.000000e+00> : vector<128xf32>
    %11 = vector.multi_reduction <add>, %10, %cst_7 [1] : vector<128x128xf32> to vector<128xf32>
    %12 = vector.shape_cast %11 : vector<128xf32> to vector<128x1xf32>
    %cst_8 = arith.constant 1.280000e+02 : f32
    %13 = vector.broadcast %cst_8 : f32 to vector<128x1xf32>
    %14 = arith.divf %12, %13 : vector<128x1xf32>
    %15 = vector.broadcast %7 : vector<128x1xf32> to vector<128x128xf32>
    %16 = arith.subf %1, %15 : vector<128x128xf32>
    %cst_9 = arith.constant 9.99999974E-6 : f32
    %17 = vector.broadcast %cst_9 : f32 to vector<128x1xf32>
    %18 = arith.addf %14, %17 : vector<128x1xf32>
    %19 = math.rsqrt %18 : vector<128x1xf32>
    %20 = vector.broadcast %19 : vector<128x1xf32> to vector<128x128xf32>
    %21 = arith.mulf %16, %20 : vector<128x128xf32>
    %22 = vector.broadcast %2 : vector<1x128xf32> to vector<128x128xf32>
    %23 = arith.mulf %21, %22 : vector<128x128xf32>
    %24 = vector.broadcast %3 : vector<1x128xf32> to vector<128x128xf32>
    %25 = arith.addf %23, %24 : vector<128x128xf32>
    %26 = arith.truncf %25 : vector<128x128xf32> to vector<128x128xbf16>
    %cst_10 = arith.constant 0.000000e+00 : f32
    %27 = vector.broadcast %cst_10 : f32 to vector<128x128xf32>
    %c0_11 = arith.constant 0 : index
    %c0_12 = arith.constant 0 : index
    %c0_13 = arith.constant 0 : index
    %28 = vector.load %arg4[%c0_11, %c0_12, %c0_13] : memref<4x128x32xbf16, #tpu.memory_space<vmem>>, vector<1x128x32xbf16>
    %29 = vector.shape_cast %28 : vector<1x128x32xbf16> to vector<128x32xbf16>
    %cst_14 = arith.constant dense<0.000000e+00> : vector<128x32xf32>
    %30 = tpu.matmul %26, %29, %cst_14 {dimension_numbers = #tpu.dot_dimension_numbers<[1], [0], [0], [1], [0, 0, 1, 1], [], []>} : vector<128x128xbf16>, vector<128x32xbf16>, vector<128x32xf32> -> vector<128x32xf32>
    %c0_15 = arith.constant 0 : index
    %c0_16 = arith.constant 0 : index
    %c0_17 = arith.constant 0 : index
    %31 = vector.load %arg5[%c0_15, %c0_16, %c0_17] : memref<4x128x32xbf16, #tpu.memory_space<vmem>>, vector<1x128x32xbf16>
    %32 = vector.shape_cast %31 : vector<1x128x32xbf16> to vector<128x32xbf16>
    %cst_18 = arith.constant dense<0.000000e+00> : vector<128x32xf32>
    %33 = tpu.matmul %26, %32, %cst_18 {dimension_numbers = #tpu.dot_dimension_numbers<[1], [0], [0], [1], [0, 0, 1, 1], [], []>} : vector<128x128xbf16>, vector<128x32xbf16>, vector<128x32xf32> -> vector<128x32xf32>
    %c0_19 = arith.constant 0 : index
    %c0_20 = arith.constant 0 : index
    %c0_21 = arith.constant 0 : index
    %34 = vector.load %arg6[%c0_19, %c0_20, %c0_21] : memref<4x128x32xbf16, #tpu.memory_space<vmem>>, vector<1x128x32xbf16>
    %35 = vector.shape_cast %34 : vector<1x128x32xbf16> to vector<128x32xbf16>
    %cst_22 = arith.constant dense<0.000000e+00> : vector<128x32xf32>
    %36 = tpu.matmul %26, %35, %cst_22 {dimension_numbers = #tpu.dot_dimension_numbers<[1], [0], [0], [1], [0, 0, 1, 1], [], []>} : vector<128x128xbf16>, vector<128x32xbf16>, vector<128x32xf32> -> vector<128x32xf32>
    %37 = vector.shape_cast %30 : vector<128x32xf32> to vector<4x32x32xf32>
    %38 = arith.truncf %37 : vector<4x32x32xf32> to vector<4x32x32xbf16>
    %39 = vector.shape_cast %33 : vector<128x32xf32> to vector<4x32x32xf32>
    %40 = arith.truncf %39 : vector<4x32x32xf32> to vector<4x32x32xbf16>
    %41 = vector.shape_cast %36 : vector<128x32xf32> to vector<4x32x32xf32>
    %42 = arith.truncf %41 : vector<4x32x32xf32> to vector<4x32x32xbf16>
    "tpu.trace_start"() <{level = 10 : i32, message = "bnd,bmd->bnm"}> : () -> ()
    %cst_23 = arith.constant dense<0.000000e+00> : vector<4x32x32xf32>
    %43 = tpu.matmul %38, %40, %cst_23 {dimension_numbers = #tpu.dot_dimension_numbers<[2], [2], [1], [1], [0, 0, 0, 1, 1, 1], [0], [0]>} : vector<4x32x32xbf16>, vector<4x32x32xbf16>, vector<4x32x32xf32> -> vector<4x32x32xf32>
    "tpu.trace_stop"() : () -> ()
    %cst_24 = arith.constant dense<0xFF800000> : vector<4x32xf32>
    %44 = vector.multi_reduction <maximumf>, %43, %cst_24 [2] : vector<4x32x32xf32> to vector<4x32xf32>
    %45 = vector.shape_cast %44 : vector<4x32xf32> to vector<4x32x1xf32>
    %46 = vector.broadcast %45 : vector<4x32x1xf32> to vector<4x32x32xf32>
    %47 = arith.subf %43, %46 : vector<4x32x32xf32>
    %48 = math.exp %47 : vector<4x32x32xf32>
    %cst_25 = arith.constant dense<0.000000e+00> : vector<4x32xf32>
    %49 = vector.multi_reduction <add>, %48, %cst_25 [2] : vector<4x32x32xf32> to vector<4x32xf32>
    %50 = vector.shape_cast %49 : vector<4x32xf32> to vector<4x32x1xf32>
    %51 = tpu.reciprocal %50 {approx = true} : vector<4x32x1xf32> -> vector<4x32x1xf32>
    %52 = vector.broadcast %51 : vector<4x32x1xf32> to vector<4x32x32xf32>
    %53 = arith.mulf %48, %52 : vector<4x32x32xf32>
    %54 = arith.truncf %53 : vector<4x32x32xf32> to vector<4x32x32xbf16>
    "tpu.trace_start"() <{level = 10 : i32, message = "bnm,bmd->bnd"}> : () -> ()
    %cst_26 = arith.constant dense<0.000000e+00> : vector<4x32x32xf32>
    %55 = tpu.matmul %54, %42, %cst_26 {dimension_numbers = #tpu.dot_dimension_numbers<[2], [1], [1], [2], [0, 0, 0, 1, 1, 2], [0], [0]>} : vector<4x32x32xbf16>, vector<4x32x32xbf16>, vector<4x32x32xf32> -> vector<4x32x32xf32>
    "tpu.trace_stop"() : () -> ()
    %56 = vector.shape_cast %55 : vector<4x32x32xf32> to vector<128x32xf32>
    %57 = arith.truncf %56 : vector<128x32xf32> to vector<128x32xbf16>
    %c0_27 = arith.constant 0 : index
    %c0_28 = arith.constant 0 : index
    %c0_29 = arith.constant 0 : index
    %58 = vector.load %arg7[%c0_27, %c0_28, %c0_29] : memref<4x32x128xbf16, #tpu.memory_space<vmem>>, vector<1x32x128xbf16>
    %59 = vector.shape_cast %58 : vector<1x32x128xbf16> to vector<32x128xbf16>
    %cst_30 = arith.constant dense<0.000000e+00> : vector<128x128xf32>
    %60 = tpu.matmul %57, %59, %cst_30 {dimension_numbers = #tpu.dot_dimension_numbers<[1], [0], [0], [1], [0, 0, 1, 1], [], []>} : vector<128x32xbf16>, vector<32x128xbf16>, vector<128x128xf32> -> vector<128x128xf32>
    %61 = arith.addf %27, %60 : vector<128x128xf32>
    %c1 = arith.constant 1 : index
    %c0_31 = arith.constant 0 : index
    %c0_32 = arith.constant 0 : index
    %62 = vector.load %arg4[%c1, %c0_31, %c0_32] : memref<4x128x32xbf16, #tpu.memory_space<vmem>>, vector<1x128x32xbf16>
    %63 = vector.shape_cast %62 : vector<1x128x32xbf16> to vector<128x32xbf16>
    %cst_33 = arith.constant dense<0.000000e+00> : vector<128x32xf32>
    %64 = tpu.matmul %26, %63, %cst_33 {dimension_numbers = #tpu.dot_dimension_numbers<[1], [0], [0], [1], [0, 0, 1, 1], [], []>} : vector<128x128xbf16>, vector<128x32xbf16>, vector<128x32xf32> -> vector<128x32xf32>
    %c1_34 = arith.constant 1 : index
    %c0_35 = arith.constant 0 : index
    %c0_36 = arith.constant 0 : index
    %65 = vector.load %arg5[%c1_34, %c0_35, %c0_36] : memref<4x128x32xbf16, #tpu.memory_space<vmem>>, vector<1x128x32xbf16>
    %66 = vector.shape_cast %65 : vector<1x128x32xbf16> to vector<128x32xbf16>
    %cst_37 = arith.constant dense<0.000000e+00> : vector<128x32xf32>
    %67 = tpu.matmul %26, %66, %cst_37 {dimension_numbers = #tpu.dot_dimension_numbers<[1], [0], [0], [1], [0, 0, 1, 1], [], []>} : vector<128x128xbf16>, vector<128x32xbf16>, vector<128x32xf32> -> vector<128x32xf32>
    %c1_38 = arith.constant 1 : index
    %c0_39 = arith.constant 0 : index
    %c0_40 = arith.constant 0 : index
    %68 = vector.load %arg6[%c1_38, %c0_39, %c0_40] : memref<4x128x32xbf16, #tpu.memory_space<vmem>>, vector<1x128x32xbf16>
    %69 = vector.shape_cast %68 : vector<1x128x32xbf16> to vector<128x32xbf16>
    %cst_41 = arith.constant dense<0.000000e+00> : vector<128x32xf32>
    %70 = tpu.matmul %26, %69, %cst_41 {dimension_numbers = #tpu.dot_dimension_numbers<[1], [0], [0], [1], [0, 0, 1, 1], [], []>} : vector<128x128xbf16>, vector<128x32xbf16>, vector<128x32xf32> -> vector<128x32xf32>
    %71 = vector.shape_cast %64 : vector<128x32xf32> to vector<4x32x32xf32>
    %72 = arith.truncf %71 : vector<4x32x32xf32> to vector<4x32x32xbf16>
    %73 = vector.shape_cast %67 : vector<128x32xf32> to vector<4x32x32xf32>
    %74 = arith.truncf %73 : vector<4x32x32xf32> to vector<4x32x32xbf16>
    %75 = vector.shape_cast %70 : vector<128x32xf32> to vector<4x32x32xf32>
    %76 = arith.truncf %75 : vector<4x32x32xf32> to vector<4x32x32xbf16>
    "tpu.trace_start"() <{level = 10 : i32, message = "bnd,bmd->bnm"}> : () -> ()
    %cst_42 = arith.constant dense<0.000000e+00> : vector<4x32x32xf32>
    %77 = tpu.matmul %72, %74, %cst_42 {dimension_numbers = #tpu.dot_dimension_numbers<[2], [2], [1], [1], [0, 0, 0, 1, 1, 1], [0], [0]>} : vector<4x32x32xbf16>, vector<4x32x32xbf16>, vector<4x32x32xf32> -> vector<4x32x32xf32>
    "tpu.trace_stop"() : () -> ()
    %cst_43 = arith.constant dense<0xFF800000> : vector<4x32xf32>
    %78 = vector.multi_reduction <maximumf>, %77, %cst_43 [2] : vector<4x32x32xf32> to vector<4x32xf32>
    %79 = vector.shape_cast %78 : vector<4x32xf32> to vector<4x32x1xf32>
    %80 = vector.broadcast %79 : vector<4x32x1xf32> to vector<4x32x32xf32>
    %81 = arith.subf %77, %80 : vector<4x32x32xf32>
    %82 = math.exp %81 : vector<4x32x32xf32>
    %cst_44 = arith.constant dense<0.000000e+00> : vector<4x32xf32>
    %83 = vector.multi_reduction <add>, %82, %cst_44 [2] : vector<4x32x32xf32> to vector<4x32xf32>
    %84 = vector.shape_cast %83 : vector<4x32xf32> to vector<4x32x1xf32>
    %85 = tpu.reciprocal %84 {approx = true} : vector<4x32x1xf32> -> vector<4x32x1xf32>
    %86 = vector.broadcast %85 : vector<4x32x1xf32> to vector<4x32x32xf32>
    %87 = arith.mulf %82, %86 : vector<4x32x32xf32>
    %88 = arith.truncf %87 : vector<4x32x32xf32> to vector<4x32x32xbf16>
    "tpu.trace_start"() <{level = 10 : i32, message = "bnm,bmd->bnd"}> : () -> ()
    %cst_45 = arith.constant dense<0.000000e+00> : vector<4x32x32xf32>
    %89 = tpu.matmul %88, %76, %cst_45 {dimension_numbers = #tpu.dot_dimension_numbers<[2], [1], [1], [2], [0, 0, 0, 1, 1, 2], [0], [0]>} : vector<4x32x32xbf16>, vector<4x32x32xbf16>, vector<4x32x32xf32> -> vector<4x32x32xf32>
    "tpu.trace_stop"() : () -> ()
    %90 = vector.shape_cast %89 : vector<4x32x32xf32> to vector<128x32xf32>
    %91 = arith.truncf %90 : vector<128x32xf32> to vector<128x32xbf16>
    %c1_46 = arith.constant 1 : index
    %c0_47 = arith.constant 0 : index
    %c0_48 = arith.constant 0 : index
    %92 = vector.load %arg7[%c1_46, %c0_47, %c0_48] : memref<4x32x128xbf16, #tpu.memory_space<vmem>>, vector<1x32x128xbf16>
    %93 = vector.shape_cast %92 : vector<1x32x128xbf16> to vector<32x128xbf16>
    %cst_49 = arith.constant dense<0.000000e+00> : vector<128x128xf32>
    %94 = tpu.matmul %91, %93, %cst_49 {dimension_numbers = #tpu.dot_dimension_numbers<[1], [0], [0], [1], [0, 0, 1, 1], [], []>} : vector<128x32xbf16>, vector<32x128xbf16>, vector<128x128xf32> -> vector<128x128xf32>
    %95 = arith.addf %61, %94 : vector<128x128xf32>
    %c2 = arith.constant 2 : index
    %c0_50 = arith.constant 0 : index
    %c0_51 = arith.constant 0 : index
    %96 = vector.load %arg4[%c2, %c0_50, %c0_51] : memref<4x128x32xbf16, #tpu.memory_space<vmem>>, vector<1x128x32xbf16>
    %97 = vector.shape_cast %96 : vector<1x128x32xbf16> to vector<128x32xbf16>
    %cst_52 = arith.constant dense<0.000000e+00> : vector<128x32xf32>
    %98 = tpu.matmul %26, %97, %cst_52 {dimension_numbers = #tpu.dot_dimension_numbers<[1], [0], [0], [1], [0, 0, 1, 1], [], []>} : vector<128x128xbf16>, vector<128x32xbf16>, vector<128x32xf32> -> vector<128x32xf32>
    %c2_53 = arith.constant 2 : index
    %c0_54 = arith.constant 0 : index
    %c0_55 = arith.constant 0 : index
    %99 = vector.load %arg5[%c2_53, %c0_54, %c0_55] : memref<4x128x32xbf16, #tpu.memory_space<vmem>>, vector<1x128x32xbf16>
    %100 = vector.shape_cast %99 : vector<1x128x32xbf16> to vector<128x32xbf16>
    %cst_56 = arith.constant dense<0.000000e+00> : vector<128x32xf32>
    %101 = tpu.matmul %26, %100, %cst_56 {dimension_numbers = #tpu.dot_dimension_numbers<[1], [0], [0], [1], [0, 0, 1, 1], [], []>} : vector<128x128xbf16>, vector<128x32xbf16>, vector<128x32xf32> -> vector<128x32xf32>
    %c2_57 = arith.constant 2 : index
    %c0_58 = arith.constant 0 : index
    %c0_59 = arith.constant 0 : index
    %102 = vector.load %arg6[%c2_57, %c0_58, %c0_59] : memref<4x128x32xbf16, #tpu.memory_space<vmem>>, vector<1x128x32xbf16>
    %103 = vector.shape_cast %102 : vector<1x128x32xbf16> to vector<128x32xbf16>
    %cst_60 = arith.constant dense<0.000000e+00> : vector<128x32xf32>
    %104 = tpu.matmul %26, %103, %cst_60 {dimension_numbers = #tpu.dot_dimension_numbers<[1], [0], [0], [1], [0, 0, 1, 1], [], []>} : vector<128x128xbf16>, vector<128x32xbf16>, vector<128x32xf32> -> vector<128x32xf32>
    %105 = vector.shape_cast %98 : vector<128x32xf32> to vector<4x32x32xf32>
    %106 = arith.truncf %105 : vector<4x32x32xf32> to vector<4x32x32xbf16>
    %107 = vector.shape_cast %101 : vector<128x32xf32> to vector<4x32x32xf32>
    %108 = arith.truncf %107 : vector<4x32x32xf32> to vector<4x32x32xbf16>
    %109 = vector.shape_cast %104 : vector<128x32xf32> to vector<4x32x32xf32>
    %110 = arith.truncf %109 : vector<4x32x32xf32> to vector<4x32x32xbf16>
    "tpu.trace_start"() <{level = 10 : i32, message = "bnd,bmd->bnm"}> : () -> ()
    %cst_61 = arith.constant dense<0.000000e+00> : vector<4x32x32xf32>
    %111 = tpu.matmul %106, %108, %cst_61 {dimension_numbers = #tpu.dot_dimension_numbers<[2], [2], [1], [1], [0, 0, 0, 1, 1, 1], [0], [0]>} : vector<4x32x32xbf16>, vector<4x32x32xbf16>, vector<4x32x32xf32> -> vector<4x32x32xf32>
    "tpu.trace_stop"() : () -> ()
    %cst_62 = arith.constant dense<0xFF800000> : vector<4x32xf32>
    %112 = vector.multi_reduction <maximumf>, %111, %cst_62 [2] : vector<4x32x32xf32> to vector<4x32xf32>
    %113 = vector.shape_cast %112 : vector<4x32xf32> to vector<4x32x1xf32>
    %114 = vector.broadcast %113 : vector<4x32x1xf32> to vector<4x32x32xf32>
    %115 = arith.subf %111, %114 : vector<4x32x32xf32>
    %116 = math.exp %115 : vector<4x32x32xf32>
    %cst_63 = arith.constant dense<0.000000e+00> : vector<4x32xf32>
    %117 = vector.multi_reduction <add>, %116, %cst_63 [2] : vector<4x32x32xf32> to vector<4x32xf32>
    %118 = vector.shape_cast %117 : vector<4x32xf32> to vector<4x32x1xf32>
    %119 = tpu.reciprocal %118 {approx = true} : vector<4x32x1xf32> -> vector<4x32x1xf32>
    %120 = vector.broadcast %119 : vector<4x32x1xf32> to vector<4x32x32xf32>
    %121 = arith.mulf %116, %120 : vector<4x32x32xf32>
    %122 = arith.truncf %121 : vector<4x32x32xf32> to vector<4x32x32xbf16>
    "tpu.trace_start"() <{level = 10 : i32, message = "bnm,bmd->bnd"}> : () -> ()
    %cst_64 = arith.constant dense<0.000000e+00> : vector<4x32x32xf32>
    %123 = tpu.matmul %122, %110, %cst_64 {dimension_numbers = #tpu.dot_dimension_numbers<[2], [1], [1], [2], [0, 0, 0, 1, 1, 2], [0], [0]>} : vector<4x32x32xbf16>, vector<4x32x32xbf16>, vector<4x32x32xf32> -> vector<4x32x32xf32>
    "tpu.trace_stop"() : () -> ()
    %124 = vector.shape_cast %123 : vector<4x32x32xf32> to vector<128x32xf32>
    %125 = arith.truncf %124 : vector<128x32xf32> to vector<128x32xbf16>
    %c2_65 = arith.constant 2 : index
    %c0_66 = arith.constant 0 : index
    %c0_67 = arith.constant 0 : index
    %126 = vector.load %arg7[%c2_65, %c0_66, %c0_67] : memref<4x32x128xbf16, #tpu.memory_space<vmem>>, vector<1x32x128xbf16>
    %127 = vector.shape_cast %126 : vector<1x32x128xbf16> to vector<32x128xbf16>
    %cst_68 = arith.constant dense<0.000000e+00> : vector<128x128xf32>
    %128 = tpu.matmul %125, %127, %cst_68 {dimension_numbers = #tpu.dot_dimension_numbers<[1], [0], [0], [1], [0, 0, 1, 1], [], []>} : vector<128x32xbf16>, vector<32x128xbf16>, vector<128x128xf32> -> vector<128x128xf32>
    %129 = arith.addf %95, %128 : vector<128x128xf32>
    %c3 = arith.constant 3 : index
    %c0_69 = arith.constant 0 : index
    %c0_70 = arith.constant 0 : index
    %130 = vector.load %arg4[%c3, %c0_69, %c0_70] : memref<4x128x32xbf16, #tpu.memory_space<vmem>>, vector<1x128x32xbf16>
    %131 = vector.shape_cast %130 : vector<1x128x32xbf16> to vector<128x32xbf16>
    %cst_71 = arith.constant dense<0.000000e+00> : vector<128x32xf32>
    %132 = tpu.matmul %26, %131, %cst_71 {dimension_numbers = #tpu.dot_dimension_numbers<[1], [0], [0], [1], [0, 0, 1, 1], [], []>} : vector<128x128xbf16>, vector<128x32xbf16>, vector<128x32xf32> -> vector<128x32xf32>
    %c3_72 = arith.constant 3 : index
    %c0_73 = arith.constant 0 : index
    %c0_74 = arith.constant 0 : index
    %133 = vector.load %arg5[%c3_72, %c0_73, %c0_74] : memref<4x128x32xbf16, #tpu.memory_space<vmem>>, vector<1x128x32xbf16>
    %134 = vector.shape_cast %133 : vector<1x128x32xbf16> to vector<128x32xbf16>
    %cst_75 = arith.constant dense<0.000000e+00> : vector<128x32xf32>
    %135 = tpu.matmul %26, %134, %cst_75 {dimension_numbers = #tpu.dot_dimension_numbers<[1], [0], [0], [1], [0, 0, 1, 1], [], []>} : vector<128x128xbf16>, vector<128x32xbf16>, vector<128x32xf32> -> vector<128x32xf32>
    %c3_76 = arith.constant 3 : index
    %c0_77 = arith.constant 0 : index
    %c0_78 = arith.constant 0 : index
    %136 = vector.load %arg6[%c3_76, %c0_77, %c0_78] : memref<4x128x32xbf16, #tpu.memory_space<vmem>>, vector<1x128x32xbf16>
    %137 = vector.shape_cast %136 : vector<1x128x32xbf16> to vector<128x32xbf16>
    %cst_79 = arith.constant dense<0.000000e+00> : vector<128x32xf32>
    %138 = tpu.matmul %26, %137, %cst_79 {dimension_numbers = #tpu.dot_dimension_numbers<[1], [0], [0], [1], [0, 0, 1, 1], [], []>} : vector<128x128xbf16>, vector<128x32xbf16>, vector<128x32xf32> -> vector<128x32xf32>
    %139 = vector.shape_cast %132 : vector<128x32xf32> to vector<4x32x32xf32>
    %140 = arith.truncf %139 : vector<4x32x32xf32> to vector<4x32x32xbf16>
    %141 = vector.shape_cast %135 : vector<128x32xf32> to vector<4x32x32xf32>
    %142 = arith.truncf %141 : vector<4x32x32xf32> to vector<4x32x32xbf16>
    %143 = vector.shape_cast %138 : vector<128x32xf32> to vector<4x32x32xf32>
    %144 = arith.truncf %143 : vector<4x32x32xf32> to vector<4x32x32xbf16>
    "tpu.trace_start"() <{level = 10 : i32, message = "bnd,bmd->bnm"}> : () -> ()
    %cst_80 = arith.constant dense<0.000000e+00> : vector<4x32x32xf32>
    %145 = tpu.matmul %140, %142, %cst_80 {dimension_numbers = #tpu.dot_dimension_numbers<[2], [2], [1], [1], [0, 0, 0, 1, 1, 1], [0], [0]>} : vector<4x32x32xbf16>, vector<4x32x32xbf16>, vector<4x32x32xf32> -> vector<4x32x32xf32>
    "tpu.trace_stop"() : () -> ()
    %cst_81 = arith.constant dense<0xFF800000> : vector<4x32xf32>
    %146 = vector.multi_reduction <maximumf>, %145, %cst_81 [2] : vector<4x32x32xf32> to vector<4x32xf32>
    %147 = vector.shape_cast %146 : vector<4x32xf32> to vector<4x32x1xf32>
    %148 = vector.broadcast %147 : vector<4x32x1xf32> to vector<4x32x32xf32>
    %149 = arith.subf %145, %148 : vector<4x32x32xf32>
    %150 = math.exp %149 : vector<4x32x32xf32>
    %cst_82 = arith.constant dense<0.000000e+00> : vector<4x32xf32>
    %151 = vector.multi_reduction <add>, %150, %cst_82 [2] : vector<4x32x32xf32> to vector<4x32xf32>
    %152 = vector.shape_cast %151 : vector<4x32xf32> to vector<4x32x1xf32>
    %153 = tpu.reciprocal %152 {approx = true} : vector<4x32x1xf32> -> vector<4x32x1xf32>
    %154 = vector.broadcast %153 : vector<4x32x1xf32> to vector<4x32x32xf32>
    %155 = arith.mulf %150, %154 : vector<4x32x32xf32>
    %156 = arith.truncf %155 : vector<4x32x32xf32> to vector<4x32x32xbf16>
    "tpu.trace_start"() <{level = 10 : i32, message = "bnm,bmd->bnd"}> : () -> ()
    %cst_83 = arith.constant dense<0.000000e+00> : vector<4x32x32xf32>
    %157 = tpu.matmul %156, %144, %cst_83 {dimension_numbers = #tpu.dot_dimension_numbers<[2], [1], [1], [2], [0, 0, 0, 1, 1, 2], [0], [0]>} : vector<4x32x32xbf16>, vector<4x32x32xbf16>, vector<4x32x32xf32> -> vector<4x32x32xf32>
    "tpu.trace_stop"() : () -> ()
    %158 = vector.shape_cast %157 : vector<4x32x32xf32> to vector<128x32xf32>
    %159 = arith.truncf %158 : vector<128x32xf32> to vector<128x32xbf16>
    %c3_84 = arith.constant 3 : index
    %c0_85 = arith.constant 0 : index
    %c0_86 = arith.constant 0 : index
    %160 = vector.load %arg7[%c3_84, %c0_85, %c0_86] : memref<4x32x128xbf16, #tpu.memory_space<vmem>>, vector<1x32x128xbf16>
    %161 = vector.shape_cast %160 : vector<1x32x128xbf16> to vector<32x128xbf16>
    %cst_87 = arith.constant dense<0.000000e+00> : vector<128x128xf32>
    %162 = tpu.matmul %159, %161, %cst_87 {dimension_numbers = #tpu.dot_dimension_numbers<[1], [0], [0], [1], [0, 0, 1, 1], [], []>} : vector<128x32xbf16>, vector<32x128xbf16>, vector<128x128xf32> -> vector<128x128xf32>
    %163 = arith.addf %129, %162 : vector<128x128xf32>
    %164 = arith.addf %1, %163 : vector<128x128xf32>
    %c0_88 = arith.constant 0 : index
    %c0_89 = arith.constant 0 : index
    %165 = vector.load %arg8[%c0_88, %c0_89] : memref<1x128xf32, #tpu.memory_space<vmem>>, vector<1x128xf32>
    %166 = vector.broadcast %165 : vector<1x128xf32> to vector<128x128xf32>
    %167 = arith.addf %164, %166 : vector<128x128xf32>
    %c0_90 = arith.constant 0 : index
    %c0_91 = arith.constant 0 : index
    %168 = vector.load %arg9[%c0_90, %c0_91] : memref<1x128xf32, #tpu.memory_space<vmem>>, vector<1x128xf32>
    %c0_92 = arith.constant 0 : index
    %c0_93 = arith.constant 0 : index
    %169 = vector.load %arg10[%c0_92, %c0_93] : memref<1x128xf32, #tpu.memory_space<vmem>>, vector<1x128xf32>
    %cst_94 = arith.constant dense<0.000000e+00> : vector<128xf32>
    %170 = vector.multi_reduction <add>, %167, %cst_94 [1] : vector<128x128xf32> to vector<128xf32>
    %171 = vector.shape_cast %170 : vector<128xf32> to vector<128x1xf32>
    %cst_95 = arith.constant 1.280000e+02 : f32
    %172 = vector.broadcast %cst_95 : f32 to vector<128x1xf32>
    %173 = arith.divf %171, %172 : vector<128x1xf32>
    %174 = vector.broadcast %173 : vector<128x1xf32> to vector<128x128xf32>
    %175 = arith.subf %167, %174 : vector<128x128xf32>
    %176 = arith.mulf %175, %175 : vector<128x128xf32>
    %cst_96 = arith.constant dense<0.000000e+00> : vector<128xf32>
    %177 = vector.multi_reduction <add>, %176, %cst_96 [1] : vector<128x128xf32> to vector<128xf32>
    %178 = vector.shape_cast %177 : vector<128xf32> to vector<128x1xf32>
    %cst_97 = arith.constant 1.280000e+02 : f32
    %179 = vector.broadcast %cst_97 : f32 to vector<128x1xf32>
    %180 = arith.divf %178, %179 : vector<128x1xf32>
    %181 = vector.broadcast %173 : vector<128x1xf32> to vector<128x128xf32>
    %182 = arith.subf %167, %181 : vector<128x128xf32>
    %cst_98 = arith.constant 9.99999974E-6 : f32
    %183 = vector.broadcast %cst_98 : f32 to vector<128x1xf32>
    %184 = arith.addf %180, %183 : vector<128x1xf32>
    %185 = math.rsqrt %184 : vector<128x1xf32>
    %186 = vector.broadcast %185 : vector<128x1xf32> to vector<128x128xf32>
    %187 = arith.mulf %182, %186 : vector<128x128xf32>
    %188 = vector.broadcast %168 : vector<1x128xf32> to vector<128x128xf32>
    %189 = arith.mulf %187, %188 : vector<128x128xf32>
    %190 = vector.broadcast %169 : vector<1x128xf32> to vector<128x128xf32>
    %191 = arith.addf %189, %190 : vector<128x128xf32>
    %192 = arith.truncf %191 : vector<128x128xf32> to vector<128x128xbf16>
    %c0_99 = arith.constant 0 : index
    %c0_100 = arith.constant 0 : index
    %193 = vector.load %arg11[%c0_99, %c0_100] : memref<128x512xbf16, #tpu.memory_space<vmem>>, vector<128x512xbf16>
    %cst_101 = arith.constant dense<0.000000e+00> : vector<128x512xf32>
    %194 = tpu.matmul %192, %193, %cst_101 {dimension_numbers = #tpu.dot_dimension_numbers<[1], [0], [0], [1], [0, 0, 1, 1], [], []>} : vector<128x128xbf16>, vector<128x512xbf16>, vector<128x512xf32> -> vector<128x512xf32>
    %c0_102 = arith.constant 0 : index
    %c0_103 = arith.constant 0 : index
    %195 = vector.load %arg12[%c0_102, %c0_103] : memref<1x512xf32, #tpu.memory_space<vmem>>, vector<1x512xf32>
    %196 = vector.broadcast %195 : vector<1x512xf32> to vector<128x512xf32>
    %197 = arith.addf %194, %196 : vector<128x512xf32>
    %cst_104 = arith.constant 5.000000e-01 : f32
    %198 = vector.broadcast %cst_104 : f32 to vector<128x512xf32>
    %199 = arith.mulf %198, %197 : vector<128x512xf32>
    %cst_105 = arith.constant 0.707106769 : f32
    %200 = vector.broadcast %cst_105 : f32 to vector<128x512xf32>
    %201 = arith.mulf %197, %200 : vector<128x512xf32>
    %202 = math.erf %201 : vector<128x512xf32>
    %cst_106 = arith.constant 1.000000e+00 : f32
    %203 = vector.broadcast %cst_106 : f32 to vector<128x512xf32>
    %204 = arith.addf %203, %202 : vector<128x512xf32>
    %205 = arith.mulf %199, %204 : vector<128x512xf32>
    %206 = arith.truncf %205 : vector<128x512xf32> to vector<128x512xbf16>
    %c0_107 = arith.constant 0 : index
    %c0_108 = arith.constant 0 : index
    %207 = vector.load %arg13[%c0_107, %c0_108] : memref<512x128xbf16, #tpu.memory_space<vmem>>, vector<512x128xbf16>
    %cst_109 = arith.constant dense<0.000000e+00> : vector<128x128xf32>
    %208 = tpu.matmul %206, %207, %cst_109 {dimension_numbers = #tpu.dot_dimension_numbers<[1], [0], [0], [1], [0, 0, 1, 1], [], []>} : vector<128x512xbf16>, vector<512x128xbf16>, vector<128x128xf32> -> vector<128x128xf32>
    %c0_110 = arith.constant 0 : index
    %c0_111 = arith.constant 0 : index
    %209 = vector.load %arg14[%c0_110, %c0_111] : memref<1x128xf32, #tpu.memory_space<vmem>>, vector<1x128xf32>
    %210 = vector.broadcast %209 : vector<1x128xf32> to vector<128x128xf32>
    %211 = arith.addf %208, %210 : vector<128x128xf32>
    %212 = arith.addf %167, %211 : vector<128x128xf32>
    %213 = vector.shape_cast %212 : vector<128x128xf32> to vector<4x32x128xf32>
    %c0_112 = arith.constant 0 : index
    %c0_113 = arith.constant 0 : index
    %c0_114 = arith.constant 0 : index
    %214 = vector.load %arg15[%c0_112, %c0_113, %c0_114] : memref<4x32x128xf32, #tpu.memory_space<vmem>>, vector<4x32x128xf32>
    tpu.vector_store %arg15[%c0_112, %c0_113, %c0_114], %213 {strides = array<i32>} : memref<4x32x128xf32, #tpu.memory_space<vmem>>, vector<4x32x128xf32>,
    return
  }
  func.func @transform_0(%arg0: i32) -> (i32, i32, i32) {
    %c0_i32 = arith.constant 0 : i32
    %c0_i32_0 = arith.constant 0 : i32
    %c0_i32_1 = arith.constant 0 : i32
    return %arg0, %c0_i32, %c0_i32_0 : i32, i32, i32
  }
  func.func @transform_1(%arg0: i32) -> (i32, i32) {
    %c0_i32 = arith.constant 0 : i32
    %c0_i32_0 = arith.constant 0 : i32
    %c0_i32_1 = arith.constant 0 : i32
    return %c0_i32, %c0_i32_0 : i32, i32
  }
  func.func @transform_2(%arg0: i32) -> (i32, i32) {
    %c0_i32 = arith.constant 0 : i32
    %c0_i32_0 = arith.constant 0 : i32
    %c0_i32_1 = arith.constant 0 : i32
    return %c0_i32, %c0_i32_0 : i32, i32
  }
  func.func @transform_3(%arg0: i32) -> (i32, i32, i32) {
    %c0_i32 = arith.constant 0 : i32
    %c0_i32_0 = arith.constant 0 : i32
    %c0_i32_1 = arith.constant 0 : i32
    %c0_i32_2 = arith.constant 0 : i32
    return %c0_i32, %c0_i32_0, %c0_i32_1 : i32, i32, i32
  }
  func.func @transform_4(%arg0: i32) -> (i32, i32, i32) {
    %c0_i32 = arith.constant 0 : i32
    %c0_i32_0 = arith.constant 0 : i32
    %c0_i32_1 = arith.constant 0 : i32
    %c0_i32_2 = arith.constant 0 : i32
    return %c0_i32, %c0_i32_0, %c0_i32_1 : i32, i32, i32
  }
  func.func @transform_5(%arg0: i32) -> (i32, i32, i32) {
    %c0_i32 = arith.constant 0 : i32
    %c0_i32_0 = arith.constant 0 : i32
    %c0_i32_1 = arith.constant 0 : i32
    %c0_i32_2 = arith.constant 0 : i32
    return %c0_i32, %c0_i32_0, %c0_i32_1 : i32, i32, i32
  }
  func.func @transform_6(%arg0: i32) -> (i32, i32, i32) {
    %c0_i32 = arith.constant 0 : i32
    %c0_i32_0 = arith.constant 0 : i32
    %c0_i32_1 = arith.constant 0 : i32
    %c0_i32_2 = arith.constant 0 : i32
    return %c0_i32, %c0_i32_0, %c0_i32_1 : i32, i32, i32
  }
  func.func @transform_7(%arg0: i32) -> (i32, i32) {
    %c0_i32 = arith.constant 0 : i32
    %c0_i32_0 = arith.constant 0 : i32
    %c0_i32_1 = arith.constant 0 : i32
    return %c0_i32, %c0_i32_0 : i32, i32
  }
  func.func @transform_8(%arg0: i32) -> (i32, i32) {
    %c0_i32 = arith.constant 0 : i32
    %c0_i32_0 = arith.constant 0 : i32
    %c0_i32_1 = arith.constant 0 : i32
    return %c0_i32, %c0_i32_0 : i32, i32
  }
  func.func @transform_9(%arg0: i32) -> (i32, i32) {
    %c0_i32 = arith.constant 0 : i32
    %c0_i32_0 = arith.constant 0 : i32
    %c0_i32_1 = arith.constant 0 : i32
    return %c0_i32, %c0_i32_0 : i32, i32
  }
  func.func @transform_10(%arg0: i32) -> (i32, i32) {
    %c0_i32 = arith.constant 0 : i32
    %c0_i32_0 = arith.constant 0 : i32
    %c0_i32_1 = arith.constant 0 : i32
    return %c0_i32, %c0_i32_0 : i32, i32
  }
  func.func @transform_11(%arg0: i32) -> (i32, i32) {
    %c0_i32 = arith.constant 0 : i32
    %c0_i32_0 = arith.constant 0 : i32
    %c0_i32_1 = arith.constant 0 : i32
    return %c0_i32, %c0_i32_0 : i32, i32
  }
  func.func @transform_12(%arg0: i32) -> (i32, i32) {
    %c0_i32 = arith.constant 0 : i32
    %c0_i32_0 = arith.constant 0 : i32
    %c0_i32_1 = arith.constant 0 : i32
    return %c0_i32, %c0_i32_0 : i32, i32
  }
  func.func @transform_13(%arg0: i32) -> (i32, i32) {
    %c0_i32 = arith.constant 0 : i32
    %c0_i32_0 = arith.constant 0 : i32
    %c0_i32_1 = arith.constant 0 : i32
    return %c0_i32, %c0_i32_0 : i32, i32
  }
  func.func @transform_14(%arg0: i32) -> (i32, i32, i32) {
    %c0_i32 = arith.constant 0 : i32
    %c0_i32_0 = arith.constant 0 : i32
    %c0_i32_1 = arith.constant 0 : i32
    return %arg0, %c0_i32, %c0_i32_0 : i32, i32, i32
  }
}

</mosaic_0001>

<bundles_post_ra>
// kernel: tpu_custom_call.1
= control target key start
LH: loop header
LB: loop body
LE: loop exit
PB: predicated region body
PF: predicated region fallthrough
CT: control target
= control target key end

     0   :  { %s12244_s0 = inlined_call_operand.vmem [shape: f32[4,32,128], index: 0, kind: input, shape index: {}]   ;;  %s12245_s1 = inlined_call_operand.vmem [shape: f32[1,128], index: 1, kind: input, shape index: {}]   ;;  %s12246_s2 = inlined_call_operand.vmem [shape: f32[1,128], index: 2, kind: input, shape index: {}]   ;;  %s12247_s3 = inlined_call_operand.vmem [shape: bf16[4,128,32], index: 3, kind: input, shape index: {}]   ;;  %s12248_s4 = inlined_call_operand.vmem [shape: bf16[4,128,32], index: 4, kind: input, shape index: {}]   ;;  %s12249_s5 = inlined_call_operand.vmem [shape: bf16[4,128,32], index: 5, kind: input, shape index: {}]   ;;  %s12250_s6 = inlined_call_operand.vmem [shape: bf16[4,32,128], index: 6, kind: input, shape index: {}]   ;;  %s12251_s7 = inlined_call_operand.vmem [shape: f32[1,128], index: 7, kind: input, shape index: {}]   ;;  %s12252_s8 = inlined_call_operand.vmem [shape: f32[1,128], index: 8, kind: input, shape index: {}]   ;;  %s12253_s9 = inlined_call_operand.vmem [shape: f32[1,128], index: 9, kind: input, shape index: {}]   ;;  %s12254_s10 = inlined_call_operand.vmem [shape: bf16[128,512], index: 10, kind: input, shape index: {}]   ;;  %s12255_s11 = inlined_call_operand.vmem [shape: f32[1,512], index: 11, kind: input, shape index: {}]   ;;  %s12256_s12 = inlined_call_operand.vmem [shape: bf16[512,128], index: 12, kind: input, shape index: {}]   ;;  %s12257_s13 = inlined_call_operand.vmem [shape: f32[1,128], index: 13, kind: input, shape index: {}]   ;;  %s12258_s14 = inlined_call_operand.hbm [shape: f32[4,32,128], index: 14, kind: output, shape index: {}]  }
   0x1   :  { %v49_v0 = vld [vmem:[%s12244_s0] sm:$0xff]  ;;  %v51_v1 = vld [vmem:[%s12244_s0 + $0x10] sm:$0xff]  ;;  %v50_v2 = vld [vmem:[%s12244_s0 + $0x8] sm:$0xff] }
   0x2   :  { %67 = vadd.xlane.f32.xlu0 %v49_v0  ;;  %71 = vadd.xlane.f32.xlu1 %v51_v1  ;;  %v52_v3 = vld [vmem:[%s12244_s0 + $0x18] sm:$0xff]  ;;  %v53_v4 = vld [vmem:[%s12244_s0 + $0x20] sm:$0xff]  ;;  %v54_v5 = vld [vmem:[%s12244_s0 + $0x28] sm:$0xff] }
   0x3   :  { %v55_v6 = vld [vmem:[%s12244_s0 + $0x30] sm:$0xff]  ;;  %v56_v7 = vld [vmem:[%s12244_s0 + $0x38] sm:$0xff]  ;;  %v9553_v8 = vld [vmem:[%s12244_s0 + $0x40] sm:$0xff] }
   0x4   :  { %v9558_v9 = vld [vmem:[%s12244_s0 + $0x48] sm:$0xff]  ;;  %v9563_v10 = vld [vmem:[%s12244_s0 + $0x50] sm:$0xff]  ;;  %v9568_v11 = vld [vmem:[%s12244_s0 + $0x58] sm:$0xff] }
   0x5   :  { %v9575_v12 = vld [vmem:[%s12244_s0 + $0x60] sm:$0xff]  ;;  %v9580_v13 = vld [vmem:[%s12244_s0 + $0x68] sm:$0xff]  ;;  %v9587_v14 = vld [vmem:[%s12244_s0 + $0x70] sm:$0xff] }
   0x6   :  { %69 = vadd.xlane.f32.xlu0 %v50_v2  ;;  %73 = vadd.xlane.f32.xlu1 %v52_v3  ;;  %v9592_v15 = vld [vmem:[%s12244_s0 + $0x78] sm:$0xff] }
   0xa   :  { %75 = vadd.xlane.f32.xlu0 %v53_v4  ;;  %77 = vadd.xlane.f32.xlu1 %v54_v5 }
   0xe   :  { %79 = vadd.xlane.f32.xlu0 %v55_v6  ;;  %81 = vadd.xlane.f32.xlu1 %v56_v7 }
  0x12   :  { %83 = vadd.xlane.f32.xlu0 %v9553_v8  ;;  %85 = vadd.xlane.f32.xlu1 %v9558_v9 }
  0x16   :  { %87 = vadd.xlane.f32.xlu0 %v9563_v10  ;;  %89 = vadd.xlane.f32.xlu1 %v9568_v11 }
  0x1a   :  { %91 = vadd.xlane.f32.xlu0 %v9575_v12  ;;  %93 = vadd.xlane.f32.xlu1 %v9580_v13 }
  0x1e   :  { %95 = vadd.xlane.f32.xlu0 %v9587_v14  ;;  %97 = vadd.xlane.f32.xlu1 %v9592_v15 }
  0x1f   :  { %19 = vsyncpa [#allocation3], 0  ;;  %v8777_v51 = vld [vmem:[%s12247_s3 + $0x38] sm:$0xff]   ;;  %v8779_v61 = vld [vmem:[%s12247_s3 + $0x30] sm:$0xff]   ;;  %vm803_vm0 = vcmask 261120  }
  0x20   :  { %v8778_v52 = vld [vmem:[%s12248_s4 + $0x38] sm:$0xff]   ;;  %8021 = vmatprep.subr.bf16.mxu0 %v8777_v51  ;;  %v8780_v62 = vld [vmem:[%s12248_s4 + $0x30] sm:$0xff]  }
  0x21   :  { %8053 = vmatprep.subr.bf16.mxu1 %v8778_v52  ;;  %8022 = vmatpush3.bf16.msra.mxu0 %v8777_v51 }
  0x22   :  { %8054 = vmatpush3.bf16.msra.mxu1 %v8778_v52  ;;  %8023 = vmatprep.subr.bf16.mxu0 %v8779_v61 }
  0x23   :  { %8055 = vmatprep.subr.bf16.mxu1 %v8780_v62 }
  0x25   :  { %8024 = vmatpush3.bf16.msra.mxu0 %v8779_v61 }
  0x26   :  { %8056 = vmatpush3.bf16.msra.mxu1 %v8780_v62 }
  0x8b   :  { %v68_v16 = vpop.xlane.xlu0 %67  ;;  %v72_v17 = vpop.xlane.xlu1 %71 }
  0x8c   :  { %v100_v18 = vmul.f32 0.0078125, %v68_v16  ;;  %v102_v19 = vmul.f32 0.0078125, %v72_v17 }
  0x8e   :  { %v9598_v20 = vsub.f32 %v49_v0, %v100_v18  ;;  %v9600_v21 = vsub.f32 %v51_v1, %v102_v19 }
  0x8f   :  { %v70_v22 = vpop.xlane.xlu0 %69  ;;  %v74_v23 = vpop.xlane.xlu1 %73 }
  0x90   :  { %v101_v24 = vmul.f32 0.0078125, %v70_v22  ;;  %v132_v25 = vmul.f32 %v9598_v20, %v9598_v20  ;;  %v103_v26 = vmul.f32 0.0078125, %v74_v23  ;;  %v134_v27 = vmul.f32 %v9600_v21, %v9600_v21  ;;  %v8783_v23 = vld [vmem:[%s12247_s3 + $0x20] sm:$0xff]  }
  0x92   :  { %148 = vadd.xlane.f32.xlu0 %v132_v25  ;;  %v9606_v28 = vsub.f32 %v50_v2, %v101_v24  ;;  %v9608_v29 = vsub.f32 %v52_v3, %v103_v26 }
  0x93   :  { %v76_v30 = vpop.xlane.xlu0 %75  ;;  %v78_v31 = vpop.xlane.xlu1 %77 }
  0x94   :  { %v104_v32 = vmul.f32 0.0078125, %v76_v30  ;;  %v133_v33 = vmul.f32 %v9606_v28, %v9606_v28  ;;  %v105_v34 = vmul.f32 0.0078125, %v78_v31  ;;  %v135_v35 = vmul.f32 %v9608_v29, %v9608_v29  ;;  %v8786_v30 = vld [vmem:[%s12248_s4 + $0x18] sm:$0xff]   ;;  %v8788_v31 = vld [vmem:[%s12248_s4 + $0x10] sm:$0xff]  }
  0x96   :  { %152 = vadd.xlane.f32.xlu0 %v134_v27  ;;  %150 = vadd.xlane.f32.xlu1 %v133_v33  ;;  %v9614_v36 = vsub.f32 %v53_v4, %v104_v32  ;;  %v9616_v37 = vsub.f32 %v54_v5, %v105_v34  ;;  %v8785_v27 = vld [vmem:[%s12247_s3 + $0x18] sm:$0xff]   ;;  %v8789_v32 = vld [vmem:[%s12247_s3 + $0x8] sm:$0xff]   ;;  %v8791_v34 = vld [vmem:[%s12247_s3] sm:$0xff]  }
  0x97   :  { %v80_v38 = vpop.xlane.xlu0 %79  ;;  %v82_v39 = vpop.xlane.xlu1 %81  ;;  %v8790_v33 = vld [vmem:[%s12248_s4 + $0x8] sm:$0xff]  }
  0x98   :  { %v106_v40 = vmul.f32 0.0078125, %v80_v38  ;;  %v136_v41 = vmul.f32 %v9614_v36, %v9614_v36  ;;  %v107_v42 = vmul.f32 0.0078125, %v82_v39  ;;  %v137_v43 = vmul.f32 %v9616_v37, %v9616_v37  ;;  %v9721_v38 = vld [vmem:[%s12249_s5 + $0x38] sm:$0xff]  }
  0x9a   :  { %154 = vadd.xlane.f32.xlu1 %v135_v35  ;;  %156 = vadd.xlane.f32.xlu0 %v136_v41  ;;  %v9622_v44 = vsub.f32 %v55_v6, %v106_v40  ;;  %v9624_v45 = vsub.f32 %v56_v7, %v107_v42  ;;  %v8781_v7 = vld [vmem:[%s12247_s3 + $0x28] sm:$0xff]   ;;  %v8792_v35 = vld [vmem:[%s12248_s4] sm:$0xff]  }
  0x9b   :  { %v84_v46 = vpop.xlane.xlu0 %83  ;;  %v86_v47 = vpop.xlane.xlu1 %85  ;;  %8025 = vmatprep.subr.bf16.mxu0 %v8781_v7 }
  0x9c   :  { %v108_v48 = vmul.f32 0.0078125, %v84_v46  ;;  %v138_v49 = vmul.f32 %v9622_v44, %v9622_v44  ;;  %v109_v50 = vmul.f32 0.0078125, %v86_v47  ;;  %v139_v53 = vmul.f32 %v9624_v45, %v9624_v45  ;;  %8026 = vmatpush3.bf16.msra.mxu0 %v8781_v7  ;;  %v9727_v7 = vld [vmem:[%s12245_s1] ss:$0 sm:$0xff] }
  0x9d   :  { %8027 = vmatprep.subr.bf16.mxu0 %v8783_v23 }
  0x9e   :  { %158 = vadd.xlane.f32.xlu1 %v137_v43  ;;  %160 = vadd.xlane.f32.xlu0 %v138_v49  ;;  %v9637_v54 = vsub.f32 %v9553_v8, %v108_v48  ;;  %v9640_v55 = vsub.f32 %v9558_v9, %v109_v50  ;;  %v8782_v8 = vld [vmem:[%s12248_s4 + $0x28] sm:$0xff]  }
  0x9f   :  { %v88_v56 = vpop.xlane.xlu0 %87  ;;  %v90_v57 = vpop.xlane.xlu1 %89  ;;  %8057 = vmatprep.subr.bf16.mxu1 %v8782_v8 }
  0xa0   :  { %v110_v58 = vmul.f32 0.0078125, %v88_v56  ;;  %v140_v59 = vmul.f32 %v9637_v54, %v9637_v54  ;;  %v111_v60 = vmul.f32 0.0078125, %v90_v57  ;;  %v141_v63 = vmul.f32 %v9640_v55, %v9640_v55  ;;  %8058 = vmatpush3.bf16.msra.mxu1 %v8782_v8  ;;  %8028 = vmatpush3.bf16.msra.mxu0 %v8783_v23 }
  0xa1   :  { %8029 = vmatprep.subr.bf16.mxu0 %v8785_v27 }
  0xa2   :  { %162 = vadd.xlane.f32.xlu1 %v139_v53  ;;  %164 = vadd.xlane.f32.xlu0 %v140_v59  ;;  %v9653_v0 = vsub.f32 %v9563_v10, %v110_v58  ;;  %v9656_v1 = vsub.f32 %v9568_v11, %v111_v60 }
  0xa3   :  { %v92_v2 = vpop.xlane.xlu0 %91  ;;  %v94_v3 = vpop.xlane.xlu1 %93 }
  0xa4   :  { %v112_v4 = vmul.f32 0.0078125, %v92_v2  ;;  %v142_v5 = vmul.f32 %v9653_v0, %v9653_v0  ;;  %v113_v6 = vmul.f32 0.0078125, %v94_v3  ;;  %v143_v9 = vmul.f32 %v9656_v1, %v9656_v1  ;;  %8030 = vmatpush3.bf16.msra.mxu0 %v8785_v27 }
  0xa6   :  { %166 = vadd.xlane.f32.xlu1 %v141_v63  ;;  %168 = vadd.xlane.f32.xlu0 %v142_v5  ;;  %v9669_v10 = vsub.f32 %v9575_v12, %v112_v4  ;;  %v9672_v11 = vsub.f32 %v9580_v13, %v113_v6  ;;  %v8784_v12 = vld [vmem:[%s12248_s4 + $0x20] sm:$0xff]  }
  0xa7   :  { %v96_v16 = vpop.xlane.xlu0 %95  ;;  %v98_v17 = vpop.xlane.xlu1 %97  ;;  %8059 = vmatprep.subr.bf16.mxu1 %v8784_v12 }
  0xa8   :  { %v114_v18 = vmul.f32 0.0078125, %v96_v16  ;;  %v144_v19 = vmul.f32 %v9669_v10, %v9669_v10  ;;  %v115_v22 = vmul.f32 0.0078125, %v98_v17  ;;  %v145_v13 = vmul.f32 %v9672_v11, %v9672_v11  ;;  %8060 = vmatpush3.bf16.msra.mxu1 %v8784_v12 }
  0xa9   :  { %8061 = vmatprep.subr.bf16.mxu1 %v8786_v30 }
  0xaa   :  { %170 = vadd.xlane.f32.xlu1 %v143_v9  ;;  %172 = vadd.xlane.f32.xlu0 %v144_v19  ;;  %v9685_v24 = vsub.f32 %v9587_v14, %v114_v18  ;;  %v9688_v25 = vsub.f32 %v9592_v15, %v115_v22  ;;  %v8787_v15 = vld [vmem:[%s12247_s3 + $0x10] sm:$0xff]  }
  0xab   :  { %8031 = vmatprep.subr.bf16.mxu0 %v8787_v15 }
  0xac   :  { %v146_v26 = vmul.f32 %v9685_v24, %v9685_v24  ;;  %v147_v14 = vmul.f32 %v9688_v25, %v9688_v25  ;;  %8062 = vmatpush3.bf16.msra.mxu1 %v8786_v30  ;;  %8032 = vmatpush3.bf16.msra.mxu0 %v8787_v15 }
  0xad   :  { %8063 = vmatprep.subr.bf16.mxu1 %v8788_v31  ;;  %8033 = vmatprep.subr.bf16.mxu0 %v8789_v32 }
  0xae   :  { %174 = vadd.xlane.f32.xlu1 %v145_v13  ;;  %176 = vadd.xlane.f32.xlu0 %v146_v26  ;;  %v9734_v26 = vld [vmem:[%s12246_s2] ss:$0 sm:$0xff] }
  0xb0   :  { %8064 = vmatpush3.bf16.msra.mxu1 %v8788_v31  ;;  %8034 = vmatpush3.bf16.msra.mxu0 %v8789_v32 }
  0xb1   :  { %8065 = vmatprep.subr.bf16.mxu1 %v8790_v33  ;;  %8035 = vmatprep.subr.bf16.mxu0 %v8791_v34 }
  0xb2   :  { %178 = vadd.xlane.f32.xlu1 %v147_v14 }
  0xb4   :  { %8066 = vmatpush3.bf16.msra.mxu1 %v8790_v33  ;;  %8036 = vmatpush3.bf16.msra.mxu0 %v8791_v34 }
  0xb5   :  { %8067 = vmatprep.subr.bf16.mxu1 %v8792_v35  ;;  %8085 = vmatprep.subr.bf16.mxu0 %v9721_v38 }
  0xb8   :  { %8068 = vmatpush3.bf16.msra.mxu1 %v8792_v35 }
 0x11b   :  { %v149_v39 = vpop.xlane.xlu0 %148 }
 0x11c   :  { %v180_v40 = vmul.f32 0.0078125, %v149_v39 }
 0x11e   :  { %v196_v41 = vadd.f32 1e-05, %v180_v40 }
 0x11f   :  { %v151_v42 = vpop.xlane.xlu1 %150  ;;  %v153_v43 = vpop.xlane.xlu0 %152 }
 0x120   :  { %8961 = vrsqrt.f32 %v196_v41  ;;  %v181_v46 = vmul.f32 0.0078125, %v151_v42  ;;  %v182_v47 = vmul.f32 0.0078125, %v153_v43 }
 0x122   :  { %v197_v48 = vadd.f32 1e-05, %v181_v46  ;;  %v198_v49 = vadd.f32 1e-05, %v182_v47 }
 0x123   :  { %v155_v50 = vpop.xlane.xlu1 %154  ;;  %v157_v51 = vpop.xlane.xlu0 %156 }
 0x124   :  { %8963 = vrsqrt.f32 %v197_v48  ;;  %v183_v52 = vmul.f32 0.0078125, %v155_v50  ;;  %v184_v53 = vmul.f32 0.0078125, %v157_v51 }
 0x125   :  { %8965 = vrsqrt.f32 %v198_v49 }
 0x126   :  { %v199_v56 = vadd.f32 1e-05, %v183_v52  ;;  %v200_v57 = vadd.f32 1e-05, %v184_v53 }
 0x127   :  { %v159_v58 = vpop.xlane.xlu1 %158  ;;  %v161_v59 = vpop.xlane.xlu0 %160 }
 0x128   :  { %8967 = vrsqrt.f32 %v199_v56  ;;  %v185_v60 = vmul.f32 0.0078125, %v159_v58  ;;  %v186_v61 = vmul.f32 0.0078125, %v161_v59 }
 0x129   :  { %8969 = vrsqrt.f32 %v200_v57 }
 0x12a   :  { %v201_v62 = vadd.f32 1e-05, %v185_v60  ;;  %v202_v63 = vadd.f32 1e-05, %v186_v61 }
 0x12b   :  { %v163_v2 = vpop.xlane.xlu1 %162  ;;  %v165_v3 = vpop.xlane.xlu0 %164 }
 0x12c   :  { %8971 = vrsqrt.f32 %v201_v62  ;;  %v187_v4 = vmul.f32 0.0078125, %v163_v2  ;;  %v188_v5 = vmul.f32 0.0078125, %v165_v3 }
 0x12d   :  { %v8962_v6 = vpop.eup %8961  ;;  %8973 = vrsqrt.f32 %v202_v63 }
 0x12e   :  { %v228_v8 = vmul.f32 %v8962_v6, %v9598_v20  ;;  %v203_v9 = vadd.f32 1e-05, %v187_v4  ;;  %v204_v16 = vadd.f32 1e-05, %v188_v5  ;;  %v8794_v4 = vld [vmem:[%s12249_s5 + $0x30] sm:$0xff]  }
 0x12f   :  { %v167_v17 = vpop.xlane.xlu1 %166  ;;  %v169_v18 = vpop.xlane.xlu0 %168 }
 0x130   :  { %8975 = vrsqrt.f32 %v203_v9  ;;  %v189_v19 = vmul.f32 0.0078125, %v167_v17  ;;  %v190_v22 = vmul.f32 0.0078125, %v169_v18  ;;  %v250_v12 = vmul.f32 %v9727_v7, %v228_v8 }
 0x131   :  { %v8964_v23 = vpop.eup %8963  ;;  %8977 = vrsqrt.f32 %v204_v16 }
 0x132   :  { %v8966_v13 = vpop.eup %8965  ;;  %v229_v27 = vmul.f32 %v8964_v23, %v9606_v28  ;;  %v205_v20 = vadd.f32 1e-05, %v189_v19  ;;  %v206_v30 = vadd.f32 1e-05, %v190_v22  ;;  %v272_v39 = vadd.f32 %v9734_v26, %v250_v12  ;;  %v8795_v22 = vld [vmem:[%s12249_s5 + $0x28] sm:$0xff]  }
 0x133   :  { %v230_v14 = vmul.f32 %v8966_v13, %v9600_v21  ;;  %v171_v15 = vpop.xlane.xlu1 %170  ;;  %v173_v31 = vpop.xlane.xlu0 %172 }
 0x134   :  { %v251_v32 = vmul.f32 %v9727_v7, %v229_v27  ;;  %8979 = vrsqrt.f32 %v205_v20  ;;  %v191_v33 = vmul.f32 0.0078125, %v171_v15  ;;  %v192_v34 = vmul.f32 0.0078125, %v173_v31 }
 0x135   :  { %v8968_v35 = vpop.eup %8967  ;;  %v252_v40 = vmul.f32 %v9727_v7, %v230_v14  ;;  %8981 = vrsqrt.f32 %v206_v30  ;;  %v8796_v14 = vld [vmem:[%s12249_s5 + $0x20] sm:$0xff]  }
 0x136   :  { %v8970_v41 = vpop.eup %8969  ;;  %v273_v28 = vadd.f32 %v9734_v26, %v251_v32  ;;  %v231_v42 = vmul.f32 %v8968_v35, %v9608_v29  ;;  %v207_v43 = vadd.f32 1e-05, %v191_v33  ;;  %v208_v21 = vadd.f32 1e-05, %v192_v34 }
 0x137   :  { %v232_v46 = vmul.f32 %v8970_v41, %v9614_v36  ;;  %v175_v47 = vpop.xlane.xlu1 %174  ;;  %v177_v48 = vpop.xlane.xlu0 %176  ;;  %v274_v29 = vadd.f32 %v9734_v26, %v252_v40  ;;  %v8797_v40 = vld [vmem:[%s12249_s5 + $0x18] sm:$0xff]  }
 0x138   :  { %v9744_v49 = vpack.c.bf16 %v273_v28, %v272_v39  ;;  %v253_v50 = vmul.f32 %v9727_v7, %v231_v42  ;;  %8983 = vrsqrt.f32 %v207_v43  ;;  %v193_v51 = vmul.f32 0.0078125, %v175_v47 }
 0x139   :  { %v8972_v52 = vpop.eup %8971  ;;  %v254_v53 = vmul.f32 %v9727_v7, %v232_v46  ;;  %8985 = vrsqrt.f32 %v208_v21  ;;  %v194_v56 = vmul.f32 0.0078125, %v177_v48  ;;  %v8798_v48 = vld [vmem:[%s12249_s5 + $0x10] sm:$0xff]  }
 0x13a   :  { %v8974_v57 = vpop.eup %8973  ;;  %v275_v58 = vadd.f32 %v9734_v26, %v253_v50  ;;  %v233_v36 = vmul.f32 %v8972_v52, %v9616_v37  ;;  %v209_v59 = vadd.f32 1e-05, %v193_v51  ;;  %8037 = vmatprep.mubr.bf16.mxu0 %v9744_v49  ;;  %8069 = vmatprep.mubr.bf16.mxu1 %v9744_v49 }
 0x13b   :  { %v234_v60 = vmul.f32 %v8974_v57, %v9622_v44  ;;  %v210_v61 = vadd.f32 1e-05, %v194_v56  ;;  %v179_v62 = vpop.xlane.xlu1 %178  ;;  %v276_v5 = vadd.f32 %v9734_v26, %v254_v53  ;;  %v8799_v57 = vld [vmem:[%s12249_s5 + $0x8] sm:$0xff]  }
 0x13c   :  { %v9754_v63 = vpack.c.bf16 %v275_v58, %v274_v29  ;;  %v255_v2 = vmul.f32 %v9727_v7, %v233_v36  ;;  %8987 = vrsqrt.f32 %v209_v59  ;;  %v195_v3 = vmul.f32 0.0078125, %v179_v62 }
 0x13d   :  { %v8976_v37 = vpop.eup %8975  ;;  %8989 = vrsqrt.f32 %v210_v61  ;;  %v256_v44 = vmul.f32 %v9727_v7, %v234_v60 }
 0x13e   :  { %v8978_v6 = vpop.eup %8977  ;;  %v277_v8 = vadd.f32 %v9734_v26, %v255_v2  ;;  %v235_v9 = vmul.f32 %v8976_v37, %v9624_v45  ;;  %v211_v16 = vadd.f32 1e-05, %v195_v3  ;;  %8038 = vmatmul.mubr.bf16.vlgmr.msra.gmra.mxu0 %v9754_v63  ;;  %8070 = vmatmul.mubr.bf16.vlgmr.msra.gmra.mxu1 %v9754_v63 }
 0x13f   :  { %v236_v17 = vmul.f32 %v8978_v6, %v9637_v54  ;;  %8086 = vmatpush3.bf16.msra.mxu0 %v9721_v38  ;;  %v278_v13 = vadd.f32 %v9734_v26, %v256_v44 }
 0x140   :  { %v9768_v18 = vpack.c.bf16 %v277_v8, %v276_v5  ;;  %v257_v19 = vmul.f32 %v9727_v7, %v235_v9  ;;  %8991 = vrsqrt.f32 %v211_v16  ;;  %8087 = vmatprep.subr.bf16.mxu0 %v8794_v4 }
 0x141   :  { %v8980_v45 = vpop.eup %8979  ;;  %v258_v23 = vmul.f32 %v9727_v7, %v236_v17 }
 0x142   :  { %v8982_v12 = vpop.eup %8981  ;;  %v279_v54 = vadd.f32 %v9734_v26, %v257_v19  ;;  %v237_v38 = vmul.f32 %v8980_v45, %v9640_v55  ;;  %8041 = vmatprep.mubr.bf16.mxu0 %v9768_v18  ;;  %8073 = vmatprep.mubr.bf16.mxu1 %v9768_v18 }
 0x143   :  { %v238_v27 = vmul.f32 %v8982_v12, %v9653_v0  ;;  %8088 = vmatpush3.bf16.msra.mxu0 %v8794_v4  ;;  %v280_v31 = vadd.f32 %v9734_v26, %v258_v23 }
 0x144   :  { %v9781_v20 = vpack.c.bf16 %v279_v54, %v278_v13  ;;  %v259_v30 = vmul.f32 %v9727_v7, %v237_v38  ;;  %8089 = vmatprep.subr.bf16.mxu0 %v8795_v22 }
 0x145   :  { %v8984_v15 = vpop.eup %8983  ;;  %v260_v33 = vmul.f32 %v9727_v7, %v238_v27 }
 0x146   :  { %v8986_v55 = vpop.eup %8985  ;;  %v281_v32 = vadd.f32 %v9734_v26, %v259_v30  ;;  %v239_v0 = vmul.f32 %v8984_v15, %v9656_v1  ;;  %8042 = vmatmul.mubr.bf16.gmra.mxu0 %v9781_v20  ;;  %8074 = vmatmul.mubr.bf16.gmra.mxu1 %v9781_v20 }
 0x147   :  { %v240_v34 = vmul.f32 %v8986_v55, %v9669_v10  ;;  %8090 = vmatpush3.bf16.msra.mxu0 %v8795_v22  ;;  %v282_v42 = vadd.f32 %v9734_v26, %v260_v33 }
 0x148   :  { %v9794_v35 = vpack.c.bf16 %v281_v32, %v280_v31  ;;  %v261_v39 = vmul.f32 %v9727_v7, %v239_v0  ;;  %8091 = vmatprep.subr.bf16.mxu0 %v8796_v14 }
 0x149   :  { %v8988_v41 = vpop.eup %8987  ;;  %v262_v28 = vmul.f32 %v9727_v7, %v240_v34 }
 0x14a   :  { %v8990_v1 = vpop.eup %8989  ;;  %v283_v43 = vadd.f32 %v9734_v26, %v261_v39  ;;  %v241_v10 = vmul.f32 %v8988_v41, %v9672_v11  ;;  %8045 = vmatprep.mubr.bf16.mxu0 %v9794_v35  ;;  %8077 = vmatprep.mubr.bf16.mxu1 %v9794_v35 }
 0x14b   :  { %v242_v21 = vmul.f32 %v8990_v1, %v9685_v24  ;;  %8092 = vmatpush3.bf16.msra.mxu0 %v8796_v14  ;;  %v284_v51 = vadd.f32 %v9734_v26, %v262_v28 }
 0x14c   :  { %v9807_v46 = vpack.c.bf16 %v283_v43, %v282_v42  ;;  %v263_v47 = vmul.f32 %v9727_v7, %v241_v10  ;;  %8093 = vmatprep.subr.bf16.mxu0 %v8797_v40 }
 0x14d   :  { %v8992_v50 = vpop.eup %8991  ;;  %v264_v52 = vmul.f32 %v9727_v7, %v242_v21 }
 0x14e   :  { %v285_v11 = vadd.f32 %v9734_v26, %v263_v47  ;;  %v243_v53 = vmul.f32 %v8992_v50, %v9688_v25  ;;  %8046 = vmatmul.mubr.bf16.gmra.mxu0 %v9807_v46  ;;  %8078 = vmatmul.mubr.bf16.gmra.mxu1 %v9807_v46 }
 0x14f   :  { %8094 = vmatpush3.bf16.msra.mxu0 %v8797_v40  ;;  %v286_v29 = vadd.f32 %v9734_v26, %v264_v52 }
 0x150   :  { %v9819_v24 = vpack.c.bf16 %v285_v11, %v284_v51  ;;  %v265_v56 = vmul.f32 %v9727_v7, %v243_v53  ;;  %8095 = vmatprep.subr.bf16.mxu0 %v8798_v48  ;;  %v8800_v7 = vld [vmem:[%s12249_s5] sm:$0xff]  }
 0x152   :  { %v287_v58 = vadd.f32 %v9734_v26, %v265_v56  ;;  %8049 = vmatprep.mubr.bf16.mxu0 %v9819_v24  ;;  %8081 = vmatprep.mubr.bf16.mxu1 %v9819_v24 }
 0x153   :  { %8096 = vmatpush3.bf16.msra.mxu0 %v8798_v48 }
 0x154   :  { %v9829_v25 = vpack.c.bf16 %v287_v58, %v286_v29  ;;  %8097 = vmatprep.subr.bf16.mxu0 %v8799_v57 }
 0x156   :  { %8050 = vmatmul.mubr.bf16.gmra.mxu0 %v9829_v25  ;;  %8082 = vmatmul.mubr.bf16.gmra.mxu1 %v9829_v25 }
 0x157   :  { %8098 = vmatpush3.bf16.msra.mxu0 %v8799_v57  ;;  %8101 = vmatprep.mubr.bf16.mxu0 %v9744_v49 }
 0x158   :  { %8099 = vmatprep.subr.bf16.mxu0 %v8800_v7 }
 0x15b   :  { %8100 = vmatpush3.bf16.msra.mxu0 %v8800_v7 }
 0x15e   :  { %8102 = vmatmul.mubr.bf16.vlgmr.msra.gmra.mxu0 %v9754_v63 }
 0x15f   :  { %8105 = vmatprep.mubr.bf16.mxu0 %v9768_v18 }
 0x166   :  { %8106 = vmatmul.mubr.bf16.gmra.mxu0 %v9781_v20 }
 0x167   :  { %8109 = vmatprep.mubr.bf16.mxu0 %v9794_v35 }
 0x16e   :  { %8110 = vmatmul.mubr.bf16.gmra.mxu0 %v9807_v46 }
 0x16f   :  { %8113 = vmatprep.mubr.bf16.mxu0 %v9819_v24 }
 0x176   :  { %8114 = vmatmul.mubr.bf16.gmra.mxu0 %v9829_v25 }
 0x1fe   :  { %v8039_v26 = vpop.f32.mrf.mxu0  ;;  %v8071_v36 = vpop.f32.mrf.mxu1 }
 0x200   :  { %v394_v59 = vpop.f32.mrf.mxu0  ;;  %v555_v60 = vpop.f32.mrf.mxu1 }
 0x202   :  { %v8040_v61 = vpop.f32.mrf.mxu0  ;;  %v8072_v62 = vpop.f32.mrf.mxu1 }
 0x203   :  { %v788_v2 = vpack.c.bf16 %v8072_v62, %v8071_v36  ;;  %v780_v15 = vpack.c.bf16 %v8040_v61, %v8039_v26 }
 0x204   :  { %v397_v3 = vpop.f32.mrf.mxu0  ;;  %v558_v4 = vpop.f32.mrf.mxu1 }
 0x205   :  { %v814_v37 = vsel %vm803_vm0, %v788_v2, 0  ;;  %v779_v5 = vpack.c.bf16 %v397_v3, %v394_v59  ;;  %v787_v6 = vpack.c.bf16 %v558_v4, %v555_v60  ;;  %8741 = vmatprep.subr.msk.bf16.mxu1 %vm803_vm0, %v788_v2 }
 0x206   :  { %v9846_v8 = vpop.f32.mrf.mxu0  ;;  %v8075_v44 = vpop.f32.mrf.mxu1  ;;  %8118 = vmatpush3.bf16.xpose.msra.mxu1 %v814_v37 }
 0x207   :  { %8742 = vmatprep.subr.msk.bf16.mxu1 %vm803_vm0, %v787_v6  ;;  %8121 = vmatprep.mubr.msk.bf16.mxu1 %vm803_vm0, %v779_v5  ;;  %v811_v12 = vsel %vm803_vm0, %v787_v6, 0 }
 0x208   :  { %v410_v9 = vpop.f32.mrf.mxu0  ;;  %v571_v16 = vpop.f32.mrf.mxu1 }
 0x20a   :  { %v8044_v17 = vpop.f32.mrf.mxu0  ;;  %v8076_v19 = vpop.f32.mrf.mxu1 }
 0x20b   :  { %v790_v23 = vpack.c.bf16 %v8076_v19, %v8075_v44  ;;  %v782_v56 = vpack.c.bf16 %v8044_v17, %v9846_v8 }
 0x20c   :  { %v413_v22 = vpop.f32.mrf.mxu0  ;;  %v574_v45 = vpop.f32.mrf.mxu1 }
 0x20d   :  { %v875_v55 = vsel %vm803_vm0, %v790_v23, 0  ;;  %v781_v32 = vpack.c.bf16 %v413_v22, %v410_v9  ;;  %v789_v34 = vpack.c.bf16 %v574_v45, %v571_v16 }
 0x20e   :  { %v8047_v13 = vpop.f32.mrf.mxu0  ;;  %v8079_v54 = vpop.f32.mrf.mxu1  ;;  %8120 = vmatpush3.bf16.xpose.msra.mxu1 %v811_v12 }
 0x20f   :  { %8743 = vmatprep.subr.msk.bf16.mxu1 %vm803_vm0, %v790_v23  ;;  %v872_v50 = vsel %vm803_vm0, %v789_v34, 0 }
 0x210   :  { %v426_v38 = vpop.f32.mrf.mxu0  ;;  %v587_v27 = vpop.f32.mrf.mxu1 }
 0x212   :  { %v8048_v30 = vpop.f32.mrf.mxu0  ;;  %v8080_v14 = vpop.f32.mrf.mxu1 }
 0x213   :  { %v792_v31 = vpack.c.bf16 %v8080_v14, %v8079_v54  ;;  %v784_v58 = vpack.c.bf16 %v8048_v30, %v8047_v13 }
 0x214   :  { %v429_v33 = vpop.f32.mrf.mxu0  ;;  %v590_v0 = vpop.f32.mrf.mxu1 }
 0x215   :  { %v936_v39 = vsel %vm803_vm0, %v792_v31, 0  ;;  %v783_v40 = vpack.c.bf16 %v429_v33, %v426_v38  ;;  %v791_v41 = vpack.c.bf16 %v590_v0, %v587_v27  ;;  %8122 = vmatmul.mubr.msk.bf16.vlgmr.msra.gmra.mxu1 %vm803_vm0, %v780_v15  ;;  %8745 = vmatprep.subr.msk.bf16.mxu0 %vm803_vm0, %v792_v31 }
 0x216   :  { %v8051_v28 = vpop.f32.mrf.mxu0  ;;  %v8083_v1 = vpop.f32.mrf.mxu1  ;;  %8126 = vmatpush3.bf16.xpose.msra.mxu1 %v875_v55  ;;  %8129 = vmatprep.mubr.msk.bf16.mxu1 %vm803_vm0, %v781_v32 }
 0x217   :  { %8134 = vmatpush3.bf16.xpose.msra.mxu0 %v936_v39  ;;  %8744 = vmatprep.subr.msk.bf16.mxu1 %vm803_vm0, %v789_v34  ;;  %v933_v11 = vsel %vm803_vm0, %v791_v41, 0 }
 0x218   :  { %8746 = vmatprep.subr.msk.bf16.mxu0 %vm803_vm0, %v791_v41  ;;  %8137 = vmatprep.mubr.msk.bf16.mxu0 %vm803_vm0, %v783_v40  ;;  %v442_v42 = vpop.f32.mrf.mxu0  ;;  %v603_v43 = vpop.f32.mrf.mxu1 }
 0x21a   :  { %v8052_v10 = vpop.f32.mrf.mxu0  ;;  %v8084_v21 = vpop.f32.mrf.mxu1 }
 0x21b   :  { %v794_v48 = vpack.c.bf16 %v8084_v21, %v8083_v1  ;;  %v786_v44 = vpack.c.bf16 %v8052_v10, %v8051_v28 }
 0x21c   :  { %v445_v47 = vpop.f32.mrf.mxu0  ;;  %v606_v57 = vpop.f32.mrf.mxu1 }
 0x21d   :  { %v997_v26 = vsel %vm803_vm0, %v794_v48, 0  ;;  %v785_v36 = vpack.c.bf16 %v445_v47, %v442_v42  ;;  %v793_v60 = vpack.c.bf16 %v606_v57, %v603_v43 }
 0x21e   :  { %v8103_v51 = vpop.f32.mrf.mxu0  ;;  %8128 = vmatpush3.bf16.xpose.msra.mxu1 %v872_v50 }
 0x21f   :  { %8136 = vmatpush3.bf16.xpose.msra.mxu0 %v933_v11  ;;  %8747 = vmatprep.subr.msk.bf16.mxu1 %vm803_vm0, %v794_v48  ;;  %v994_v37 = vsel %vm803_vm0, %v793_v60, 0 }
 0x220   :  { %v716_v52 = vpop.f32.mrf.mxu0 }
 0x222   :  { %v8104_v53 = vpop.f32.mrf.mxu0 }
 0x223   :  { %v796_v29 = vpack.c.bf16 %v8104_v53, %v8103_v51 }
 0x224   :  { %v719_v7 = vpop.f32.mrf.mxu0 }
 0x225   :  { %v795_v59 = vpack.c.bf16 %v719_v7, %v716_v52  ;;  %8130 = vmatmul.mubr.msk.bf16.vlgmr.msra.gmra.mxu1 %vm803_vm0, %v782_v56  ;;  %8149 = vmatprep.subr.bf16.mxu0 %v796_v29 }
 0x226   :  { %8138 = vmatmul.mubr.msk.bf16.vlgmr.msra.gmra.mxu0 %vm803_vm0, %v784_v58  ;;  %v8107_v61 = vpop.f32.mrf.mxu0  ;;  %8142 = vmatpush3.bf16.xpose.msra.mxu1 %v997_v26 }
 0x227   :  { %8145 = vmatprep.mubr.msk.bf16.mxu1 %vm803_vm0, %v785_v36  ;;  %8150 = vmatpush3.bf16.msra.mxu0 %v796_v29 }
 0x228   :  { %8748 = vmatprep.subr.msk.bf16.mxu1 %vm803_vm0, %v793_v60  ;;  %8151 = vmatprep.subr.bf16.mxu0 %v795_v59  ;;  %v732_v62 = vpop.f32.mrf.mxu0 }
 0x22a   :  { %v8108_v2 = vpop.f32.mrf.mxu0 }
 0x22b   :  { %8152 = vmatpush3.bf16.msra.mxu0 %v795_v59  ;;  %v798_v4 = vpack.c.bf16 %v8108_v2, %v8107_v61 }
 0x22c   :  { %v735_v3 = vpop.f32.mrf.mxu0 }
 0x22d   :  { %v797_v17 = vpack.c.bf16 %v735_v3, %v732_v62 }
 0x22e   :  { %v8111_v5 = vpop.f32.mrf.mxu0  ;;  %8144 = vmatpush3.bf16.xpose.msra.mxu1 %v994_v37 }
 0x22f   :  { %8157 = vmatprep.subr.bf16.mxu1 %v798_v4 }
 0x230   :  { %v9870_v6 = vpop.f32.mrf.mxu0 }
 0x232   :  { %v8112_v8 = vpop.f32.mrf.mxu0 }
 0x233   :  { %v9872_v9 = vpack.c.bf16 %v8112_v8, %v8111_v5 }
 0x234   :  { %v9874_v16 = vpop.f32.mrf.mxu0 }
 0x235   :  { %8146 = vmatmul.mubr.msk.bf16.vlgmr.msra.gmra.mxu1 %vm803_vm0, %v786_v44  ;;  %8165 = vmatprep.subr.bf16.mxu0 %v9872_v9 }
 0x236   :  { %v8115_v19 = vpop.f32.mrf.mxu0  ;;  %8158 = vmatpush3.bf16.msra.mxu1 %v798_v4 }
 0x237   :  { %8159 = vmatprep.subr.bf16.mxu1 %v797_v17 }
 0x238   :  { %v9878_v22 = vpop.f32.mrf.mxu0 }
 0x23a   :  { %v8116_v45 = vpop.f32.mrf.mxu0  ;;  %8160 = vmatpush3.bf16.msra.mxu1 %v797_v17 }
 0x23b   :  { %v9880_v23 = vpack.c.bf16 %v8116_v45, %v8115_v19 }
 0x23c   :  { %v9896_v40 = vpop.f32.mrf.mxu0 }
 0x23d   :  { %8173 = vmatprep.subr.bf16.mxu1 %v9880_v23 }
 0x2d5   :  { %v9883_v12 = vpop.f32.mrf.mxu1 }
 0x2d6   :  { %v1054_v48 = vsel %vm803_vm0, %v9883_v12, -inf }
 0x2d7   :  { %v9885_v13 = vpop.f32.mrf.mxu1 }
 0x2d8   :  { %v1048_v10 = vsel %vm803_vm0, %v9885_v13, -inf }
 0x2d9   :  { %v9887_v54 = vpop.f32.mrf.mxu1 }
 0x2da   :  { %v1057_v11 = vsel %vm803_vm0, %v9887_v54, -inf }
 0x2db   :  { %v9889_v38 = vpop.f32.mrf.mxu1 }
 0x2dc   :  { %v1051_v50 = vsel %vm803_vm0, %v9889_v38, -inf }
 0x2e5   :  { %v8131_v27 = vpop.f32.mrf.mxu1 }
 0x2e6   :  { %v1066_v30 = vsel %vm803_vm0, %v8131_v27, -inf  ;;  %v9900_v42 = vpop.f32.mrf.mxu0 }
 0x2e7   :  { %1067 = vmax.xlane.f32.xlu0 %v1066_v30  ;;  %v911_v14 = vpop.f32.mrf.mxu1  ;;  %v1078_v56 = vsel %vm803_vm0, %v9900_v42, -inf }
 0x2e8   :  { %v1060_v31 = vsel %vm803_vm0, %v911_v14, -inf  ;;  %v9908_v47 = vpop.f32.mrf.mxu0 }
 0x2e9   :  { %v8132_v15 = vpop.f32.mrf.mxu1  ;;  %v1072_v52 = vsel %vm803_vm0, %v9908_v47, -inf }
 0x2ea   :  { %v1069_v55 = vsel %vm803_vm0, %v8132_v15, -inf  ;;  %v9914_v51 = vpop.f32.mrf.mxu0 }
 0x2eb   :  { %1061 = vmax.xlane.f32.xlu0 %v1060_v31  ;;  %1070 = vmax.xlane.f32.xlu1 %v1069_v55  ;;  %v914_v32 = vpop.f32.mrf.mxu1  ;;  %v1081_v29 = vsel %vm803_vm0, %v9914_v51, -inf }
 0x2ec   :  { %v1063_v33 = vsel %vm803_vm0, %v914_v32, -inf  ;;  %v9920_v53 = vpop.f32.mrf.mxu0 }
 0x2ed   :  { %v1075_v57 = vsel %vm803_vm0, %v9920_v53, -inf }
 0x2ef   :  { %1064 = vmax.xlane.f32.xlu1 %v1063_v33 }
 0x2f5   :  { %v8147_v0 = vpop.f32.mrf.mxu1 }
 0x2f6   :  { %v1090_v34 = vsel %vm803_vm0, %v8147_v0, -inf }
 0x2f7   :  { %1091 = vmax.xlane.f32.xlu0 %v1090_v34  ;;  %v1033_v39 = vpop.f32.mrf.mxu1 }
 0x2f8   :  { %v1084_v28 = vsel %vm803_vm0, %v1033_v39, -inf }
 0x2f9   :  { %v8148_v41 = vpop.f32.mrf.mxu1 }
 0x2fa   :  { %v1093_v1 = vsel %vm803_vm0, %v8148_v41, -inf }
 0x2fb   :  { %1085 = vmax.xlane.f32.xlu0 %v1084_v28  ;;  %1094 = vmax.xlane.f32.xlu1 %v1093_v1  ;;  %v9902_v43 = vpop.f32.mrf.mxu1 }
 0x2fc   :  { %v1087_v21 = vsel %vm803_vm0, %v9902_v43, -inf }
 0x2ff   :  { %1049 = vmax.xlane.f32.xlu0 %v1048_v10  ;;  %1088 = vmax.xlane.f32.xlu1 %v1087_v21 }
 0x303   :  { %1055 = vmax.xlane.f32.xlu0 %v1054_v48  ;;  %1052 = vmax.xlane.f32.xlu1 %v1051_v50 }
 0x307   :  { %1058 = vmax.xlane.f32.xlu1 %v1057_v11  ;;  %1073 = vmax.xlane.f32.xlu0 %v1072_v52 }
 0x30b   :  { %1079 = vmax.xlane.f32.xlu0 %v1078_v56  ;;  %1076 = vmax.xlane.f32.xlu1 %v1075_v57 }
 0x30f   :  { %1082 = vmax.xlane.f32.xlu1 %v1081_v29 }
 0x370   :  { %v1068_v58 = vpop.xlane.xlu0 %1067 }
 0x371   :  { %v1102_v7 = vsub.f32 %v8131_v27, %v1068_v58 }
 0x373   :  { %v1124_v26 = vmul.f32 1.442695, %v1102_v7 }
 0x374   :  { %v1062_v36 = vpop.xlane.xlu0 %1061  ;;  %v1071_v59 = vpop.xlane.xlu1 %1070 }
 0x375   :  { %8993 = vpow2.f32 %v1124_v26  ;;  %v1100_v60 = vsub.f32 %v911_v14, %v1062_v36  ;;  %v1103_v61 = vsub.f32 %v8132_v15, %v1071_v59 }
 0x377   :  { %v1120_v62 = vmul.f32 1.442695, %v1100_v60  ;;  %v1126_v2 = vmul.f32 1.442695, %v1103_v61 }
 0x378   :  { %v1065_v3 = vpop.xlane.xlu1 %1064 }
 0x379   :  { %8995 = vpow2.f32 %v1120_v62  ;;  %v1101_v4 = vsub.f32 %v914_v32, %v1065_v3 }
 0x37a   :  { %8997 = vpow2.f32 %v1126_v2 }
 0x37b   :  { %v1122_v37 = vmul.f32 1.442695, %v1101_v4 }
 0x37d   :  { %8999 = vpow2.f32 %v1122_v37 }
 0x380   :  { %v1092_v5 = vpop.xlane.xlu0 %1091 }
 0x381   :  { %v1110_v8 = vsub.f32 %v8147_v0, %v1092_v5 }
 0x382   :  { %v9928_v44 = vpop.eup %8993 }
 0x383   :  { %v1140_v17 = vmul.f32 1.442695, %v1110_v8  ;;  %v1162_v19 = vsel %vm803_vm0, %v9928_v44, 0.0 }
 0x384   :  { %v1086_v45 = vpop.xlane.xlu0 %1085  ;;  %v1095_v27 = vpop.xlane.xlu1 %1094  ;;  %1163 = vadd.xlane.f32.xlu0 %v1162_v19 }
 0x385   :  { %9001 = vpow2.f32 %v1140_v17  ;;  %v1108_v30 = vsub.f32 %v1033_v39, %v1086_v45  ;;  %v1111_v14 = vsub.f32 %v8148_v41, %v1095_v27 }
 0x386   :  { %v9932_v15 = vpop.eup %8995 }
 0x387   :  { %v9934_v31 = vpop.eup %8997  ;;  %v1136_v55 = vmul.f32 1.442695, %v1108_v30  ;;  %v1142_v32 = vmul.f32 1.442695, %v1111_v14  ;;  %v1156_v33 = vsel %vm803_vm0, %v9932_v15, 0.0 }
 0x388   :  { %v1050_v0 = vpop.xlane.xlu0 %1049  ;;  %v1089_v34 = vpop.xlane.xlu1 %1088  ;;  %1157 = vadd.xlane.f32.xlu0 %v1156_v33  ;;  %v1165_v28 = vsel %vm803_vm0, %v9934_v31, 0.0 }
 0x389   :  { %9003 = vpow2.f32 %v1136_v55  ;;  %v1096_v1 = vsub.f32 %v9885_v13, %v1050_v0  ;;  %v1109_v39 = vsub.f32 %v9902_v43, %v1089_v34  ;;  %1166 = vadd.xlane.f32.xlu1 %v1165_v28 }
 0x38a   :  { %v9942_v41 = vpop.eup %8999  ;;  %9005 = vpow2.f32 %v1142_v32 }
 0x38b   :  { %v1112_v10 = vmul.f32 1.442695, %v1096_v1  ;;  %v1138_v21 = vmul.f32 1.442695, %v1109_v39  ;;  %v1159_v48 = vsel %vm803_vm0, %v9942_v41, 0.0 }
 0x38c   :  { %v1056_v50 = vpop.xlane.xlu0 %1055  ;;  %v1053_v11 = vpop.xlane.xlu1 %1052 }
 0x38d   :  { %9007 = vpow2.f32 %v1112_v10  ;;  %v1098_v52 = vsub.f32 %v9883_v12, %v1056_v50  ;;  %v1097_v56 = vsub.f32 %v9889_v38, %v1053_v11  ;;  %1160 = vadd.xlane.f32.xlu1 %v1159_v48 }
 0x38e   :  { %9009 = vpow2.f32 %v1138_v21 }
 0x38f   :  { %v1116_v13 = vmul.f32 1.442695, %v1098_v52  ;;  %v1114_v43 = vmul.f32 1.442695, %v1097_v56 }
 0x390   :  { %v1059_v57 = vpop.xlane.xlu1 %1058  ;;  %v1074_v29 = vpop.xlane.xlu0 %1073 }
 0x391   :  { %9011 = vpow2.f32 %v1116_v13  ;;  %v1099_v58 = vsub.f32 %v9887_v54, %v1059_v57  ;;  %v1104_v7 = vsub.f32 %v9908_v47, %v1074_v29 }
 0x392   :  { %v9950_v26 = vpop.eup %9001  ;;  %9013 = vpow2.f32 %v1114_v43 }
 0x393   :  { %v1118_v36 = vmul.f32 1.442695, %v1099_v58  ;;  %v1128_v59 = vmul.f32 1.442695, %v1104_v7  ;;  %v1186_v12 = vsel %vm803_vm0, %v9950_v26, 0.0 }
 0x394   :  { %1187 = vadd.xlane.f32.xlu0 %v1186_v12  ;;  %v1080_v38 = vpop.xlane.xlu0 %1079  ;;  %v1077_v60 = vpop.xlane.xlu1 %1076 }
 0x395   :  { %9015 = vpow2.f32 %v1118_v36  ;;  %v1106_v61 = vsub.f32 %v9900_v42, %v1080_v38  ;;  %v1105_v62 = vsub.f32 %v9920_v53, %v1077_v60 }
 0x396   :  { %v9956_v2 = vpop.eup %9003  ;;  %9017 = vpow2.f32 %v1128_v59 }
 0x397   :  { %v9958_v54 = vpop.eup %9005  ;;  %v1132_v47 = vmul.f32 1.442695, %v1106_v61  ;;  %v1130_v3 = vmul.f32 1.442695, %v1105_v62  ;;  %v1180_v4 = vsel %vm803_vm0, %v9956_v2, 0.0 }
 0x398   :  { %1181 = vadd.xlane.f32.xlu0 %v1180_v4  ;;  %v1189_v37 = vsel %vm803_vm0, %v9958_v54, 0.0  ;;  %v1083_v5 = vpop.xlane.xlu1 %1082 }
 0x399   :  { %9019 = vpow2.f32 %v1132_v47  ;;  %1190 = vadd.xlane.f32.xlu1 %v1189_v37  ;;  %v1107_v42 = vsub.f32 %v9914_v51, %v1083_v5 }
 0x39a   :  { %v9965_v53 = vpop.eup %9007  ;;  %9021 = vpow2.f32 %v1130_v3 }
 0x39b   :  { %v9967_v8 = vpop.eup %9009  ;;  %v1134_v17 = vmul.f32 1.442695, %v1107_v42  ;;  %v1144_v19 = vsel %vm803_vm0, %v9965_v53, 0.0 }
 0x39c   :  { %1145 = vadd.xlane.f32.xlu0 %v1144_v19  ;;  %v1183_v45 = vsel %vm803_vm0, %v9967_v8, 0.0 }
 0x39d   :  { %9023 = vpow2.f32 %v1134_v17  ;;  %1184 = vadd.xlane.f32.xlu1 %v1183_v45 }
 0x39e   :  { %v9973_v27 = vpop.eup %9011 }
 0x39f   :  { %v9975_v30 = vpop.eup %9013  ;;  %v1150_v51 = vsel %vm803_vm0, %v9973_v27, 0.0 }
 0x3a0   :  { %1151 = vadd.xlane.f32.xlu0 %v1150_v51  ;;  %v1147_v14 = vsel %vm803_vm0, %v9975_v30, 0.0 }
 0x3a1   :  { %1148 = vadd.xlane.f32.xlu1 %v1147_v14 }
 0x3a2   :  { %v9981_v55 = vpop.eup %9015 }
 0x3a3   :  { %v9983_v32 = vpop.eup %9017  ;;  %v1153_v33 = vsel %vm803_vm0, %v9981_v55, 0.0 }
 0x3a4   :  { %v1168_v0 = vsel %vm803_vm0, %v9983_v32, 0.0 }
 0x3a5   :  { %1169 = vadd.xlane.f32.xlu0 %v1168_v0  ;;  %1154 = vadd.xlane.f32.xlu1 %v1153_v33 }
 0x3a6   :  { %v9989_v34 = vpop.eup %9019 }
 0x3a7   :  { %v9991_v28 = vpop.eup %9021  ;;  %v1174_v1 = vsel %vm803_vm0, %v9989_v34, 0.0 }
 0x3a8   :  { %v1171_v39 = vsel %vm803_vm0, %v9991_v28, 0.0 }
 0x3a9   :  { %1175 = vadd.xlane.f32.xlu0 %v1174_v1  ;;  %1172 = vadd.xlane.f32.xlu1 %v1171_v39 }
 0x3aa   :  { %v9997_v10 = vpop.eup %9023 }
 0x3ab   :  { %v1177_v21 = vsel %vm803_vm0, %v9997_v10, 0.0 }
 0x3ad   :  { %1178 = vadd.xlane.f32.xlu1 %v1177_v21  ;;  %v8802_v21 = vld [vmem:[%s12248_s4 + $0x70] sm:$0xff]  }
 0x40d   :  { %v1164_v48 = vpop.xlane.xlu0 %1163 }
 0x411   :  { %v1158_v50 = vpop.xlane.xlu0 %1157 }
 0x412   :  { %v1167_v11 = vpop.xlane.xlu1 %1166 }
 0x413   :  { %9025 = vrcp.f32 %v1167_v11 }
 0x414   :  { %9027 = vrcp.f32 %v1158_v50 }
 0x415   :  { %9029 = vrcp.f32 %v1164_v48  ;;  %v8803_v48 = vld [vmem:[%s12248_s4 + $0x68] sm:$0xff]  }
 0x416   :  { %v1161_v52 = vpop.xlane.xlu1 %1160 }
 0x417   :  { %9031 = vrcp.f32 %v1161_v52 }
 0x41d   :  { %v1188_v56 = vpop.xlane.xlu0 %1187 }
 0x420   :  { %v9026_v13 = vpop.eup %9025 }
 0x421   :  { %v1182_v43 = vpop.xlane.xlu0 %1181  ;;  %v9028_v57 = vpop.eup %9027  ;;  %v1215_v36 = vmul.f32 %v9026_v13, %v9934_v31  ;;  %v801_v31 = vpack.c.bf16 %v9896_v40, %v9878_v22 }
 0x422   :  { %v1191_v29 = vpop.xlane.xlu1 %1190  ;;  %v9030_v58 = vpop.eup %9029  ;;  %v1212_v12 = vmul.f32 %v9028_v57, %v9932_v15  ;;  %v799_v57 = vpack.c.bf16 %v9874_v16, %v9870_v6  ;;  %v8806_v6 = vld [vmem:[%s12248_s4 + $0x58] sm:$0xff]  }
 0x423   :  { %9033 = vrcp.f32 %v1191_v29  ;;  %v1214_v61 = vmul.f32 %v9030_v58, %v9928_v44  ;;  %v8801_v44 = vld [vmem:[%s12248_s4 + $0x78] sm:$0xff]  }
 0x424   :  { %v9032_v7 = vpop.eup %9031  ;;  %9035 = vrcp.f32 %v1182_v43 }
 0x425   :  { %v1146_v59 = vpop.xlane.xlu0 %1145  ;;  %v1213_v38 = vmul.f32 %v9032_v7, %v9942_v41  ;;  %9037 = vrcp.f32 %v1188_v56  ;;  %v1227_v47 = vpack.c.bf16 %v1215_v36, %v1214_v61  ;;  %v8804_v56 = vld [vmem:[%s12248_s4 + $0x60] sm:$0xff]   ;;  %v8805_v7 = vld [vmem:[%s12247_s3 + $0x78] sm:$0xff]   ;;  %v8808_v36 = vld [vmem:[%s12248_s4 + $0x50] sm:$0xff]  }
 0x426   :  { %v1185_v60 = vpop.xlane.xlu1 %1184  ;;  %v8815_v61 = vld [vmem:[%s12247_s3 + $0x48] sm:$0xff]  }
 0x427   :  { %9039 = vrcp.f32 %v1185_v60  ;;  %v1226_v62 = vpack.c.bf16 %v1213_v38, %v1212_v12  ;;  %v8812_v12 = vld [vmem:[%s12248_s4 + $0x40] sm:$0xff]   ;;  %v8813_v38 = vld [vmem:[%s12247_s3 + $0x58] sm:$0xff]   ;;  %v8814_v60 = vld [vmem:[%s12247_s3 + $0x50] sm:$0xff]  }
 0x428   :  { %9041 = vrcp.f32 %v1146_v59  ;;  %v8811_v59 = vld [vmem:[%s12247_s3 + $0x60] sm:$0xff]  }
 0x429   :  { %8161 = vmatprep.mubr.msk.bf16.mxu1 %vm803_vm0, %v1226_v62  ;;  %v1152_v3 = vpop.xlane.xlu0 %1151  ;;  %v8816_v62 = vld [vmem:[%s12247_s3 + $0x40] sm:$0xff]  }
 0x42a   :  { %8162 = vmatmul.mubr.msk.bf16.vlgmr.msra.gmra.mxu1 %vm803_vm0, %v1227_v47  ;;  %v1149_v4 = vpop.xlane.xlu1 %1148  ;;  %v8817_v47 = vld [vmem:[%s12249_s5 + $0x78] sm:$0xff]  }
 0x42b   :  { %8174 = vmatpush3.bf16.msra.mxu1 %v9880_v23  ;;  %9043 = vrcp.f32 %v1149_v4  ;;  %v8820_v4 = vld [vmem:[%s12249_s5 + $0x60] sm:$0xff]  }
 0x42c   :  { %8175 = vmatprep.subr.bf16.mxu1 %v801_v31  ;;  %9045 = vrcp.f32 %v1152_v3  ;;  %v8818_v3 = vld [vmem:[%s12249_s5 + $0x70] sm:$0xff]  }
 0x42e   :  { %v1170_v15 = vpop.xlane.xlu0 %1169  ;;  %v1155_v41 = vpop.xlane.xlu1 %1154 }
 0x42f   :  { %8176 = vmatpush3.bf16.msra.mxu1 %v801_v31  ;;  %9047 = vrcp.f32 %v1155_v41  ;;  %v8819_v31 = vld [vmem:[%s12249_s5 + $0x68] sm:$0xff]  }
 0x430   :  { %8213 = vmatprep.subr.bf16.mxu1 %v8801_v44  ;;  %v9034_v37 = vpop.eup %9033  ;;  %9049 = vrcp.f32 %v1170_v15  ;;  %v8822_v15 = vld [vmem:[%s12249_s5 + $0x50] sm:$0xff]   ;;  %v8823_v41 = vld [vmem:[%s12249_s5 + $0x48] sm:$0xff]  }
 0x431   :  { %v9036_v5 = vpop.eup %9035  ;;  %v1223_v23 = vmul.f32 %v9034_v37, %v9958_v54  ;;  %v8824_v37 = vld [vmem:[%s12249_s5 + $0x40] sm:$0xff]  }
 0x432   :  { %v1176_v22 = vpop.xlane.xlu0 %1175  ;;  %v1173_v40 = vpop.xlane.xlu1 %1172  ;;  %v1220_v19 = vmul.f32 %v9036_v5, %v9956_v2 }
 0x433   :  { %v9038_v42 = vpop.eup %9037  ;;  %9051 = vrcp.f32 %v1173_v40 }
 0x434   :  { %v9040_v17 = vpop.eup %9039  ;;  %9053 = vrcp.f32 %v1176_v22  ;;  %v1222_v33 = vmul.f32 %v9038_v42, %v9950_v26 }
 0x435   :  { %v1221_v45 = vmul.f32 %v9040_v17, %v9967_v8  ;;  %v9042_v51 = vpop.eup %9041 }
 0x436   :  { %v1179_v14 = vpop.xlane.xlu1 %1178  ;;  %v1231_v39 = vpack.c.bf16 %v1223_v23, %v1222_v33  ;;  %v1208_v54 = vmul.f32 %v9042_v51, %v9965_v53 }
 0x437   :  { %9055 = vrcp.f32 %v1179_v14  ;;  %v1230_v0 = vpack.c.bf16 %v1221_v45, %v1220_v19 }
 0x438   :  { %v9044_v1 = vpop.eup %9043 }
 0x439   :  { %8177 = vmatprep.mubr.msk.bf16.mxu1 %vm803_vm0, %v1230_v0  ;;  %v1209_v2 = vmul.f32 %v9044_v1, %v9975_v30  ;;  %v9046_v8 = vpop.eup %9045 }
 0x43a   :  { %8178 = vmatmul.mubr.msk.bf16.vlgmr.msra.gmra.mxu1 %vm803_vm0, %v1231_v39  ;;  %v1210_v11 = vmul.f32 %v9046_v8, %v9973_v27 }
 0x43b   :  { %8214 = vmatpush3.bf16.msra.mxu1 %v8801_v44  ;;  %8229 = vmatprep.mubr.bf16.mxu1 %v9744_v49  ;;  %v1224_v26 = vpack.c.bf16 %v1209_v2, %v1208_v54  ;;  %v8821_v44 = vld [vmem:[%s12249_s5 + $0x58] sm:$0xff]  }
 0x43c   :  { %8215 = vmatprep.subr.bf16.mxu1 %v8802_v21  ;;  %v9048_v50 = vpop.eup %9047 }
 0x43d   :  { %8153 = vmatprep.mubr.msk.bf16.mxu0 %vm803_vm0, %v1224_v26  ;;  %v1211_v53 = vmul.f32 %v9048_v50, %v9981_v55  ;;  %v9050_v30 = vpop.eup %9049 }
 0x43e   :  { %v1216_v29 = vmul.f32 %v9050_v30, %v9983_v32 }
 0x43f   :  { %8216 = vmatpush3.bf16.msra.mxu1 %v8802_v21  ;;  %v1225_v52 = vpack.c.bf16 %v1211_v53, %v1210_v11 }
 0x440   :  { %8217 = vmatprep.subr.bf16.mxu1 %v8803_v48  ;;  %v9052_v13 = vpop.eup %9051 }
 0x441   :  { %v9054_v43 = vpop.eup %9053  ;;  %8154 = vmatmul.mubr.msk.bf16.vlgmr.msra.gmra.mxu0 %vm803_vm0, %v1225_v52  ;;  %v1217_v27 = vmul.f32 %v9052_v13, %v9991_v28  ;;  %v8807_v28 = vld [vmem:[%s12247_s3 + $0x70] sm:$0xff]  }
 0x442   :  { %8166 = vmatpush3.bf16.msra.mxu0 %v9872_v9  ;;  %v1218_v16 = vmul.f32 %v9054_v43, %v9989_v34  ;;  %v8809_v34 = vld [vmem:[%s12247_s3 + $0x68] sm:$0xff]  }
 0x443   :  { %8218 = vmatpush3.bf16.msra.mxu1 %v8803_v48  ;;  %8167 = vmatprep.subr.bf16.mxu0 %v799_v57  ;;  %v1228_v58 = vpack.c.bf16 %v1217_v27, %v1216_v29 }
 0x444   :  { %v9056_v55 = vpop.eup %9055  ;;  %8219 = vmatprep.subr.bf16.mxu1 %v8804_v56 }
 0x445   :  { %v1219_v32 = vmul.f32 %v9056_v55, %v9997_v10  ;;  %8169 = vmatprep.mubr.msk.bf16.mxu0 %vm803_vm0, %v1228_v58  ;;  %v8810_v10 = vld [vmem:[%s12248_s4 + $0x48] sm:$0xff]  }
 0x446   :  { %8168 = vmatpush3.bf16.msra.mxu0 %v799_v57 }
 0x447   :  { %8220 = vmatpush3.bf16.msra.mxu1 %v8804_v56  ;;  %v1229_v9 = vpack.c.bf16 %v1219_v32, %v1218_v16  ;;  %8181 = vmatprep.subr.bf16.mxu0 %v8805_v7 }
 0x448   :  { %8221 = vmatprep.subr.bf16.mxu1 %v8806_v6 }
 0x449   :  { %8170 = vmatmul.mubr.msk.bf16.vlgmr.msra.gmra.mxu0 %vm803_vm0, %v1229_v9 }
 0x44a   :  { %8182 = vmatpush3.bf16.msra.mxu0 %v8805_v7  ;;  %8197 = vmatprep.mubr.bf16.mxu0 %v9744_v49 }
 0x44b   :  { %8222 = vmatpush3.bf16.msra.mxu1 %v8806_v6  ;;  %8183 = vmatprep.subr.bf16.mxu0 %v8807_v28 }
 0x44c   :  { %8223 = vmatprep.subr.bf16.mxu1 %v8808_v36 }
 0x44e   :  { %8184 = vmatpush3.bf16.msra.mxu0 %v8807_v28 }
 0x44f   :  { %8224 = vmatpush3.bf16.msra.mxu1 %v8808_v36  ;;  %8185 = vmatprep.subr.bf16.mxu0 %v8809_v34 }
 0x450   :  { %8225 = vmatprep.subr.bf16.mxu1 %v8810_v10 }
 0x452   :  { %8186 = vmatpush3.bf16.msra.mxu0 %v8809_v34 }
 0x453   :  { %8226 = vmatpush3.bf16.msra.mxu1 %v8810_v10  ;;  %8187 = vmatprep.subr.bf16.mxu0 %v8811_v59 }
 0x454   :  { %8227 = vmatprep.subr.bf16.mxu1 %v8812_v12 }
 0x456   :  { %8188 = vmatpush3.bf16.msra.mxu0 %v8811_v59 }
 0x457   :  { %8228 = vmatpush3.bf16.msra.mxu1 %v8812_v12  ;;  %8189 = vmatprep.subr.bf16.mxu0 %v8813_v38 }
 0x45a   :  { %8190 = vmatpush3.bf16.msra.mxu0 %v8813_v38  ;;  %8230 = vmatmul.mubr.bf16.vlgmr.msra.gmra.mxu1 %v9754_v63 }
 0x45b   :  { %8233 = vmatprep.mubr.bf16.mxu1 %v9768_v18  ;;  %8191 = vmatprep.subr.bf16.mxu0 %v8814_v60 }
 0x45e   :  { %8192 = vmatpush3.bf16.msra.mxu0 %v8814_v60 }
 0x45f   :  { %8193 = vmatprep.subr.bf16.mxu0 %v8815_v61 }
 0x462   :  { %8194 = vmatpush3.bf16.msra.mxu0 %v8815_v61  ;;  %8234 = vmatmul.mubr.bf16.gmra.mxu1 %v9781_v20 }
 0x463   :  { %8237 = vmatprep.mubr.bf16.mxu1 %v9794_v35  ;;  %8195 = vmatprep.subr.bf16.mxu0 %v8816_v62 }
 0x466   :  { %8196 = vmatpush3.bf16.msra.mxu0 %v8816_v62 }
 0x467   :  { %8245 = vmatprep.subr.bf16.mxu0 %v8817_v47 }
 0x469   :  { %8198 = vmatmul.mubr.bf16.vlgmr.msra.gmra.mxu0 %v9754_v63 }
 0x46a   :  { %8201 = vmatprep.mubr.bf16.mxu0 %v9768_v18  ;;  %8238 = vmatmul.mubr.bf16.gmra.mxu1 %v9807_v46 }
 0x46b   :  { %8246 = vmatpush3.bf16.msra.mxu0 %v8817_v47  ;;  %8241 = vmatprep.mubr.bf16.mxu1 %v9819_v24 }
 0x46c   :  { %8247 = vmatprep.subr.bf16.mxu0 %v8818_v3 }
 0x46f   :  { %8248 = vmatpush3.bf16.msra.mxu0 %v8818_v3 }
 0x470   :  { %8249 = vmatprep.subr.bf16.mxu0 %v8819_v31 }
 0x471   :  { %8202 = vmatmul.mubr.bf16.gmra.mxu0 %v9781_v20 }
 0x472   :  { %8205 = vmatprep.mubr.bf16.mxu0 %v9794_v35  ;;  %8242 = vmatmul.mubr.bf16.gmra.mxu1 %v9829_v25 }
 0x473   :  { %8250 = vmatpush3.bf16.msra.mxu0 %v8819_v31 }
 0x474   :  { %8251 = vmatprep.subr.bf16.mxu0 %v8820_v4 }
 0x477   :  { %8252 = vmatpush3.bf16.msra.mxu0 %v8820_v4 }
 0x478   :  { %8253 = vmatprep.subr.bf16.mxu0 %v8821_v44 }
 0x479   :  { %8206 = vmatmul.mubr.bf16.gmra.mxu0 %v9807_v46 }
 0x47a   :  { %8209 = vmatprep.mubr.bf16.mxu0 %v9819_v24 }
 0x47b   :  { %8254 = vmatpush3.bf16.msra.mxu0 %v8821_v44 }
 0x47c   :  { %8255 = vmatprep.subr.bf16.mxu0 %v8822_v15 }
 0x47f   :  { %8256 = vmatpush3.bf16.msra.mxu0 %v8822_v15 }
 0x480   :  { %8257 = vmatprep.subr.bf16.mxu0 %v8823_v41 }
 0x481   :  { %8210 = vmatmul.mubr.bf16.gmra.mxu0 %v9829_v25 }
 0x482   :  { %8261 = vmatprep.mubr.bf16.mxu0 %v9744_v49 }
 0x483   :  { %8258 = vmatpush3.bf16.msra.mxu0 %v8823_v41 }
 0x484   :  { %8259 = vmatprep.subr.bf16.mxu0 %v8824_v37 }
 0x487   :  { %8260 = vmatpush3.bf16.msra.mxu0 %v8824_v37 }
 0x48a   :  { %8262 = vmatmul.mubr.bf16.vlgmr.msra.gmra.mxu0 %v9754_v63 }
 0x48b   :  { %8265 = vmatprep.mubr.bf16.mxu0 %v9768_v18 }
 0x492   :  { %8266 = vmatmul.mubr.bf16.gmra.mxu0 %v9781_v20 }
 0x493   :  { %8269 = vmatprep.mubr.bf16.mxu0 %v9794_v35 }
 0x49a   :  { %8270 = vmatmul.mubr.bf16.gmra.mxu0 %v9807_v46 }
 0x49b   :  { %8273 = vmatprep.mubr.bf16.mxu0 %v9819_v24 }
 0x4a2   :  { %8274 = vmatmul.mubr.bf16.gmra.mxu0 %v9829_v25 }
 0x4ea   :  { %v10127_v5 = vpop.f32.mrf.mxu1 }
 0x4ec   :  { %v10129_v22 = vpop.f32.mrf.mxu1 }
 0x4ee   :  { %v10131_v40 = vpop.f32.mrf.mxu1 }
 0x4ef   :  { %v1455_v42 = vpack.c.bf16 %v10131_v40, %v10127_v5  ;;  %v8833_v40 = vld [vmem:[%s12248_s4 + $0x88] sm:$0xff]  }
 0x4f0   :  { %v10135_v17 = vpop.f32.mrf.mxu1 }
 0x4fa   :  { %v10137_v23 = vpop.f32.mrf.mxu1 }
 0x4fc   :  { %v10139_v19 = vpop.f32.mrf.mxu1 }
 0x4fe   :  { %v10141_v45 = vpop.f32.mrf.mxu1 }
 0x500   :  { %v10163_v26 = vpop.f32.mrf.mxu1 }
 0x501   :  { %v10145_v14 = vpop.f32.mrf.mxu0 }
 0x503   :  { %v10147_v33 = vpop.f32.mrf.mxu0 }
 0x505   :  { %v10149_v0 = vpop.f32.mrf.mxu0 }
 0x506   :  { %v1453_v1 = vpack.c.bf16 %v10149_v0, %v10145_v14  ;;  %v8832_v14 = vld [vmem:[%s12248_s4 + $0x90] sm:$0xff]   ;;  %v1458_v0 = vpack.c.bf16 %v10163_v26, %v10139_v19  ;;  %v12271_v19 = vpack.c.bf16 %v10141_v45, %v10137_v23  ;;  %v8837_v23 = vld [vmem:[%s12247_s3 + $0xb8] sm:$0xff]  }
 0x507   :  { %v10153_v39 = vpop.f32.mrf.mxu0 }
 0x509   :  { %v10155_v21 = vpop.f32.mrf.mxu0 }
 0x50b   :  { %v10157_v54 = vpop.f32.mrf.mxu0 }
 0x50d   :  { %v10159_v2 = vpop.f32.mrf.mxu0 }
 0x50e   :  { %v12270_v5 = vpack.c.bf16 %v10159_v2, %v10155_v21  ;;  %v8836_v21 = vld [vmem:[%s12250_s6 + $0x10] sm:$0xff]  }
 0x50f   :  { %v10168_v29 = vpop.f32.mrf.mxu0 }
 0x51a   :  { %v8231_v48 = vpop.f32.mrf.mxu1 }
 0x51c   :  { %v1725_v50 = vpop.f32.mrf.mxu1 }
 0x51e   :  { %v8232_v11 = vpop.f32.mrf.mxu1 }
 0x51f   :  { %v1959_v53 = vpack.c.bf16 %v8232_v11, %v8231_v48 }
 0x520   :  { %v1728_v30 = vpop.f32.mrf.mxu1 }
 0x521   :  { %v1984_v52 = vsel %vm803_vm0, %v1959_v53, 0  ;;  %v1958_v56 = vpack.c.bf16 %v1728_v30, %v1725_v50  ;;  %8749 = vmatprep.subr.msk.bf16.mxu1 %vm803_vm0, %v1959_v53 }
 0x522   :  { %v8235_v13 = vpop.f32.mrf.mxu1  ;;  %8278 = vmatpush3.bf16.xpose.msra.mxu1 %v1984_v52 }
 0x523   :  { %8750 = vmatprep.subr.msk.bf16.mxu1 %vm803_vm0, %v1958_v56  ;;  %v1981_v7 = vsel %vm803_vm0, %v1958_v56, 0 }
 0x524   :  { %v1741_v43 = vpop.f32.mrf.mxu1 }
 0x526   :  { %v8236_v57 = vpop.f32.mrf.mxu1 }
 0x527   :  { %v1961_v55 = vpack.c.bf16 %v8236_v57, %v8235_v13 }
 0x528   :  { %v1744_v27 = vpop.f32.mrf.mxu1 }
 0x529   :  { %v8199_v58 = vpop.f32.mrf.mxu0  ;;  %v2045_v47 = vsel %vm803_vm0, %v1961_v55, 0  ;;  %v1960_v3 = vpack.c.bf16 %v1744_v27, %v1741_v43 }
 0x52a   :  { %v8239_v6 = vpop.f32.mrf.mxu1  ;;  %8280 = vmatpush3.bf16.xpose.msra.mxu1 %v1981_v7 }
 0x52b   :  { %v1563_v16 = vpop.f32.mrf.mxu0  ;;  %8751 = vmatprep.subr.msk.bf16.mxu1 %vm803_vm0, %v1961_v55  ;;  %v2042_v30 = vsel %vm803_vm0, %v1960_v3, 0 }
 0x52c   :  { %v1757_v32 = vpop.f32.mrf.mxu1 }
 0x52d   :  { %v8200_v9 = vpop.f32.mrf.mxu0 }
 0x52e   :  { %v8240_v28 = vpop.f32.mrf.mxu1  ;;  %v1951_v12 = vpack.c.bf16 %v8200_v9, %v8199_v58 }
 0x52f   :  { %v1963_v36 = vpack.c.bf16 %v8240_v28, %v8239_v6  ;;  %v1566_v34 = vpop.f32.mrf.mxu0 }
 0x530   :  { %v1950_v10 = vpack.c.bf16 %v1566_v34, %v1563_v16  ;;  %v1760_v59 = vpop.f32.mrf.mxu1 }
 0x531   :  { %v2106_v38 = vsel %vm803_vm0, %v1963_v36, 0  ;;  %v1962_v60 = vpack.c.bf16 %v1760_v59, %v1757_v32  ;;  %v8203_v61 = vpop.f32.mrf.mxu0  ;;  %8753 = vmatprep.subr.msk.bf16.mxu0 %vm803_vm0, %v1963_v36 }
 0x532   :  { %v8243_v62 = vpop.f32.mrf.mxu1  ;;  %8281 = vmatprep.mubr.msk.bf16.mxu1 %vm803_vm0, %v1950_v10  ;;  %8294 = vmatpush3.bf16.xpose.msra.mxu0 %v2106_v38 }
 0x533   :  { %v1579_v31 = vpop.f32.mrf.mxu0  ;;  %8282 = vmatmul.mubr.msk.bf16.vlgmr.msra.gmra.mxu1 %vm803_vm0, %v1951_v12  ;;  %8754 = vmatprep.subr.msk.bf16.mxu0 %vm803_vm0, %v1962_v60  ;;  %v2103_v50 = vsel %vm803_vm0, %v1962_v60, 0 }
 0x534   :  { %8286 = vmatpush3.bf16.xpose.msra.mxu1 %v2045_v47  ;;  %v1773_v4 = vpop.f32.mrf.mxu1 }
 0x535   :  { %8752 = vmatprep.subr.msk.bf16.mxu1 %vm803_vm0, %v1960_v3  ;;  %v8204_v44 = vpop.f32.mrf.mxu0 }
 0x536   :  { %v8244_v41 = vpop.f32.mrf.mxu1  ;;  %v1953_v57 = vpack.c.bf16 %v8204_v44, %v8203_v61 }
 0x537   :  { %v1582_v15 = vpop.f32.mrf.mxu0  ;;  %v1965_v11 = vpack.c.bf16 %v8244_v41, %v8243_v62 }
 0x538   :  { %v1952_v37 = vpack.c.bf16 %v1582_v15, %v1579_v31  ;;  %v1776_v13 = vpop.f32.mrf.mxu1 }
 0x539   :  { %v8207_v48 = vpop.f32.mrf.mxu0  ;;  %v2167_v58 = vsel %vm803_vm0, %v1965_v11, 0  ;;  %v1964_v7 = vpack.c.bf16 %v1776_v13, %v1773_v4 }
 0x53a   :  { %8289 = vmatprep.mubr.msk.bf16.mxu1 %vm803_vm0, %v1952_v37  ;;  %8296 = vmatpush3.bf16.xpose.msra.mxu0 %v2103_v50 }
 0x53b   :  { %v1595_v53 = vpop.f32.mrf.mxu0  ;;  %v2164_v36 = vsel %vm803_vm0, %v1964_v7, 0 }
 0x53c   :  { %8288 = vmatpush3.bf16.xpose.msra.mxu1 %v2042_v30 }
 0x53d   :  { %8755 = vmatprep.subr.msk.bf16.mxu1 %vm803_vm0, %v1965_v11  ;;  %v8208_v52 = vpop.f32.mrf.mxu0 }
 0x53e   :  { %v1955_v27 = vpack.c.bf16 %v8208_v52, %v8207_v48 }
 0x53f   :  { %v1598_v56 = vpop.f32.mrf.mxu0 }
 0x540   :  { %v1954_v43 = vpack.c.bf16 %v1598_v56, %v1595_v53 }
 0x541   :  { %v8211_v55 = vpop.f32.mrf.mxu0 }
 0x542   :  { %8297 = vmatprep.mubr.msk.bf16.mxu0 %vm803_vm0, %v1954_v43 }
 0x543   :  { %8290 = vmatmul.mubr.msk.bf16.vlgmr.msra.gmra.mxu1 %vm803_vm0, %v1953_v57  ;;  %v1611_v6 = vpop.f32.mrf.mxu0  ;;  %8298 = vmatmul.mubr.msk.bf16.vlgmr.msra.gmra.mxu0 %vm803_vm0, %v1955_v27 }
 0x544   :  { %8302 = vmatpush3.bf16.xpose.msra.mxu1 %v2167_v58 }
 0x545   :  { %8756 = vmatprep.subr.msk.bf16.mxu1 %vm803_vm0, %v1964_v7  ;;  %v8212_v16 = vpop.f32.mrf.mxu0 }
 0x546   :  { %v1957_v38 = vpack.c.bf16 %v8212_v16, %v8211_v55 }
 0x547   :  { %v1614_v32 = vpop.f32.mrf.mxu0 }
 0x548   :  { %v1956_v9 = vpack.c.bf16 %v1614_v32, %v1611_v6 }
 0x54a   :  { %v8263_v28 = vpop.f32.mrf.mxu0  ;;  %8305 = vmatprep.mubr.msk.bf16.mxu1 %vm803_vm0, %v1956_v9 }
 0x54c   :  { %v1887_v34 = vpop.f32.mrf.mxu0  ;;  %8304 = vmatpush3.bf16.xpose.msra.mxu1 %v2164_v36 }
 0x54e   :  { %v8264_v10 = vpop.f32.mrf.mxu0 }
 0x54f   :  { %v1967_v59 = vpack.c.bf16 %v8264_v10, %v8263_v28 }
 0x550   :  { %v1890_v12 = vpop.f32.mrf.mxu0 }
 0x551   :  { %v1966_v60 = vpack.c.bf16 %v1890_v12, %v1887_v34  ;;  %8309 = vmatprep.subr.bf16.mxu0 %v1967_v59 }
 0x552   :  { %v8267_v61 = vpop.f32.mrf.mxu0  ;;  %8310 = vmatpush3.bf16.msra.mxu0 %v1967_v59 }
 0x553   :  { %8306 = vmatmul.mubr.msk.bf16.vlgmr.msra.gmra.mxu1 %vm803_vm0, %v1957_v38  ;;  %8311 = vmatprep.subr.bf16.mxu0 %v1966_v60 }
 0x554   :  { %v1903_v62 = vpop.f32.mrf.mxu0 }
 0x556   :  { %v8268_v47 = vpop.f32.mrf.mxu0  ;;  %8312 = vmatpush3.bf16.msra.mxu0 %v1966_v60 }
 0x557   :  { %v1969_v3 = vpack.c.bf16 %v8268_v47, %v8267_v61 }
 0x558   :  { %v1906_v31 = vpop.f32.mrf.mxu0 }
 0x559   :  { %v1968_v4 = vpack.c.bf16 %v1906_v31, %v1903_v62  ;;  %8317 = vmatprep.subr.bf16.mxu1 %v1969_v3 }
 0x55a   :  { %v8271_v44 = vpop.f32.mrf.mxu0  ;;  %8318 = vmatpush3.bf16.msra.mxu1 %v1969_v3 }
 0x55b   :  { %8319 = vmatprep.subr.bf16.mxu1 %v1968_v4 }
 0x55c   :  { %v10191_v15 = vpop.f32.mrf.mxu0 }
 0x55e   :  { %v8272_v41 = vpop.f32.mrf.mxu0  ;;  %8320 = vmatpush3.bf16.msra.mxu1 %v1968_v4 }
 0x55f   :  { %v10193_v37 = vpack.c.bf16 %v8272_v41, %v8271_v44 }
 0x560   :  { %v10195_v48 = vpop.f32.mrf.mxu0 }
 0x561   :  { %8325 = vmatprep.subr.bf16.mxu0 %v10193_v37 }
 0x562   :  { %v8275_v50 = vpop.f32.mrf.mxu0 }
 0x564   :  { %v10198_v11 = vpop.f32.mrf.mxu0 }
 0x566   :  { %v8276_v53 = vpop.f32.mrf.mxu0 }
 0x567   :  { %v10200_v30 = vpack.c.bf16 %v8276_v53, %v8275_v50 }
 0x568   :  { %v10207_v7 = vpop.f32.mrf.mxu0 }
 0x569   :  { %8333 = vmatprep.subr.bf16.mxu1 %v10200_v30 }
 0x5f3   :  { %v8283_v52 = vpop.f32.mrf.mxu1 }
 0x5f4   :  { %v2224_v27 = vsel %vm803_vm0, %v8283_v52, -inf }
 0x5f5   :  { %v2020_v56 = vpop.f32.mrf.mxu1 }
 0x5f6   :  { %v2218_v13 = vsel %vm803_vm0, %v2020_v56, -inf }
 0x5f7   :  { %2219 = vmax.xlane.f32.xlu0 %v2218_v13  ;;  %v8284_v43 = vpop.f32.mrf.mxu1 }
 0x5f8   :  { %v2227_v58 = vsel %vm803_vm0, %v8284_v43, -inf }
 0x5f9   :  { %v2023_v57 = vpop.f32.mrf.mxu1 }
 0x5fa   :  { %v2221_v55 = vsel %vm803_vm0, %v2023_v57, -inf }
 0x5fb   :  { %2225 = vmax.xlane.f32.xlu0 %v2224_v27  ;;  %2222 = vmax.xlane.f32.xlu1 %v2221_v55 }
 0x5ff   :  { %2228 = vmax.xlane.f32.xlu1 %v2227_v58 }
 0x603   :  { %v10209_v6 = vpop.f32.mrf.mxu1  ;;  %v10211_v16 = vpop.f32.mrf.mxu0 }
 0x604   :  { %v2236_v10 = vsel %vm803_vm0, %v10209_v6, -inf  ;;  %v2248_v62 = vsel %vm803_vm0, %v10211_v16, -inf }
 0x605   :  { %v2081_v32 = vpop.f32.mrf.mxu1  ;;  %v10214_v28 = vpop.f32.mrf.mxu0 }
 0x606   :  { %v2230_v9 = vsel %vm803_vm0, %v2081_v32, -inf  ;;  %v2242_v38 = vsel %vm803_vm0, %v10214_v28, -inf }
 0x607   :  { %2231 = vmax.xlane.f32.xlu0 %v2230_v9  ;;  %v10216_v36 = vpop.f32.mrf.mxu1  ;;  %v10221_v12 = vpop.f32.mrf.mxu0 }
 0x608   :  { %v2239_v60 = vsel %vm803_vm0, %v10216_v36, -inf  ;;  %v2251_v4 = vsel %vm803_vm0, %v10221_v12, -inf }
 0x609   :  { %v2084_v34 = vpop.f32.mrf.mxu1  ;;  %v10227_v61 = vpop.f32.mrf.mxu0 }
 0x60a   :  { %v2233_v59 = vsel %vm803_vm0, %v2084_v34, -inf  ;;  %v2245_v47 = vsel %vm803_vm0, %v10227_v61, -inf }
 0x60b   :  { %2237 = vmax.xlane.f32.xlu0 %v2236_v10  ;;  %2234 = vmax.xlane.f32.xlu1 %v2233_v59 }
 0x60f   :  { %2243 = vmax.xlane.f32.xlu0 %v2242_v38  ;;  %2240 = vmax.xlane.f32.xlu1 %v2239_v60 }
 0x613   :  { %2249 = vmax.xlane.f32.xlu0 %v2248_v62  ;;  %2246 = vmax.xlane.f32.xlu1 %v2245_v47  ;;  %v10233_v3 = vpop.f32.mrf.mxu1 }
 0x614   :  { %v2260_v53 = vsel %vm803_vm0, %v10233_v3, -inf }
 0x615   :  { %v10235_v31 = vpop.f32.mrf.mxu1 }
 0x616   :  { %v2254_v44 = vsel %vm803_vm0, %v10235_v31, -inf }
 0x617   :  { %2252 = vmax.xlane.f32.xlu1 %v2251_v4  ;;  %2255 = vmax.xlane.f32.xlu0 %v2254_v44  ;;  %v10241_v41 = vpop.f32.mrf.mxu1 }
 0x618   :  { %v2263_v27 = vsel %vm803_vm0, %v10241_v41, -inf }
 0x619   :  { %v10243_v50 = vpop.f32.mrf.mxu1 }
 0x61a   :  { %v2257_v13 = vsel %vm803_vm0, %v10243_v50, -inf }
 0x61b   :  { %2261 = vmax.xlane.f32.xlu0 %v2260_v53  ;;  %2258 = vmax.xlane.f32.xlu1 %v2257_v13 }
 0x61f   :  { %2264 = vmax.xlane.f32.xlu1 %v2263_v27 }
 0x680   :  { %v2220_v55 = vpop.xlane.xlu0 %2219 }
 0x681   :  { %v2266_v58 = vsub.f32 %v2020_v56, %v2220_v55 }
 0x683   :  { %v2282_v9 = vmul.f32 1.442695, %v2266_v58 }
 0x684   :  { %v2226_v10 = vpop.xlane.xlu0 %2225  ;;  %v2223_v59 = vpop.xlane.xlu1 %2222 }
 0x685   :  { %9057 = vpow2.f32 %v2282_v9  ;;  %v2268_v38 = vsub.f32 %v8283_v52, %v2226_v10  ;;  %v2267_v60 = vsub.f32 %v2023_v57, %v2223_v59 }
 0x687   :  { %v2286_v62 = vmul.f32 1.442695, %v2268_v38  ;;  %v2284_v47 = vmul.f32 1.442695, %v2267_v60 }
 0x688   :  { %v2229_v4 = vpop.xlane.xlu1 %2228 }
 0x689   :  { %9059 = vpow2.f32 %v2286_v62  ;;  %v2269_v44 = vsub.f32 %v8284_v43, %v2229_v4 }
 0x68a   :  { %9061 = vpow2.f32 %v2284_v47 }
 0x68b   :  { %v2288_v53 = vmul.f32 1.442695, %v2269_v44 }
 0x68d   :  { %9063 = vpow2.f32 %v2288_v53 }
 0x690   :  { %v2232_v13 = vpop.xlane.xlu0 %2231 }
 0x691   :  { %v2270_v51 = vsub.f32 %v2081_v32, %v2232_v13 }
 0x692   :  { %v10251_v8 = vpop.eup %9057 }
 0x693   :  { %v2290_v27 = vmul.f32 1.442695, %v2270_v51  ;;  %v2314_v56 = vsel %vm803_vm0, %v10251_v8, 0.0 }
 0x694   :  { %v2238_v55 = vpop.xlane.xlu0 %2237  ;;  %v2235_v58 = vpop.xlane.xlu1 %2234  ;;  %2315 = vadd.xlane.f32.xlu0 %v2314_v56 }
 0x695   :  { %9065 = vpow2.f32 %v2290_v27  ;;  %v2272_v52 = vsub.f32 %v10209_v6, %v2238_v55  ;;  %v2271_v57 = vsub.f32 %v2084_v34, %v2235_v58 }
 0x696   :  { %v10256_v9 = vpop.eup %9059 }
 0x697   :  { %v10258_v43 = vpop.eup %9061  ;;  %v2294_v10 = vmul.f32 1.442695, %v2272_v52  ;;  %v2292_v59 = vmul.f32 1.442695, %v2271_v57  ;;  %v2320_v32 = vsel %vm803_vm0, %v10256_v9, 0.0 }
 0x698   :  { %v2244_v51 = vpop.xlane.xlu0 %2243  ;;  %v2241_v38 = vpop.xlane.xlu1 %2240  ;;  %2321 = vadd.xlane.f32.xlu0 %v2320_v32  ;;  %v2317_v60 = vsel %vm803_vm0, %v10258_v43, 0.0 }
 0x699   :  { %9067 = vpow2.f32 %v2294_v10  ;;  %v2274_v62 = vsub.f32 %v10214_v28, %v2244_v51  ;;  %v2273_v6 = vsub.f32 %v10216_v36, %v2241_v38  ;;  %2318 = vadd.xlane.f32.xlu1 %v2317_v60 }
 0x69a   :  { %v10266_v34 = vpop.eup %9063  ;;  %9069 = vpow2.f32 %v2292_v59 }
 0x69b   :  { %v2298_v47 = vmul.f32 1.442695, %v2274_v62  ;;  %v2296_v4 = vmul.f32 1.442695, %v2273_v6  ;;  %v2323_v44 = vsel %vm803_vm0, %v10266_v34, 0.0 }
 0x69c   :  { %v2250_v53 = vpop.xlane.xlu0 %2249  ;;  %v2247_v13 = vpop.xlane.xlu1 %2246 }
 0x69d   :  { %9071 = vpow2.f32 %v2298_v47  ;;  %v2276_v27 = vsub.f32 %v10211_v16, %v2250_v53  ;;  %v2275_v56 = vsub.f32 %v10227_v61, %v2247_v13  ;;  %2324 = vadd.xlane.f32.xlu1 %v2323_v44 }
 0x69e   :  { %9073 = vpow2.f32 %v2296_v4 }
 0x69f   :  { %v2302_v28 = vmul.f32 1.442695, %v2276_v27  ;;  %v2300_v36 = vmul.f32 1.442695, %v2275_v56 }
 0x6a0   :  { %v2253_v55 = vpop.xlane.xlu1 %2252  ;;  %v2256_v58 = vpop.xlane.xlu0 %2255 }
 0x6a1   :  { %9075 = vpow2.f32 %v2302_v28  ;;  %v2277_v52 = vsub.f32 %v10221_v12, %v2253_v55  ;;  %v2278_v57 = vsub.f32 %v10235_v31, %v2256_v58 }
 0x6a2   :  { %v10274_v10 = vpop.eup %9065  ;;  %9077 = vpow2.f32 %v2300_v36 }
 0x6a3   :  { %v2304_v59 = vmul.f32 1.442695, %v2277_v52  ;;  %v2306_v32 = vmul.f32 1.442695, %v2278_v57  ;;  %v2326_v16 = vsel %vm803_vm0, %v10274_v10, 0.0 }
 0x6a4   :  { %2327 = vadd.xlane.f32.xlu0 %v2326_v16  ;;  %v2262_v61 = vpop.xlane.xlu0 %2261  ;;  %v2259_v51 = vpop.xlane.xlu1 %2258 }
 0x6a5   :  { %9079 = vpow2.f32 %v2304_v59  ;;  %v2280_v38 = vsub.f32 %v10233_v3, %v2262_v61  ;;  %v2279_v60 = vsub.f32 %v10243_v50, %v2259_v51 }
 0x6a6   :  { %v10280_v62 = vpop.eup %9067  ;;  %9081 = vpow2.f32 %v2306_v32 }
 0x6a7   :  { %v10282_v12 = vpop.eup %9069  ;;  %v2310_v31 = vmul.f32 1.442695, %v2280_v38  ;;  %v2308_v6 = vmul.f32 1.442695, %v2279_v60  ;;  %v2332_v47 = vsel %vm803_vm0, %v10280_v62, 0.0 }
 0x6a8   :  { %2333 = vadd.xlane.f32.xlu0 %v2332_v47  ;;  %v2329_v4 = vsel %vm803_vm0, %v10282_v12, 0.0  ;;  %v2265_v44 = vpop.xlane.xlu1 %2264 }
 0x6a9   :  { %9083 = vpow2.f32 %v2310_v31  ;;  %2330 = vadd.xlane.f32.xlu1 %v2329_v4  ;;  %v2281_v3 = vsub.f32 %v10241_v41, %v2265_v44 }
 0x6aa   :  { %v10289_v50 = vpop.eup %9071  ;;  %9085 = vpow2.f32 %v2308_v6 }
 0x6ab   :  { %v10291_v53 = vpop.eup %9073  ;;  %v2312_v13 = vmul.f32 1.442695, %v2281_v3  ;;  %v2338_v27 = vsel %vm803_vm0, %v10289_v50, 0.0 }
 0x6ac   :  { %2339 = vadd.xlane.f32.xlu0 %v2338_v27  ;;  %v2335_v56 = vsel %vm803_vm0, %v10291_v53, 0.0 }
 0x6ad   :  { %9087 = vpow2.f32 %v2312_v13  ;;  %2336 = vadd.xlane.f32.xlu1 %v2335_v56 }
 0x6ae   :  { %v10297_v28 = vpop.eup %9075 }
 0x6af   :  { %v10299_v36 = vpop.eup %9077  ;;  %v2344_v41 = vsel %vm803_vm0, %v10297_v28, 0.0 }
 0x6b0   :  { %2345 = vadd.xlane.f32.xlu0 %v2344_v41  ;;  %v2341_v55 = vsel %vm803_vm0, %v10299_v36, 0.0 }
 0x6b1   :  { %2342 = vadd.xlane.f32.xlu1 %v2341_v55 }
 0x6b2   :  { %v10305_v58 = vpop.eup %9079 }
 0x6b3   :  { %v10307_v52 = vpop.eup %9081  ;;  %v2347_v57 = vsel %vm803_vm0, %v10305_v58, 0.0 }
 0x6b4   :  { %v2350_v59 = vsel %vm803_vm0, %v10307_v52, 0.0 }
 0x6b5   :  { %2351 = vadd.xlane.f32.xlu0 %v2350_v59  ;;  %2348 = vadd.xlane.f32.xlu1 %v2347_v57 }
 0x6b6   :  { %v10313_v32 = vpop.eup %9083 }
 0x6b7   :  { %v10315_v16 = vpop.eup %9085  ;;  %v2356_v61 = vsel %vm803_vm0, %v10313_v32, 0.0 }
 0x6b8   :  { %v2353_v51 = vsel %vm803_vm0, %v10315_v16, 0.0 }
 0x6b9   :  { %2357 = vadd.xlane.f32.xlu0 %v2356_v61  ;;  %2354 = vadd.xlane.f32.xlu1 %v2353_v51 }
 0x6ba   :  { %v10321_v38 = vpop.eup %9087 }
 0x6bb   :  { %v2359_v60 = vsel %vm803_vm0, %v10321_v38, 0.0 }
 0x6bd   :  { %2360 = vadd.xlane.f32.xlu1 %v2359_v60 }
 0x71d   :  { %v2316_v31 = vpop.xlane.xlu0 %2315 }
 0x71e   :  { %9089 = vrcp.f32 %v2316_v31 }
 0x721   :  { %v2322_v6 = vpop.xlane.xlu0 %2321 }
 0x722   :  { %v2319_v47 = vpop.xlane.xlu1 %2318 }
 0x723   :  { %9091 = vrcp.f32 %v2319_v47 }
 0x724   :  { %9093 = vrcp.f32 %v2322_v6 }
 0x726   :  { %v2325_v4 = vpop.xlane.xlu1 %2324 }
 0x727   :  { %9095 = vrcp.f32 %v2325_v4 }
 0x72b   :  { %v9090_v3 = vpop.eup %9089 }
 0x72c   :  { %v2378_v56 = vmul.f32 %v9090_v3, %v10251_v8  ;;  %v1970_v8 = vpack.c.bf16 %v10195_v48, %v10191_v15 }
 0x72d   :  { %v2328_v44 = vpop.xlane.xlu0 %2327 }
 0x72e   :  { %9097 = vrcp.f32 %v2328_v44 }
 0x730   :  { %v9092_v13 = vpop.eup %9091 }
 0x731   :  { %v2334_v27 = vpop.xlane.xlu0 %2333  ;;  %v2379_v41 = vmul.f32 %v9092_v13, %v10258_v43  ;;  %v9094_v55 = vpop.eup %9093 }
 0x732   :  { %v2331_v57 = vpop.xlane.xlu1 %2330  ;;  %v2380_v60 = vmul.f32 %v9094_v55, %v10256_v9 }
 0x733   :  { %9099 = vrcp.f32 %v2331_v57  ;;  %v2394_v59 = vpack.c.bf16 %v2379_v41, %v2378_v56 }
 0x734   :  { %v9096_v61 = vpop.eup %9095  ;;  %9101 = vrcp.f32 %v2334_v27 }
 0x735   :  { %v2340_v51 = vpop.xlane.xlu0 %2339  ;;  %8313 = vmatprep.mubr.msk.bf16.mxu0 %vm803_vm0, %v2394_v59  ;;  %v2381_v31 = vmul.f32 %v9096_v61, %v10266_v34 }
 0x736   :  { %v2337_v6 = vpop.xlane.xlu1 %2336 }
 0x737   :  { %9103 = vrcp.f32 %v2337_v6  ;;  %v2395_v47 = vpack.c.bf16 %v2381_v31, %v2380_v60 }
 0x738   :  { %9105 = vrcp.f32 %v2340_v51 }
 0x739   :  { %v2346_v43 = vpop.xlane.xlu0 %2345  ;;  %8314 = vmatmul.mubr.msk.bf16.vlgmr.msra.gmra.mxu0 %vm803_vm0, %v2395_v47 }
 0x73a   :  { %8326 = vmatpush3.bf16.msra.mxu0 %v10193_v37  ;;  %v2343_v4 = vpop.xlane.xlu1 %2342 }
 0x73b   :  { %9107 = vrcp.f32 %v2343_v4  ;;  %8327 = vmatprep.subr.bf16.mxu0 %v1970_v8  ;;  %v9098_v44 = vpop.eup %9097 }
 0x73c   :  { %9109 = vrcp.f32 %v2346_v43  ;;  %v2382_v13 = vmul.f32 %v9098_v44, %v10274_v10 }
 0x73e   :  { %v2352_v9 = vpop.xlane.xlu0 %2351  ;;  %8328 = vmatpush3.bf16.msra.mxu0 %v1970_v8  ;;  %v2349_v34 = vpop.xlane.xlu1 %2348 }
 0x73f   :  { %9111 = vrcp.f32 %v2349_v34 }
 0x740   :  { %v9100_v3 = vpop.eup %9099  ;;  %9113 = vrcp.f32 %v2352_v9 }
 0x741   :  { %v2383_v15 = vmul.f32 %v9100_v3, %v10282_v12  ;;  %v9102_v48 = vpop.eup %9101  ;;  %v1972_v12 = vpack.c.bf16 %v10207_v7, %v10198_v11 }
 0x742   :  { %v2358_v27 = vpop.xlane.xlu0 %2357  ;;  %v2355_v56 = vpop.xlane.xlu1 %2354  ;;  %v2384_v55 = vmul.f32 %v9102_v48, %v10280_v62  ;;  %v8839_v48 = vld [vmem:[%s12247_s3 + $0xa8] sm:$0xff]  }
 0x743   :  { %v2396_v41 = vpack.c.bf16 %v2383_v15, %v2382_v13  ;;  %9115 = vrcp.f32 %v2355_v56  ;;  %v1452_v13 = vpack.c.bf16 %v10153_v39, %v10147_v33  ;;  %v8829_v33 = vld [vmem:[%s12248_s4 + $0xa8] sm:$0xff]   ;;  %v8830_v39 = vld [vmem:[%s12248_s4 + $0xa0] sm:$0xff]   ;;  %v8838_v15 = vld [vmem:[%s12247_s3 + $0xb0] sm:$0xff]  }
 0x744   :  { %v9104_v37 = vpop.eup %9103  ;;  %9117 = vrcp.f32 %v2358_v27  ;;  %v8840_v56 = vld [vmem:[%s12247_s3 + $0xa0] sm:$0xff]  }
 0x745   :  { %8321 = vmatprep.mubr.msk.bf16.mxu1 %vm803_vm0, %v2396_v41  ;;  %v2385_v57 = vmul.f32 %v9104_v37, %v10291_v53  ;;  %v9106_v59 = vpop.eup %9105  ;;  %v8825_v53 = vld [vmem:[%s12250_s6 + $0x8] sm:$0xff]  }
 0x746   :  { %v2361_v61 = vpop.xlane.xlu1 %2360  ;;  %v2386_v60 = vmul.f32 %v9106_v59, %v10289_v50 }
 0x747   :  { %9119 = vrcp.f32 %v2361_v61  ;;  %v2397_v10 = vpack.c.bf16 %v2385_v57, %v2384_v55  ;;  %v8841_v55 = vld [vmem:[%s12247_s3 + $0x98] sm:$0xff]  }
 0x748   :  { %v9108_v51 = vpop.eup %9107 }
 0x749   :  { %8322 = vmatmul.mubr.msk.bf16.vlgmr.msra.gmra.mxu1 %vm803_vm0, %v2397_v10  ;;  %v2387_v31 = vmul.f32 %v9108_v51, %v10299_v36  ;;  %v9110_v6 = vpop.eup %9109  ;;  %v8842_v10 = vld [vmem:[%s12247_s3 + $0x90] sm:$0xff]  }
 0x74a   :  { %8334 = vmatpush3.bf16.msra.mxu1 %v10200_v30  ;;  %v2388_v11 = vmul.f32 %v9110_v6, %v10297_v28 }
 0x74b   :  { %8335 = vmatprep.subr.bf16.mxu1 %v1972_v12  ;;  %v2398_v62 = vpack.c.bf16 %v2387_v31, %v2386_v60  ;;  %v8843_v60 = vld [vmem:[%s12247_s3 + $0x88] sm:$0xff]  }
 0x74c   :  { %v9112_v47 = vpop.eup %9111 }
 0x74d   :  { %8329 = vmatprep.mubr.msk.bf16.mxu0 %vm803_vm0, %v2398_v62  ;;  %v2389_v7 = vmul.f32 %v9112_v47, %v10305_v58  ;;  %v9114_v50 = vpop.eup %9113  ;;  %v8826_v58 = vld [vmem:[%s12250_s6] sm:$0xff]  }
 0x74e   :  { %8336 = vmatpush3.bf16.msra.mxu1 %v1972_v12  ;;  %v2390_v43 = vmul.f32 %v9114_v50, %v10307_v52  ;;  %v8827_v52 = vld [vmem:[%s12248_s4 + $0xb8] sm:$0xff]  }
 0x74f   :  { %8361 = vmatprep.subr.bf16.mxu1 %v8825_v53  ;;  %v2399_v36 = vpack.c.bf16 %v2389_v7, %v2388_v11  ;;  %v8844_v11 = vld [vmem:[%s12247_s3 + $0x80] sm:$0xff]  }
 0x750   :  { %v9116_v8 = vpop.eup %9115 }
 0x751   :  { %v9118_v30 = vpop.eup %9117  ;;  %8330 = vmatmul.mubr.msk.bf16.vlgmr.msra.gmra.mxu0 %vm803_vm0, %v2399_v36  ;;  %v2391_v4 = vmul.f32 %v9116_v8, %v10315_v16  ;;  %v1454_v16 = vpack.c.bf16 %v10135_v17, %v10129_v22  ;;  %v1456_v22 = vpack.c.bf16 %v10168_v29, %v10157_v54  ;;  %v8831_v17 = vld [vmem:[%s12248_s4 + $0x98] sm:$0xff]  }
 0x752   :  { %v2392_v34 = vmul.f32 %v9118_v30, %v10313_v32  ;;  %v8828_v32 = vld [vmem:[%s12248_s4 + $0xb0] sm:$0xff]   ;;  %v8845_v36 = vld [vmem:[%s12249_s5 + $0xb8] sm:$0xff]  }
 0x753   :  { %v2400_v9 = vpack.c.bf16 %v2391_v4, %v2390_v43 }
 0x754   :  { %v9120_v44 = vpop.eup %9119 }
 0x755   :  { %v2393_v3 = vmul.f32 %v9120_v44, %v10321_v38  ;;  %8337 = vmatprep.mubr.msk.bf16.mxu1 %vm803_vm0, %v2400_v9 }
 0x757   :  { %v2401_v28 = vpack.c.bf16 %v2393_v3, %v2392_v34 }
 0x759   :  { %8338 = vmatmul.mubr.msk.bf16.vlgmr.msra.gmra.mxu1 %vm803_vm0, %v2401_v28  ;;  %v8846_v28 = vld [vmem:[%s12249_s5 + $0xb0] sm:$0xff]  }
 0x75a   :  { %8362 = vmatpush3.bf16.msra.mxu1 %v8825_v53  ;;  %8365 = vmatprep.mubr.msk.bf16.mxu1 %vm803_vm0, %v1452_v13 }
 0x75b   :  { %8363 = vmatprep.subr.bf16.mxu1 %v8826_v58 }
 0x75e   :  { %8364 = vmatpush3.bf16.msra.mxu1 %v8826_v58 }
 0x75f   :  { %8413 = vmatprep.subr.bf16.mxu1 %v8827_v52 }
 0x761   :  { %8366 = vmatmul.mubr.msk.bf16.vlgmr.msra.gmra.mxu1 %vm803_vm0, %v1453_v1  ;;  %v8835_v1 = vld [vmem:[%s12250_s6 + $0x18] sm:$0xff]  }
 0x762   :  { %8369 = vmatprep.mubr.msk.bf16.mxu1 %vm803_vm0, %v1454_v16  ;;  %8414 = vmatpush3.bf16.msra.mxu1 %v8827_v52  ;;  %v8847_v52 = vld [vmem:[%s12249_s5 + $0xa8] sm:$0xff]  }
 0x763   :  { %8415 = vmatprep.subr.bf16.mxu1 %v8828_v32  ;;  %8341 = vmatprep.subr.bf16.mxu0 %v8835_v1 }
 0x764   :  { %8342 = vmatpush3.bf16.msra.mxu0 %v8835_v1 }
 0x765   :  { %8343 = vmatprep.subr.bf16.mxu0 %v8836_v21 }
 0x766   :  { %8416 = vmatpush3.bf16.msra.mxu1 %v8828_v32 }
 0x767   :  { %8417 = vmatprep.subr.bf16.mxu1 %v8829_v33 }
 0x768   :  { %8344 = vmatpush3.bf16.msra.mxu0 %v8836_v21 }
 0x769   :  { %8370 = vmatmul.mubr.msk.bf16.gmra.mxu1 %vm803_vm0, %v1455_v42  ;;  %v8834_v42 = vld [vmem:[%s12248_s4 + $0x80] sm:$0xff]   ;;  %8381 = vmatprep.subr.bf16.mxu0 %v8837_v23 }
 0x76a   :  { %8373 = vmatprep.mubr.msk.bf16.mxu1 %vm803_vm0, %v1456_v22  ;;  %8418 = vmatpush3.bf16.msra.mxu1 %v8829_v33  ;;  %v8848_v33 = vld [vmem:[%s12249_s5 + $0xa0] sm:$0xff]  }
 0x76b   :  { %8419 = vmatprep.subr.bf16.mxu1 %v8830_v39 }
 0x76e   :  { %8420 = vmatpush3.bf16.msra.mxu1 %v8830_v39 }
 0x76f   :  { %8421 = vmatprep.subr.bf16.mxu1 %v8831_v17 }
 0x771   :  { %8374 = vmatmul.mubr.msk.bf16.gmra.mxu1 %vm803_vm0, %v12270_v5  ;;  %v8850_v5 = vld [vmem:[%s12249_s5 + $0x90] sm:$0xff]  }
 0x772   :  { %8377 = vmatprep.mubr.msk.bf16.mxu1 %vm803_vm0, %v1458_v0  ;;  %8422 = vmatpush3.bf16.msra.mxu1 %v8831_v17  ;;  %v8849_v17 = vld [vmem:[%s12249_s5 + $0x98] sm:$0xff]  }
 0x773   :  { %8423 = vmatprep.subr.bf16.mxu1 %v8832_v14 }
 0x776   :  { %8424 = vmatpush3.bf16.msra.mxu1 %v8832_v14 }
 0x777   :  { %8425 = vmatprep.subr.bf16.mxu1 %v8833_v40 }
 0x779   :  { %8378 = vmatmul.mubr.msk.bf16.gmra.mxu1 %vm803_vm0, %v12271_v19  ;;  %v8851_v19 = vld [vmem:[%s12249_s5 + $0x88] sm:$0xff]  }
 0x77a   :  { %8426 = vmatpush3.bf16.msra.mxu1 %v8833_v40  ;;  %8429 = vmatprep.mubr.bf16.mxu1 %v9744_v49 }
 0x77b   :  { %8427 = vmatprep.subr.bf16.mxu1 %v8834_v42 }
 0x77e   :  { %8428 = vmatpush3.bf16.msra.mxu1 %v8834_v42 }
 0x781   :  { %8430 = vmatmul.mubr.bf16.vlgmr.msra.gmra.mxu1 %v9754_v63 }
 0x782   :  { %8433 = vmatprep.mubr.bf16.mxu1 %v9768_v18 }
 0x789   :  { %8434 = vmatmul.mubr.bf16.gmra.mxu1 %v9781_v20 }
 0x78a   :  { %8437 = vmatprep.mubr.bf16.mxu1 %v9794_v35 }
 0x791   :  { %8438 = vmatmul.mubr.bf16.gmra.mxu1 %v9807_v46 }
 0x792   :  { %8441 = vmatprep.mubr.bf16.mxu1 %v9819_v24 }
 0x799   :  { %8442 = vmatmul.mubr.bf16.gmra.mxu1 %v9829_v25 }
 0x7f9   :  { %v8315_v45 = vpop.f32.mrf.mxu0 }
 0x7fb   :  { %v2442_v54 = vpop.f32.mrf.mxu0 }
 0x7fd   :  { %v8316_v2 = vpop.f32.mrf.mxu0 }
 0x7fe   :  { %v2623_v38 = vpack.c.bf16 %v8316_v2, %v8315_v45 }
 0x7ff   :  { %v2445_v26 = vpop.f32.mrf.mxu0 }
 0x800   :  { %v2622_v29 = vpack.c.bf16 %v2445_v26, %v2442_v54 }
 0x802   :  { %8345 = vmatprep.mubr.msk.bf16.mxu0 %vm803_vm0, %v2622_v29 }
 0x803   :  { %8346 = vmatmul.mubr.msk.bf16.vlgmr.msra.gmra.mxu0 %vm803_vm0, %v2623_v38 }
 0x804   :  { %8382 = vmatpush3.bf16.msra.mxu0 %v8837_v23  ;;  %v8852_v23 = vld [vmem:[%s12249_s5 + $0x80] sm:$0xff]  }
 0x805   :  { %8383 = vmatprep.subr.bf16.mxu0 %v8838_v15 }
 0x808   :  { %8384 = vmatpush3.bf16.msra.mxu0 %v8838_v15 }
 0x809   :  { %v8323_v27 = vpop.f32.mrf.mxu1  ;;  %8385 = vmatprep.subr.bf16.mxu0 %v8839_v48 }
 0x80b   :  { %v2497_v41 = vpop.f32.mrf.mxu1 }
 0x80c   :  { %8386 = vmatpush3.bf16.msra.mxu0 %v8839_v48 }
 0x80d   :  { %v8324_v37 = vpop.f32.mrf.mxu1  ;;  %8387 = vmatprep.subr.bf16.mxu0 %v8840_v56 }
 0x80e   :  { %v2625_v61 = vpack.c.bf16 %v8324_v37, %v8323_v27 }
 0x80f   :  { %v2500_v57 = vpop.f32.mrf.mxu1 }
 0x810   :  { %v2624_v59 = vpack.c.bf16 %v2500_v57, %v2497_v41  ;;  %8388 = vmatpush3.bf16.msra.mxu0 %v8840_v56 }
 0x811   :  { %8389 = vmatprep.subr.bf16.mxu0 %v8841_v55  ;;  %v8331_v51 = vpop.f32.mrf.mxu0 }
 0x812   :  { %8349 = vmatprep.mubr.msk.bf16.mxu0 %vm803_vm0, %v2624_v59 }
 0x813   :  { %8350 = vmatmul.mubr.msk.bf16.gmra.mxu0 %vm803_vm0, %v2625_v61  ;;  %v2552_v12 = vpop.f32.mrf.mxu0 }
 0x814   :  { %8390 = vmatpush3.bf16.msra.mxu0 %v8841_v55 }
 0x815   :  { %8391 = vmatprep.subr.bf16.mxu0 %v8842_v10  ;;  %v8332_v31 = vpop.f32.mrf.mxu0 }
 0x816   :  { %v2627_v47 = vpack.c.bf16 %v8332_v31, %v8331_v51 }
 0x817   :  { %v2555_v6 = vpop.f32.mrf.mxu0 }
 0x818   :  { %8392 = vmatpush3.bf16.msra.mxu0 %v8842_v10  ;;  %v2626_v62 = vpack.c.bf16 %v2555_v6, %v2552_v12 }
 0x819   :  { %v8339_v53 = vpop.f32.mrf.mxu1  ;;  %8393 = vmatprep.subr.bf16.mxu0 %v8843_v60 }
 0x81a   :  { %8353 = vmatprep.mubr.msk.bf16.mxu0 %vm803_vm0, %v2626_v62 }
 0x81b   :  { %v2607_v7 = vpop.f32.mrf.mxu1  ;;  %8354 = vmatmul.mubr.msk.bf16.gmra.mxu0 %vm803_vm0, %v2627_v47 }
 0x81c   :  { %8394 = vmatpush3.bf16.msra.mxu0 %v8843_v60 }
 0x81d   :  { %v8340_v50 = vpop.f32.mrf.mxu1  ;;  %8395 = vmatprep.subr.bf16.mxu0 %v8844_v11 }
 0x81e   :  { %v2629_v4 = vpack.c.bf16 %v8340_v50, %v8339_v53 }
 0x81f   :  { %v2610_v8 = vpop.f32.mrf.mxu1 }
 0x820   :  { %v2628_v30 = vpack.c.bf16 %v2610_v8, %v2607_v7  ;;  %8396 = vmatpush3.bf16.msra.mxu0 %v8844_v11 }
 0x821   :  { %v10460_v43 = vpop.f32.mrf.mxu1  ;;  %8445 = vmatprep.subr.bf16.mxu0 %v8845_v36 }
 0x822   :  { %8357 = vmatprep.mubr.msk.bf16.mxu0 %vm803_vm0, %v2628_v30 }
 0x823   :  { %v10463_v44 = vpop.f32.mrf.mxu1  ;;  %8358 = vmatmul.mubr.msk.bf16.gmra.mxu0 %vm803_vm0, %v2629_v4 }
 0x824   :  { %8397 = vmatprep.mubr.bf16.mxu0 %v9744_v49 }
 0x825   :  { %v10467_v9 = vpop.f32.mrf.mxu1 }
 0x827   :  { %v10469_v34 = vpop.f32.mrf.mxu1 }
 0x828   :  { %12272 = vst [vmem:[#allocation5_spill] sm:$0xff] %v10469_v34 }
 0x829   :  { %v10471_v3 = vpop.f32.mrf.mxu1 }
 0x82b   :  { %v10476_v58 = vpop.f32.mrf.mxu1  ;;  %8398 = vmatmul.mubr.bf16.vlgmr.msra.gmra.mxu0 %v9754_v63 }
 0x82c   :  { %8401 = vmatprep.mubr.bf16.mxu0 %v9768_v18  ;;  %8446 = vmatpush3.bf16.msra.mxu0 %v8845_v36 }
 0x82d   :  { %v10480_v13 = vpop.f32.mrf.mxu1  ;;  %8447 = vmatprep.subr.bf16.mxu0 %v8846_v28 }
 0x82f   :  { %v10485_v32 = vpop.f32.mrf.mxu1 }
 0x830   :  { %12273 = vst [vmem:[#allocation6_spill] sm:$0xff] %v10485_v32  ;;  %8448 = vmatpush3.bf16.msra.mxu0 %v8846_v28 }
 0x831   :  { %v10487_v16 = vpop.f32.mrf.mxu1  ;;  %8449 = vmatprep.subr.bf16.mxu0 %v8847_v52 }
 0x833   :  { %v10492_v39 = vpop.f32.mrf.mxu1  ;;  %8402 = vmatmul.mubr.bf16.gmra.mxu0 %v9781_v20 }
 0x834   :  { %8405 = vmatprep.mubr.bf16.mxu0 %v9794_v35  ;;  %8450 = vmatpush3.bf16.msra.mxu0 %v8847_v52 }
 0x835   :  { %v10496_v22 = vpop.f32.mrf.mxu1  ;;  %8451 = vmatprep.subr.bf16.mxu0 %v8848_v33 }
 0x837   :  { %v10501_v14 = vpop.f32.mrf.mxu1 }
 0x838   :  { %12274 = vst [vmem:[#allocation7_spill] sm:$0xff] %v10501_v14  ;;  %8452 = vmatpush3.bf16.msra.mxu0 %v8848_v33 }
 0x839   :  { %v10503_v0 = vpop.f32.mrf.mxu1  ;;  %8453 = vmatprep.subr.bf16.mxu0 %v8849_v17 }
 0x83a   :  { %12275 = vst [vmem:[#allocation8_spill] sm:$0xff] %v10503_v0 }
 0x83b   :  { %v10508_v40 = vpop.f32.mrf.mxu1  ;;  %8406 = vmatmul.mubr.bf16.gmra.mxu0 %v9807_v46 }
 0x83c   :  { %12276 = vst [vmem:[#allocation9_spill] sm:$0xff] %v10508_v40  ;;  %8409 = vmatprep.mubr.bf16.mxu0 %v9819_v24  ;;  %8454 = vmatpush3.bf16.msra.mxu0 %v8849_v17 }
 0x83d   :  { %v10512_v42 = vpop.f32.mrf.mxu1  ;;  %8455 = vmatprep.subr.bf16.mxu0 %v8850_v5 }
 0x83e   :  { %12277 = vst [vmem:[#allocation10_spill] sm:$0xff] %v10512_v42 }
 0x83f   :  { %v10517_v1 = vpop.f32.mrf.mxu1 }
 0x840   :  { %12278 = vst [vmem:[#allocation11_spill] sm:$0xff] %v10517_v1  ;;  %8456 = vmatpush3.bf16.msra.mxu0 %v8850_v5 }
 0x841   :  { %v8431_v21 = vpop.f32.mrf.mxu1  ;;  %8457 = vmatprep.subr.bf16.mxu0 %v8851_v19 }
 0x843   :  { %v3162_v45 = vpop.f32.mrf.mxu1  ;;  %8410 = vmatmul.mubr.bf16.gmra.mxu0 %v9829_v25 }
 0x844   :  { %8458 = vmatpush3.bf16.msra.mxu0 %v8851_v19  ;;  %8461 = vmatprep.mubr.bf16.mxu0 %v9744_v49 }
 0x845   :  { %v8432_v54 = vpop.f32.mrf.mxu1  ;;  %8459 = vmatprep.subr.bf16.mxu0 %v8852_v23 }
 0x846   :  { %v3396_v2 = vpack.c.bf16 %v8432_v54, %v8431_v21 }
 0x847   :  { %v3165_v26 = vpop.f32.mrf.mxu1 }
 0x848   :  { %v3421_v29 = vsel %vm803_vm0, %v3396_v2, 0  ;;  %v3395_v38 = vpack.c.bf16 %v3165_v26, %v3162_v45  ;;  %8757 = vmatprep.subr.msk.bf16.mxu1 %vm803_vm0, %v3396_v2  ;;  %8460 = vmatpush3.bf16.msra.mxu0 %v8852_v23 }
 0x849   :  { %v8435_v15 = vpop.f32.mrf.mxu1  ;;  %8478 = vmatpush3.bf16.xpose.msra.mxu1 %v3421_v29 }
 0x84a   :  { %8758 = vmatprep.subr.msk.bf16.mxu1 %vm803_vm0, %v3395_v38  ;;  %v3418_v37 = vsel %vm803_vm0, %v3395_v38, 0 }
 0x84b   :  { %v3178_v48 = vpop.f32.mrf.mxu1  ;;  %8462 = vmatmul.mubr.bf16.vlgmr.msra.gmra.mxu0 %v9754_v63 }
 0x84c   :  { %8465 = vmatprep.mubr.bf16.mxu0 %v9768_v18 }
 0x84d   :  { %v8436_v27 = vpop.f32.mrf.mxu1 }
 0x84e   :  { %v3398_v41 = vpack.c.bf16 %v8436_v27, %v8435_v15 }
 0x84f   :  { %v3181_v56 = vpop.f32.mrf.mxu1 }
 0x850   :  { %v3482_v29 = vsel %vm803_vm0, %v3398_v41, 0  ;;  %v3397_v38 = vpack.c.bf16 %v3181_v56, %v3178_v48 }
 0x851   :  { %v8439_v55 = vpop.f32.mrf.mxu1  ;;  %8480 = vmatpush3.bf16.xpose.msra.mxu1 %v3418_v37 }
 0x852   :  { %8759 = vmatprep.subr.msk.bf16.mxu1 %vm803_vm0, %v3398_v41 }
 0x853   :  { %v3194_v57 = vpop.f32.mrf.mxu1  ;;  %8466 = vmatmul.mubr.bf16.gmra.mxu0 %v9781_v20 }
 0x854   :  { %8469 = vmatprep.mubr.bf16.mxu0 %v9794_v35 }
 0x855   :  { %v8440_v59 = vpop.f32.mrf.mxu1 }
 0x856   :  { %v3400_v61 = vpack.c.bf16 %v8440_v59, %v8439_v55 }
 0x857   :  { %v3197_v10 = vpop.f32.mrf.mxu1 }
 0x858   :  { %v3543_v51 = vsel %vm803_vm0, %v3400_v61, 0  ;;  %v3399_v12 = vpack.c.bf16 %v3197_v10, %v3194_v57  ;;  %8761 = vmatprep.subr.msk.bf16.mxu0 %vm803_vm0, %v3400_v61 }
 0x859   :  { %8494 = vmatpush3.bf16.xpose.msra.mxu0 %v3543_v51  ;;  %v8443_v45 = vpop.f32.mrf.mxu1 }
 0x85a   :  { %8762 = vmatprep.subr.msk.bf16.mxu0 %vm803_vm0, %v3399_v12  ;;  %v3540_v60 = vsel %vm803_vm0, %v3399_v12, 0  ;;  %v3479_v12 = vsel %vm803_vm0, %v3397_v38, 0 }
 0x85b   :  { %8470 = vmatmul.mubr.bf16.gmra.mxu0 %v9807_v46  ;;  %v3210_v27 = vpop.f32.mrf.mxu1 }
 0x85c   :  { %8473 = vmatprep.mubr.bf16.mxu0 %v9819_v24 }
 0x85d   :  { %v8444_v57 = vpop.f32.mrf.mxu1 }
 0x85e   :  { %v3402_v10 = vpack.c.bf16 %v8444_v57, %v8443_v45 }
 0x85f   :  { %v3213_v41 = vpop.f32.mrf.mxu1 }
 0x861   :  { %8496 = vmatpush3.bf16.xpose.msra.mxu0 %v3540_v60 }
 0x863   :  { %8474 = vmatmul.mubr.bf16.gmra.mxu0 %v9829_v25 }
 0x8c3   :  { %v10540_v31 = vpop.f32.mrf.mxu0 }
 0x8c5   :  { %v10542_v6 = vpop.f32.mrf.mxu0 }
 0x8c7   :  { %v10544_v62 = vpop.f32.mrf.mxu0 }
 0x8c9   :  { %v10546_v53 = vpop.f32.mrf.mxu0 }
 0x8ca   :  { %12279 = vst [vmem:[#allocation12_spill] sm:$0xff] %v10546_v53 }
 0x8d3   :  { %v10548_v47 = vpop.f32.mrf.mxu0 }
 0x8d5   :  { %v10550_v11 = vpop.f32.mrf.mxu0 }
 0x8d7   :  { %v10552_v7 = vpop.f32.mrf.mxu0 }
 0x8d9   :  { %v10554_v50 = vpop.f32.mrf.mxu0 }
 0x8da   :  { %12280 = vst [vmem:[#allocation13_spill] sm:$0xff] %v10554_v50 }
 0x8db   :  { %v10556_v36 = vpop.f32.mrf.mxu0 }
 0x8dd   :  { %v10558_v8 = vpop.f32.mrf.mxu0 }
 0x8df   :  { %v10560_v30 = vpop.f32.mrf.mxu0 }
 0x8e1   :  { %v10562_v4 = vpop.f32.mrf.mxu0 }
 0x8e2   :  { %12281 = vst [vmem:[#allocation14_spill] sm:$0xff] %v10562_v4 }
 0x8e3   :  { %v10564_v28 = vpop.f32.mrf.mxu0 }
 0x8e4   :  { %12282 = vst [vmem:[#allocation15_spill] sm:$0xff] %v10564_v28 }
 0x8e5   :  { %v10566_v52 = vpop.f32.mrf.mxu0 }
 0x8e6   :  { %12283 = vst [vmem:[#allocation16_spill] sm:$0xff] %v10566_v52 }
 0x8e7   :  { %v10568_v33 = vpop.f32.mrf.mxu0 }
 0x8e8   :  { %12284 = vst [vmem:[#allocation17_spill] sm:$0xff] %v10568_v33 }
 0x8e9   :  { %v10570_v17 = vpop.f32.mrf.mxu0 }
 0x8ea   :  { %12285 = vst [vmem:[#allocation18_spill] sm:$0xff] %v10570_v17 }
 0x8eb   :  { %v8399_v5 = vpop.f32.mrf.mxu0 }
 0x8ed   :  { %v3000_v19 = vpop.f32.mrf.mxu0 }
 0x8ef   :  { %v8400_v21 = vpop.f32.mrf.mxu0 }
 0x8f0   :  { %v3388_v2 = vpack.c.bf16 %v8400_v21, %v8399_v5 }
 0x8f1   :  { %v3003_v23 = vpop.f32.mrf.mxu0 }
 0x8f2   :  { %v3387_v54 = vpack.c.bf16 %v3003_v23, %v3000_v19  ;;  %v3604_v23 = vsel %vm803_vm0, %v3402_v10, 0 }
 0x8f3   :  { %v8403_v26 = vpop.f32.mrf.mxu0 }
 0x8f4   :  { %8481 = vmatprep.mubr.msk.bf16.mxu1 %vm803_vm0, %v3387_v54  ;;  %v3401_v54 = vpack.c.bf16 %v3213_v41, %v3210_v27 }
 0x8f5   :  { %v3016_v15 = vpop.f32.mrf.mxu0  ;;  %8482 = vmatmul.mubr.msk.bf16.vlgmr.msra.gmra.mxu1 %vm803_vm0, %v3388_v2 }
 0x8f6   :  { %8486 = vmatpush3.bf16.xpose.msra.mxu1 %v3482_v29 }
 0x8f7   :  { %8760 = vmatprep.subr.msk.bf16.mxu1 %vm803_vm0, %v3397_v38  ;;  %v8404_v37 = vpop.f32.mrf.mxu0 }
 0x8f8   :  { %v3390_v5 = vpack.c.bf16 %v8404_v37, %v8403_v26  ;;  %v3601_v37 = vsel %vm803_vm0, %v3401_v54, 0 }
 0x8f9   :  { %v3019_v55 = vpop.f32.mrf.mxu0 }
 0x8fa   :  { %v3389_v59 = vpack.c.bf16 %v3019_v55, %v3016_v15 }
 0x8fb   :  { %v8407_v61 = vpop.f32.mrf.mxu0 }
 0x8fc   :  { %8489 = vmatprep.mubr.msk.bf16.mxu1 %vm803_vm0, %v3389_v59 }
 0x8fd   :  { %v3032_v51 = vpop.f32.mrf.mxu0 }
 0x8fe   :  { %8488 = vmatpush3.bf16.xpose.msra.mxu1 %v3479_v12 }
 0x8ff   :  { %8763 = vmatprep.subr.msk.bf16.mxu1 %vm803_vm0, %v3402_v10  ;;  %v8408_v48 = vpop.f32.mrf.mxu0 }
 0x900   :  { %v3392_v19 = vpack.c.bf16 %v8408_v48, %v8407_v61 }
 0x901   :  { %v3035_v56 = vpop.f32.mrf.mxu0 }
 0x902   :  { %v3391_v60 = vpack.c.bf16 %v3035_v56, %v3032_v51 }
 0x903   :  { %v8411_v21 = vpop.f32.mrf.mxu0 }
 0x904   :  { %8497 = vmatprep.mubr.msk.bf16.mxu0 %vm803_vm0, %v3391_v60 }
 0x905   :  { %8490 = vmatmul.mubr.msk.bf16.vlgmr.msra.gmra.mxu1 %vm803_vm0, %v3390_v5  ;;  %v3048_v45 = vpop.f32.mrf.mxu0  ;;  %8498 = vmatmul.mubr.msk.bf16.vlgmr.msra.gmra.mxu0 %vm803_vm0, %v3392_v19 }
 0x906   :  { %8502 = vmatpush3.bf16.xpose.msra.mxu1 %v3604_v23 }
 0x907   :  { %8764 = vmatprep.subr.msk.bf16.mxu1 %vm803_vm0, %v3401_v54  ;;  %v8412_v2 = vpop.f32.mrf.mxu0 }
 0x908   :  { %v3394_v61 = vpack.c.bf16 %v8412_v2, %v8411_v21 }
 0x909   :  { %v3051_v29 = vpop.f32.mrf.mxu0 }
 0x90a   :  { %v3393_v38 = vpack.c.bf16 %v3051_v29, %v3048_v45 }
 0x90b   :  { %v8463_v15 = vpop.f32.mrf.mxu0 }
 0x90c   :  { %8505 = vmatprep.mubr.msk.bf16.mxu1 %vm803_vm0, %v3393_v38 }
 0x90d   :  { %v3324_v26 = vpop.f32.mrf.mxu0 }
 0x90e   :  { %8504 = vmatpush3.bf16.xpose.msra.mxu1 %v3601_v37 }
 0x90f   :  { %v8464_v55 = vpop.f32.mrf.mxu0 }
 0x910   :  { %v3404_v27 = vpack.c.bf16 %v8464_v55, %v8463_v15 }
 0x911   :  { %v3327_v57 = vpop.f32.mrf.mxu0 }
 0x912   :  { %v3403_v59 = vpack.c.bf16 %v3327_v57, %v3324_v26  ;;  %8509 = vmatprep.subr.bf16.mxu0 %v3404_v27 }
 0x913   :  { %v8467_v10 = vpop.f32.mrf.mxu0  ;;  %8510 = vmatpush3.bf16.msra.mxu0 %v3404_v27 }
 0x914   :  { %8511 = vmatprep.subr.bf16.mxu0 %v3403_v59 }
 0x915   :  { %8506 = vmatmul.mubr.msk.bf16.vlgmr.msra.gmra.mxu1 %vm803_vm0, %v3394_v61  ;;  %v3340_v51 = vpop.f32.mrf.mxu0 }
 0x917   :  { %v8468_v12 = vpop.f32.mrf.mxu0  ;;  %8512 = vmatpush3.bf16.msra.mxu0 %v3403_v59 }
 0x918   :  { %v3406_v48 = vpack.c.bf16 %v8468_v12, %v8467_v10 }
 0x919   :  { %v3343_v56 = vpop.f32.mrf.mxu0 }
 0x91a   :  { %v3405_v41 = vpack.c.bf16 %v3343_v56, %v3340_v51  ;;  %8517 = vmatprep.subr.bf16.mxu1 %v3406_v48 }
 0x91b   :  { %v8471_v60 = vpop.f32.mrf.mxu0  ;;  %8518 = vmatpush3.bf16.msra.mxu1 %v3406_v48 }
 0x91c   :  { %8519 = vmatprep.subr.bf16.mxu1 %v3405_v41 }
 0x91d   :  { %v10587_v5 = vpop.f32.mrf.mxu0 }
 0x91f   :  { %v8472_v19 = vpop.f32.mrf.mxu0  ;;  %8520 = vmatpush3.bf16.msra.mxu1 %v3405_v41 }
 0x920   :  { %v10589_v21 = vpack.c.bf16 %v8472_v19, %v8471_v60 }
 0x921   :  { %v10591_v23 = vpop.f32.mrf.mxu0 }
 0x922   :  { %8525 = vmatprep.subr.bf16.mxu0 %v10589_v21 }
 0x923   :  { %v8475_v54 = vpop.f32.mrf.mxu0 }
 0x925   :  { %v10594_v45 = vpop.f32.mrf.mxu0 }
 0x927   :  { %v8476_v2 = vpop.f32.mrf.mxu0 }
 0x928   :  { %v10596_v29 = vpack.c.bf16 %v8476_v2, %v8475_v54 }
 0x929   :  { %v10603_v61 = vpop.f32.mrf.mxu0 }
 0x92a   :  { %8533 = vmatprep.subr.bf16.mxu1 %v10596_v29 }
 0x9b5   :  { %v8483_v38 = vpop.f32.mrf.mxu1 }
 0x9b6   :  { %v3661_v27 = vsel %vm803_vm0, %v8483_v38, -inf }
 0x9b7   :  { %v3457_v15 = vpop.f32.mrf.mxu1 }
 0x9b8   :  { %v3655_v26 = vsel %vm803_vm0, %v3457_v15, -inf }
 0x9b9   :  { %3656 = vmax.xlane.f32.xlu0 %v3655_v26  ;;  %v8484_v37 = vpop.f32.mrf.mxu1 }
 0x9ba   :  { %v3664_v59 = vsel %vm803_vm0, %v8484_v37, -inf }
 0x9bb   :  { %v3460_v55 = vpop.f32.mrf.mxu1 }
 0x9bc   :  { %v3658_v57 = vsel %vm803_vm0, %v3460_v55, -inf }
 0x9bd   :  { %3662 = vmax.xlane.f32.xlu0 %v3661_v27  ;;  %3659 = vmax.xlane.f32.xlu1 %v3658_v57 }
 0x9c1   :  { %3665 = vmax.xlane.f32.xlu1 %v3664_v59 }
 0x9c5   :  { %v10605_v10 = vpop.f32.mrf.mxu1  ;;  %v10607_v51 = vpop.f32.mrf.mxu0 }
 0x9c6   :  { %v3673_v19 = vsel %vm803_vm0, %v10605_v10, -inf  ;;  %v3685_v59 = vsel %vm803_vm0, %v10607_v51, -inf }
 0x9c7   :  { %v3518_v12 = vpop.f32.mrf.mxu1  ;;  %v10610_v56 = vpop.f32.mrf.mxu0 }
 0x9c8   :  { %v3667_v48 = vsel %vm803_vm0, %v3518_v12, -inf  ;;  %v3679_v26 = vsel %vm803_vm0, %v10610_v56, -inf }
 0x9c9   :  { %3668 = vmax.xlane.f32.xlu0 %v3667_v48  ;;  %v10612_v41 = vpop.f32.mrf.mxu1  ;;  %v10617_v2 = vpop.f32.mrf.mxu0 }
 0x9ca   :  { %v3676_v27 = vsel %vm803_vm0, %v10612_v41, -inf  ;;  %v3688_v1 = vsel %vm803_vm0, %v10617_v2, -inf }
 0x9cb   :  { %v3521_v60 = vpop.f32.mrf.mxu1  ;;  %v10623_v57 = vpop.f32.mrf.mxu0 }
 0x9cc   :  { %v3670_v54 = vsel %vm803_vm0, %v3521_v60, -inf  ;;  %v3682_v48 = vsel %vm803_vm0, %v10623_v57, -inf }
 0x9cd   :  { %3674 = vmax.xlane.f32.xlu0 %v3673_v19  ;;  %3671 = vmax.xlane.f32.xlu1 %v3670_v54 }
 0x9d1   :  { %3680 = vmax.xlane.f32.xlu0 %v3679_v26  ;;  %3677 = vmax.xlane.f32.xlu1 %v3676_v27 }
 0x9d5   :  { %3686 = vmax.xlane.f32.xlu0 %v3685_v59  ;;  %3683 = vmax.xlane.f32.xlu1 %v3682_v48  ;;  %v10629_v19 = vpop.f32.mrf.mxu1 }
 0x9d6   :  { %v3697_v59 = vsel %vm803_vm0, %v10629_v19, -inf }
 0x9d7   :  { %v10631_v54 = vpop.f32.mrf.mxu1 }
 0x9d8   :  { %v3691_v17 = vsel %vm803_vm0, %v10631_v54, -inf }
 0x9d9   :  { %3689 = vmax.xlane.f32.xlu1 %v3688_v1  ;;  %3692 = vmax.xlane.f32.xlu0 %v3691_v17  ;;  %v10637_v26 = vpop.f32.mrf.mxu1 }
 0x9da   :  { %v3700_v14 = vsel %vm803_vm0, %v10637_v26, -inf }
 0x9db   :  { %v10639_v27 = vpop.f32.mrf.mxu1 }
 0x9dc   :  { %v3694_v48 = vsel %vm803_vm0, %v10639_v27, -inf }
 0x9dd   :  { %3698 = vmax.xlane.f32.xlu0 %v3697_v59  ;;  %3695 = vmax.xlane.f32.xlu1 %v3694_v48 }
 0x9e1   :  { %3701 = vmax.xlane.f32.xlu1 %v3700_v14 }
 0xa42   :  { %v3657_v4 = vpop.xlane.xlu0 %3656 }
 0xa43   :  { %v3703_v32 = vsub.f32 %v3457_v15, %v3657_v4 }
 0xa45   :  { %v3719_v1 = vmul.f32 1.442695, %v3703_v32 }
 0xa46   :  { %v3663_v17 = vpop.xlane.xlu0 %3662  ;;  %v3660_v50 = vpop.xlane.xlu1 %3659 }
 0xa47   :  { %9121 = vpow2.f32 %v3719_v1  ;;  %v3705_v34 = vsub.f32 %v8483_v38, %v3663_v17  ;;  %v3704_v53 = vsub.f32 %v3460_v55, %v3660_v50 }
 0xa49   :  { %v3723_v42 = vmul.f32 1.442695, %v3705_v34  ;;  %v3721_v33 = vmul.f32 1.442695, %v3704_v53 }
 0xa4a   :  { %v3666_v40 = vpop.xlane.xlu1 %3665 }
 0xa4b   :  { %9123 = vpow2.f32 %v3723_v42  ;;  %v3706_v52 = vsub.f32 %v8484_v37, %v3666_v40 }
 0xa4c   :  { %9125 = vpow2.f32 %v3721_v33 }
 0xa4d   :  { %v3725_v59 = vmul.f32 1.442695, %v3706_v52 }
 0xa4f   :  { %9127 = vpow2.f32 %v3725_v59 }
 0xa52   :  { %v3669_v48 = vpop.xlane.xlu0 %3668 }
 0xa53   :  { %v3707_v0 = vsub.f32 %v3518_v12, %v3669_v48 }
 0xa54   :  { %v10647_v28 = vpop.eup %9121 }
 0xa55   :  { %v3727_v14 = vmul.f32 1.442695, %v3707_v0  ;;  %v3751_v32 = vsel %vm803_vm0, %v10647_v28, 0.0 }
 0xa56   :  { %v3675_v4 = vpop.xlane.xlu0 %3674  ;;  %v3672_v15 = vpop.xlane.xlu1 %3671  ;;  %3752 = vadd.xlane.f32.xlu0 %v3751_v32 }
 0xa57   :  { %9129 = vpow2.f32 %v3727_v14  ;;  %v3709_v34 = vsub.f32 %v10605_v10, %v3675_v4  ;;  %v3708_v53 = vsub.f32 %v3521_v60, %v3672_v15 }
 0xa58   :  { %v10652_v42 = vpop.eup %9123 }
 0xa59   :  { %v10654_v40 = vpop.eup %9125  ;;  %v3731_v50 = vmul.f32 1.442695, %v3709_v34  ;;  %v3729_v52 = vmul.f32 1.442695, %v3708_v53  ;;  %v3757_v33 = vsel %vm803_vm0, %v10652_v42, 0.0 }
 0xa5a   :  { %v3681_v0 = vpop.xlane.xlu0 %3680  ;;  %v3678_v38 = vpop.xlane.xlu1 %3677  ;;  %3758 = vadd.xlane.f32.xlu0 %v3757_v33  ;;  %v3754_v37 = vsel %vm803_vm0, %v10654_v40, 0.0 }
 0xa5b   :  { %9131 = vpow2.f32 %v3731_v50  ;;  %v3711_v55 = vsub.f32 %v10610_v56, %v3681_v0  ;;  %v3710_v10 = vsub.f32 %v10612_v41, %v3678_v38  ;;  %3755 = vadd.xlane.f32.xlu1 %v3754_v37 }
 0xa5c   :  { %v10662_v12 = vpop.eup %9127  ;;  %9133 = vpow2.f32 %v3729_v52 }
 0xa5d   :  { %v3735_v60 = vmul.f32 1.442695, %v3711_v55  ;;  %v3733_v1 = vmul.f32 1.442695, %v3710_v10  ;;  %v3760_v17 = vsel %vm803_vm0, %v10662_v12, 0.0 }
 0xa5e   :  { %v3687_v59 = vpop.xlane.xlu0 %3686  ;;  %v3684_v48 = vpop.xlane.xlu1 %3683 }
 0xa5f   :  { %9135 = vpow2.f32 %v3735_v60  ;;  %v3713_v14 = vsub.f32 %v10607_v51, %v3687_v59  ;;  %v3712_v32 = vsub.f32 %v10623_v57, %v3684_v48  ;;  %3761 = vadd.xlane.f32.xlu1 %v3760_v17 }
 0xa60   :  { %9137 = vpow2.f32 %v3733_v1 }
 0xa61   :  { %v3739_v56 = vmul.f32 1.442695, %v3713_v14  ;;  %v3737_v41 = vmul.f32 1.442695, %v3712_v32 }
 0xa62   :  { %v3690_v4 = vpop.xlane.xlu1 %3689  ;;  %v3693_v15 = vpop.xlane.xlu0 %3692 }
 0xa63   :  { %9139 = vpow2.f32 %v3739_v56  ;;  %v3714_v34 = vsub.f32 %v10617_v2, %v3690_v4  ;;  %v3715_v53 = vsub.f32 %v10631_v54, %v3693_v15 }
 0xa64   :  { %v10670_v50 = vpop.eup %9129  ;;  %9141 = vpow2.f32 %v3737_v41 }
 0xa65   :  { %v3741_v52 = vmul.f32 1.442695, %v3714_v34  ;;  %v3743_v33 = vmul.f32 1.442695, %v3715_v53  ;;  %v3763_v51 = vsel %vm803_vm0, %v10670_v50, 0.0 }
 0xa66   :  { %3764 = vadd.xlane.f32.xlu0 %v3763_v51  ;;  %v3699_v57 = vpop.xlane.xlu0 %3698  ;;  %v3696_v0 = vpop.xlane.xlu1 %3695 }
 0xa67   :  { %9143 = vpow2.f32 %v3741_v52  ;;  %v3717_v38 = vsub.f32 %v10629_v19, %v3699_v57  ;;  %v3716_v37 = vsub.f32 %v10639_v27, %v3696_v0 }
 0xa68   :  { %v10676_v55 = vpop.eup %9131  ;;  %9145 = vpow2.f32 %v3743_v33 }
 0xa69   :  { %v10678_v2 = vpop.eup %9133  ;;  %v3747_v54 = vmul.f32 1.442695, %v3717_v38  ;;  %v3745_v10 = vmul.f32 1.442695, %v3716_v37  ;;  %v3769_v60 = vsel %vm803_vm0, %v10676_v55, 0.0 }
 0xa6a   :  { %3770 = vadd.xlane.f32.xlu0 %v3769_v60  ;;  %v3766_v1 = vsel %vm803_vm0, %v10678_v2, 0.0  ;;  %v3702_v17 = vpop.xlane.xlu1 %3701 }
 0xa6b   :  { %9147 = vpow2.f32 %v3747_v54  ;;  %3767 = vadd.xlane.f32.xlu1 %v3766_v1  ;;  %v3718_v19 = vsub.f32 %v10637_v26, %v3702_v17 }
 0xa6c   :  { %v10685_v27 = vpop.eup %9135  ;;  %9149 = vpow2.f32 %v3745_v10 }
 0xa6d   :  { %v10687_v59 = vpop.eup %9137  ;;  %v3749_v48 = vmul.f32 1.442695, %v3718_v19  ;;  %v3775_v14 = vsel %vm803_vm0, %v10685_v27, 0.0 }
 0xa6e   :  { %3776 = vadd.xlane.f32.xlu0 %v3775_v14  ;;  %v3772_v32 = vsel %vm803_vm0, %v10687_v59, 0.0 }
 0xa6f   :  { %9151 = vpow2.f32 %v3749_v48  ;;  %3773 = vadd.xlane.f32.xlu1 %v3772_v32 }
 0xa70   :  { %v10693_v56 = vpop.eup %9139 }
 0xa71   :  { %v10695_v41 = vpop.eup %9141  ;;  %v3781_v26 = vsel %vm803_vm0, %v10693_v56, 0.0 }
 0xa72   :  { %3782 = vadd.xlane.f32.xlu0 %v3781_v26  ;;  %v3778_v4 = vsel %vm803_vm0, %v10695_v41, 0.0 }
 0xa73   :  { %3779 = vadd.xlane.f32.xlu1 %v3778_v4 }
 0xa74   :  { %v10701_v15 = vpop.eup %9143 }
 0xa75   :  { %v10703_v34 = vpop.eup %9145  ;;  %v3784_v53 = vsel %vm803_vm0, %v10701_v15, 0.0 }
 0xa76   :  { %v3787_v52 = vsel %vm803_vm0, %v10703_v34, 0.0 }
 0xa77   :  { %3788 = vadd.xlane.f32.xlu0 %v3787_v52  ;;  %3785 = vadd.xlane.f32.xlu1 %v3784_v53 }
 0xa78   :  { %v10709_v33 = vpop.eup %9147 }
 0xa79   :  { %v10711_v51 = vpop.eup %9149  ;;  %v3793_v57 = vsel %vm803_vm0, %v10709_v33, 0.0 }
 0xa7a   :  { %v3790_v0 = vsel %vm803_vm0, %v10711_v51, 0.0 }
 0xa7b   :  { %3794 = vadd.xlane.f32.xlu0 %v3793_v57  ;;  %3791 = vadd.xlane.f32.xlu1 %v3790_v0 }
 0xa7c   :  { %v10717_v38 = vpop.eup %9151 }
 0xa7d   :  { %v3796_v37 = vsel %vm803_vm0, %v10717_v38, 0.0 }
 0xa7f   :  { %3797 = vadd.xlane.f32.xlu1 %v3796_v37 }
 0xadf   :  { %v3753_v54 = vpop.xlane.xlu0 %3752 }
 0xae0   :  { %9153 = vrcp.f32 %v3753_v54 }
 0xae3   :  { %v3759_v10 = vpop.xlane.xlu0 %3758 }
 0xae4   :  { %v3756_v60 = vpop.xlane.xlu1 %3755 }
 0xae5   :  { %9155 = vrcp.f32 %v3756_v60 }
 0xae6   :  { %9157 = vrcp.f32 %v3759_v10 }
 0xae8   :  { %v3762_v1 = vpop.xlane.xlu1 %3761 }
 0xae9   :  { %9159 = vrcp.f32 %v3762_v1 }
 0xaed   :  { %v9154_v19 = vpop.eup %9153 }
 0xaee   :  { %v3815_v32 = vmul.f32 %v9154_v19, %v10647_v28  ;;  %v3407_v28 = vpack.c.bf16 %v10591_v23, %v10587_v5 }
 0xaef   :  { %v3765_v17 = vpop.xlane.xlu0 %3764 }
 0xaf0   :  { %9161 = vrcp.f32 %v3765_v17 }
 0xaf2   :  { %v9156_v48 = vpop.eup %9155 }
 0xaf3   :  { %v3771_v14 = vpop.xlane.xlu0 %3770  ;;  %v3816_v26 = vmul.f32 %v9156_v48, %v10654_v40  ;;  %v9158_v4 = vpop.eup %9157 }
 0xaf4   :  { %v3768_v53 = vpop.xlane.xlu1 %3767  ;;  %v3817_v0 = vmul.f32 %v9158_v4, %v10652_v42 }
 0xaf5   :  { %9163 = vrcp.f32 %v3768_v53  ;;  %v3831_v52 = vpack.c.bf16 %v3816_v26, %v3815_v32 }
 0xaf6   :  { %v9160_v57 = vpop.eup %9159  ;;  %9165 = vrcp.f32 %v3771_v14 }
 0xaf7   :  { %v3818_v37 = vmul.f32 %v9160_v57, %v10662_v12  ;;  %v3777_v54 = vpop.xlane.xlu0 %3776  ;;  %8513 = vmatprep.mubr.msk.bf16.mxu0 %vm803_vm0, %v3831_v52 }
 0xaf8   :  { %v3774_v10 = vpop.xlane.xlu1 %3773 }
 0xaf9   :  { %v3832_v60 = vpack.c.bf16 %v3818_v37, %v3817_v0  ;;  %9167 = vrcp.f32 %v3774_v10  ;;  %v8853_v10 = vld [vmem:[%s12247_s3 + $0xf8] sm:$0xff]  }
 0xafa   :  { %9169 = vrcp.f32 %v3777_v54 }
 0xafb   :  { %v3783_v40 = vpop.xlane.xlu0 %3782  ;;  %8514 = vmatmul.mubr.msk.bf16.vlgmr.msra.gmra.mxu0 %vm803_vm0, %v3832_v60 }
 0xafc   :  { %8526 = vmatpush3.bf16.msra.mxu0 %v10589_v21  ;;  %v3780_v1 = vpop.xlane.xlu1 %3779 }
 0xafd   :  { %9171 = vrcp.f32 %v3780_v1  ;;  %8527 = vmatprep.subr.bf16.mxu0 %v3407_v28  ;;  %v9162_v42 = vpop.eup %9161 }
 0xafe   :  { %9173 = vrcp.f32 %v3783_v40  ;;  %v3819_v48 = vmul.f32 %v9162_v42, %v10670_v50 }
 0xb00   :  { %v3789_v12 = vpop.xlane.xlu0 %3788  ;;  %8528 = vmatpush3.bf16.msra.mxu0 %v3407_v28  ;;  %v3786_v17 = vpop.xlane.xlu1 %3785 }
 0xb01   :  { %9175 = vrcp.f32 %v3786_v17 }
 0xb02   :  { %v9164_v19 = vpop.eup %9163  ;;  %9177 = vrcp.f32 %v3789_v12 }
 0xb03   :  { %v3820_v5 = vmul.f32 %v9164_v19, %v10678_v2  ;;  %v9166_v23 = vpop.eup %9165  ;;  %v3409_v2 = vpack.c.bf16 %v10603_v61, %v10594_v45  ;;  %v8854_v19 = vld [vmem:[%s12247_s3 + $0xf0] sm:$0xff]  }
 0xb04   :  { %v3795_v14 = vpop.xlane.xlu0 %3794  ;;  %v3792_v32 = vpop.xlane.xlu1 %3791  ;;  %v3821_v4 = vmul.f32 %v9166_v23, %v10676_v55  ;;  %v8861_v23 = vld [vmem:[%s12249_s5 + $0xf8] sm:$0xff]  }
 0xb05   :  { %v3833_v26 = vpack.c.bf16 %v3820_v5, %v3819_v48  ;;  %9179 = vrcp.f32 %v3792_v32  ;;  %v8859_v48 = vld [vmem:[%s12247_s3 + $0xc8] sm:$0xff]   ;;  %v8860_v5 = vld [vmem:[%s12247_s3 + $0xc0] sm:$0xff]  }
 0xb06   :  { %v9168_v21 = vpop.eup %9167  ;;  %9181 = vrcp.f32 %v3795_v14  ;;  %v8862_v14 = vld [vmem:[%s12249_s5 + $0xf0] sm:$0xff]   ;;  %v8863_v32 = vld [vmem:[%s12249_s5 + $0xe8] sm:$0xff]  }
 0xb07   :  { %v3822_v53 = vmul.f32 %v9168_v21, %v10687_v59  ;;  %8521 = vmatprep.mubr.msk.bf16.mxu1 %vm803_vm0, %v3833_v26  ;;  %v9170_v52 = vpop.eup %9169  ;;  %v8869_v26 = vld [vmem:[%s12250_s6 + $0x28] sm:$0xff]   ;;  %v8864_v21 = vld [vmem:[%s12249_s5 + $0xe0] sm:$0xff]  }
 0xb08   :  { %v3798_v57 = vpop.xlane.xlu1 %3797  ;;  %v3823_v37 = vmul.f32 %v9170_v52, %v10685_v27  ;;  %8541 = vmatprep.subr.bf16.mxu0 %v8869_v26  ;;  %v8866_v52 = vld [vmem:[%s12249_s5 + $0xd0] sm:$0xff]  }
 0xb09   :  { %v3834_v0 = vpack.c.bf16 %v3822_v53, %v3821_v4  ;;  %9183 = vrcp.f32 %v3798_v57  ;;  %v8870_v4 = vld [vmem:[%s12250_s6 + $0x20] sm:$0xff]   ;;  %v8865_v53 = vld [vmem:[%s12249_s5 + $0xd8] sm:$0xff]  }
 0xb0a   :  { %v9172_v50 = vpop.eup %9171  ;;  %v8871_v57 = vld [vmem:[%s12248_s4 + $0xf8] sm:$0xff]  }
 0xb0b   :  { %8522 = vmatmul.mubr.msk.bf16.vlgmr.msra.gmra.mxu1 %vm803_vm0, %v3834_v0  ;;  %v3824_v54 = vmul.f32 %v9172_v50, %v10695_v41  ;;  %v9174_v55 = vpop.eup %9173  ;;  %v8867_v0 = vld [vmem:[%s12249_s5 + $0xc8] sm:$0xff]   ;;  %v8868_v50 = vld [vmem:[%s12249_s5 + $0xc0] sm:$0xff]  }
 0xb0c   :  { %8534 = vmatpush3.bf16.msra.mxu1 %v10596_v29  ;;  %v3825_v45 = vmul.f32 %v9174_v55, %v10693_v56 }
 0xb0d   :  { %8535 = vmatprep.subr.bf16.mxu1 %v3409_v2  ;;  %v3835_v59 = vpack.c.bf16 %v3824_v54, %v3823_v37 }
 0xb0e   :  { %v9176_v60 = vpop.eup %9175 }
 0xb0f   :  { %8529 = vmatprep.mubr.msk.bf16.mxu0 %vm803_vm0, %v3835_v59  ;;  %v3826_v61 = vmul.f32 %v9176_v60, %v10701_v15  ;;  %v9178_v27 = vpop.eup %9177  ;;  %v8872_v60 = vld [vmem:[%s12248_s4 + $0xf0] sm:$0xff]  }
 0xb10   :  { %8536 = vmatpush3.bf16.msra.mxu1 %v3409_v2  ;;  %v3827_v40 = vmul.f32 %v9178_v27, %v10703_v34  ;;  %v8855_v34 = vld [vmem:[%s12247_s3 + $0xe8] sm:$0xff]   ;;  %v8874_v27 = vld [vmem:[%s12248_s4 + $0xe0] sm:$0xff]  }
 0xb11   :  { %8561 = vmatprep.subr.bf16.mxu1 %v8853_v10  ;;  %v3836_v41 = vpack.c.bf16 %v3826_v61, %v3825_v45  ;;  %v8873_v45 = vld [vmem:[%s12248_s4 + $0xe8] sm:$0xff]  }
 0xb12   :  { %v9180_v28 = vpop.eup %9179 }
 0xb13   :  { %v9182_v29 = vpop.eup %9181  ;;  %8530 = vmatmul.mubr.msk.bf16.vlgmr.msra.gmra.mxu0 %vm803_vm0, %v3836_v41  ;;  %v3828_v1 = vmul.f32 %v9180_v28, %v10711_v51  ;;  %v8857_v51 = vld [vmem:[%s12247_s3 + $0xd8] sm:$0xff]  }
 0xb14   :  { %v3829_v17 = vmul.f32 %v9182_v29, %v10709_v33  ;;  %v8856_v33 = vld [vmem:[%s12247_s3 + $0xe0] sm:$0xff]   ;;  %8542 = vmatpush3.bf16.msra.mxu0 %v8869_v26  ;;  %v8875_v29 = vld [vmem:[%s12248_s4 + $0xd8] sm:$0xff]  }
 0xb15   :  { %v3837_v12 = vpack.c.bf16 %v3828_v1, %v3827_v40  ;;  %8543 = vmatprep.subr.bf16.mxu0 %v8870_v4 }
 0xb16   :  { %v9184_v42 = vpop.eup %9183 }
 0xb17   :  { %v3830_v56 = vmul.f32 %v9184_v42, %v10717_v38  ;;  %8537 = vmatprep.mubr.msk.bf16.mxu1 %vm803_vm0, %v3837_v12  ;;  %v8858_v38 = vld [vmem:[%s12247_s3 + $0xd0] sm:$0xff]  }
 0xb18   :  { %8544 = vmatpush3.bf16.msra.mxu0 %v8870_v4  ;;  %v8876_v12 = vld [vmem:[%s12248_s4 + $0xd0] sm:$0xff]  }
 0xb19   :  { %v3838_v15 = vpack.c.bf16 %v3830_v56, %v3829_v17  ;;  %8593 = vmatprep.subr.bf16.mxu0 %v8871_v57 }
 0xb1b   :  { %8538 = vmatmul.mubr.msk.bf16.vlgmr.msra.gmra.mxu1 %vm803_vm0, %v3838_v15  ;;  %v8877_v15 = vld [vmem:[%s12248_s4 + $0xc8] sm:$0xff]  }
 0xb1c   :  { %8562 = vmatpush3.bf16.msra.mxu1 %v8853_v10  ;;  %8577 = vmatprep.mubr.bf16.mxu1 %v9744_v49 }
 0xb1d   :  { %8563 = vmatprep.subr.bf16.mxu1 %v8854_v19 }
 0xb20   :  { %8564 = vmatpush3.bf16.msra.mxu1 %v8854_v19 }
 0xb21   :  { %8565 = vmatprep.subr.bf16.mxu1 %v8855_v34 }
 0xb24   :  { %8566 = vmatpush3.bf16.msra.mxu1 %v8855_v34 }
 0xb25   :  { %8567 = vmatprep.subr.bf16.mxu1 %v8856_v33 }
 0xb28   :  { %8568 = vmatpush3.bf16.msra.mxu1 %v8856_v33 }
 0xb29   :  { %8569 = vmatprep.subr.bf16.mxu1 %v8857_v51 }
 0xb2c   :  { %8570 = vmatpush3.bf16.msra.mxu1 %v8857_v51 }
 0xb2d   :  { %8571 = vmatprep.subr.bf16.mxu1 %v8858_v38 }
 0xb30   :  { %8572 = vmatpush3.bf16.msra.mxu1 %v8858_v38 }
 0xb31   :  { %8573 = vmatprep.subr.bf16.mxu1 %v8859_v48 }
 0xb34   :  { %8574 = vmatpush3.bf16.msra.mxu1 %v8859_v48  ;;  %v8878_v48 = vld [vmem:[%s12248_s4 + $0xc0] sm:$0xff]  }
 0xb35   :  { %8575 = vmatprep.subr.bf16.mxu1 %v8860_v5 }
 0xb38   :  { %8576 = vmatpush3.bf16.msra.mxu1 %v8860_v5 }
 0xb39   :  { %8625 = vmatprep.subr.bf16.mxu1 %v8861_v23 }
 0xb3b   :  { %8578 = vmatmul.mubr.bf16.vlgmr.msra.gmra.mxu1 %v9754_v63 }
 0xb3c   :  { %8581 = vmatprep.mubr.bf16.mxu1 %v9768_v18  ;;  %8626 = vmatpush3.bf16.msra.mxu1 %v8861_v23 }
 0xb3d   :  { %8627 = vmatprep.subr.bf16.mxu1 %v8862_v14 }
 0xb40   :  { %8628 = vmatpush3.bf16.msra.mxu1 %v8862_v14 }
 0xb41   :  { %8629 = vmatprep.subr.bf16.mxu1 %v8863_v32 }
 0xb43   :  { %8582 = vmatmul.mubr.bf16.gmra.mxu1 %v9781_v20 }
 0xb44   :  { %8585 = vmatprep.mubr.bf16.mxu1 %v9794_v35  ;;  %8630 = vmatpush3.bf16.msra.mxu1 %v8863_v32 }
 0xb45   :  { %8631 = vmatprep.subr.bf16.mxu1 %v8864_v21 }
 0xb48   :  { %8632 = vmatpush3.bf16.msra.mxu1 %v8864_v21 }
 0xb49   :  { %8633 = vmatprep.subr.bf16.mxu1 %v8865_v53 }
 0xb4b   :  { %8586 = vmatmul.mubr.bf16.gmra.mxu1 %v9807_v46 }
 0xb4c   :  { %8589 = vmatprep.mubr.bf16.mxu1 %v9819_v24  ;;  %8634 = vmatpush3.bf16.msra.mxu1 %v8865_v53 }
 0xb4d   :  { %8635 = vmatprep.subr.bf16.mxu1 %v8866_v52 }
 0xb50   :  { %8636 = vmatpush3.bf16.msra.mxu1 %v8866_v52 }
 0xb51   :  { %8637 = vmatprep.subr.bf16.mxu1 %v8867_v0 }
 0xb53   :  { %8590 = vmatmul.mubr.bf16.gmra.mxu1 %v9829_v25 }
 0xb54   :  { %8638 = vmatpush3.bf16.msra.mxu1 %v8867_v0  ;;  %8641 = vmatprep.mubr.bf16.mxu1 %v9744_v49 }
 0xb55   :  { %8639 = vmatprep.subr.bf16.mxu1 %v8868_v50 }
 0xb58   :  { %8640 = vmatpush3.bf16.msra.mxu1 %v8868_v50 }
 0xb5b   :  { %8642 = vmatmul.mubr.bf16.vlgmr.msra.gmra.mxu1 %v9754_v63 }
 0xb5c   :  { %8645 = vmatprep.mubr.bf16.mxu1 %v9768_v18 }
 0xb63   :  { %8646 = vmatmul.mubr.bf16.gmra.mxu1 %v9781_v20 }
 0xb64   :  { %8649 = vmatprep.mubr.bf16.mxu1 %v9794_v35 }
 0xb6b   :  { %8650 = vmatmul.mubr.bf16.gmra.mxu1 %v9807_v46 }
 0xb6c   :  { %8653 = vmatprep.mubr.bf16.mxu1 %v9819_v24 }
 0xb73   :  { %8654 = vmatmul.mubr.bf16.gmra.mxu1 %v9829_v25 }
 0xbbb   :  { %v8515_v2 = vpop.f32.mrf.mxu0 }
 0xbbd   :  { %v3879_v37 = vpop.f32.mrf.mxu0 }
 0xbbf   :  { %v8516_v54 = vpop.f32.mrf.mxu0 }
 0xbc0   :  { %v4060_v10 = vpack.c.bf16 %v8516_v54, %v8515_v2 }
 0xbc1   :  { %v3882_v55 = vpop.f32.mrf.mxu0 }
 0xbc2   :  { %v4059_v59 = vpack.c.bf16 %v3882_v55, %v3879_v37 }
 0xbc4   :  { %8545 = vmatprep.mubr.msk.bf16.mxu0 %vm803_vm0, %v4059_v59 }
 0xbc5   :  { %8546 = vmatmul.mubr.msk.bf16.vlgmr.msra.gmra.mxu0 %vm803_vm0, %v4060_v10 }
 0xbc6   :  { %8594 = vmatpush3.bf16.msra.mxu0 %v8871_v57 }
 0xbc7   :  { %8595 = vmatprep.subr.bf16.mxu0 %v8872_v60 }
 0xbca   :  { %8596 = vmatpush3.bf16.msra.mxu0 %v8872_v60 }
 0xbcb   :  { %v8523_v61 = vpop.f32.mrf.mxu1  ;;  %8597 = vmatprep.subr.bf16.mxu0 %v8873_v45 }
 0xbcd   :  { %v3934_v41 = vpop.f32.mrf.mxu1 }
 0xbce   :  { %8598 = vmatpush3.bf16.msra.mxu0 %v8873_v45 }
 0xbcf   :  { %v8524_v28 = vpop.f32.mrf.mxu1  ;;  %8599 = vmatprep.subr.bf16.mxu0 %v8874_v27 }
 0xbd0   :  { %v4062_v42 = vpack.c.bf16 %v8524_v28, %v8523_v61 }
 0xbd1   :  { %v3937_v40 = vpop.f32.mrf.mxu1 }
 0xbd2   :  { %v4061_v1 = vpack.c.bf16 %v3937_v40, %v3934_v41  ;;  %8600 = vmatpush3.bf16.msra.mxu0 %v8874_v27 }
 0xbd3   :  { %8601 = vmatprep.subr.bf16.mxu0 %v8875_v29  ;;  %v8531_v17 = vpop.f32.mrf.mxu0 }
 0xbd4   :  { %8549 = vmatprep.mubr.msk.bf16.mxu0 %vm803_vm0, %v4061_v1 }
 0xbd5   :  { %8550 = vmatmul.mubr.msk.bf16.gmra.mxu0 %vm803_vm0, %v4062_v42  ;;  %v3989_v56 = vpop.f32.mrf.mxu0 }
 0xbd6   :  { %8602 = vmatpush3.bf16.msra.mxu0 %v8875_v29 }
 0xbd7   :  { %8603 = vmatprep.subr.bf16.mxu0 %v8876_v12  ;;  %v8532_v19 = vpop.f32.mrf.mxu0 }
 0xbd8   :  { %v4064_v38 = vpack.c.bf16 %v8532_v19, %v8531_v17 }
 0xbd9   :  { %v3992_v34 = vpop.f32.mrf.mxu0 }
 0xbda   :  { %8604 = vmatpush3.bf16.msra.mxu0 %v8876_v12  ;;  %v4063_v33 = vpack.c.bf16 %v3992_v34, %v3989_v56  ;;  %v2839_v34 = vadd.f32 %v10463_v44, %v10542_v6  ;;  %v2855_v44 = vadd.f32 %v10476_v58, %v10550_v11  ;;  %v2871_v58 = vadd.f32 %v10492_v39, %v10558_v8 }
 0xbdb   :  { %v8539_v51 = vpop.f32.mrf.mxu1  ;;  %8605 = vmatprep.subr.bf16.mxu0 %v8877_v15 }
 0xbdc   :  { %8553 = vmatprep.mubr.msk.bf16.mxu0 %vm803_vm0, %v4063_v33 }
 0xbdd   :  { %v4044_v5 = vpop.f32.mrf.mxu1  ;;  %8554 = vmatmul.mubr.msk.bf16.gmra.mxu0 %vm803_vm0, %v4064_v38  ;;  %v2850_v38 = vadd.f32 %v10467_v9, %v10544_v62  ;;  %v2866_v9 = vadd.f32 %v10480_v13, %v10552_v7  ;;  %v2882_v13 = vadd.f32 %v10496_v22, %v10560_v30 }
 0xbde   :  { %8606 = vmatpush3.bf16.msra.mxu0 %v8877_v15  ;;  %v2847_v15 = vadd.f32 %v10460_v43, %v10540_v31  ;;  %v2863_v43 = vadd.f32 %v10471_v3, %v10548_v47  ;;  %v2879_v3 = vadd.f32 %v10487_v16, %v10556_v36 }
 0xbdf   :  { %v8540_v23 = vpop.f32.mrf.mxu1  ;;  %8607 = vmatprep.subr.bf16.mxu0 %v8878_v48 }
 0xbe0   :  { %v4066_v26 = vpack.c.bf16 %v8540_v23, %v8539_v51 }
 0xbe1   :  { %v4047_v14 = vpop.f32.mrf.mxu1 }
 0xbe2   :  { %v4065_v32 = vpack.c.bf16 %v4047_v14, %v4044_v5  ;;  %8608 = vmatpush3.bf16.msra.mxu0 %v8878_v48 }
 0xbe4   :  { %8557 = vmatprep.mubr.msk.bf16.mxu0 %vm803_vm0, %v4065_v32 }
 0xbe5   :  { %8558 = vmatmul.mubr.msk.bf16.gmra.mxu0 %vm803_vm0, %v4066_v26 }
 0xbe6   :  { %8609 = vmatprep.mubr.bf16.mxu0 %v9744_v49 }
 0xbed   :  { %8610 = vmatmul.mubr.bf16.vlgmr.msra.gmra.mxu0 %v9754_v63 }
 0xbee   :  { %8613 = vmatprep.mubr.bf16.mxu0 %v9768_v18 }
 0xbf5   :  { %8614 = vmatmul.mubr.bf16.gmra.mxu0 %v9781_v20 }
 0xbf6   :  { %8617 = vmatprep.mubr.bf16.mxu0 %v9794_v35 }
 0xbfb   :  { %v10858_v21 = vpop.f32.mrf.mxu1 }
 0xbfd   :  { %v4320_v4 = vpop.f32.mrf.mxu1  ;;  %8618 = vmatmul.mubr.bf16.gmra.mxu0 %v9807_v46 }
 0xbfe   :  { %8621 = vmatprep.mubr.bf16.mxu0 %v9819_v24 }
 0xbff   :  { %v10861_v53 = vpop.f32.mrf.mxu1 }
 0xc00   :  { %v4708_v49 = vpack.c.bf16 %v10861_v53, %v10858_v21 }
 0xc01   :  { %v4323_v52 = vpop.f32.mrf.mxu1 }
 0xc02   :  { %v4707_v18 = vpack.c.bf16 %v4323_v52, %v4320_v4 }
 0xc03   :  { %v10866_v63 = vpop.f32.mrf.mxu1 }
 0xc05   :  { %v10868_v57 = vpop.f32.mrf.mxu1  ;;  %8622 = vmatmul.mubr.bf16.gmra.mxu0 %v9829_v25 }
 0xc06   :  { %8661 = vmatprep.mubr.msk.bf16.mxu0 %vm803_vm0, %v4707_v18 }
 0xc07   :  { %v10871_v20 = vpop.f32.mrf.mxu1 }
 0xc08   :  { %v4710_v35 = vpack.c.bf16 %v10871_v20, %v10866_v63 }
 0xc09   :  { %v10876_v46 = vpop.f32.mrf.mxu1 }
 0xc0b   :  { %v10878_v24 = vpop.f32.mrf.mxu1 }
 0xc0d   :  { %v4352_v0 = vpop.f32.mrf.mxu1 }
 0xc0f   :  { %v10880_v50 = vpop.f32.mrf.mxu1 }
 0xc10   :  { %v4712_v2 = vpack.c.bf16 %v10880_v50, %v10878_v24 }
 0xc11   :  { %v4355_v37 = vpop.f32.mrf.mxu1 }
 0xc12   :  { %v4711_v54 = vpack.c.bf16 %v4355_v37, %v4352_v0 }
 0xc13   :  { %v10884_v25 = vpop.f32.mrf.mxu1 }
 0xc14   :  { %8677 = vmatprep.mubr.msk.bf16.mxu1 %vm803_vm0, %v4711_v54 }
 0xc15   :  { %v10887_v55 = vpop.f32.mrf.mxu1 }
 0xc17   :  { %v10889_v59 = vpop.f32.mrf.mxu1 }
 0xc19   :  { %v10891_v10 = vpop.f32.mrf.mxu1 }
 0xc1b   :  { %v10893_v60 = vpop.f32.mrf.mxu1 }
 0xc1d   :  { %v10895_v45 = vpop.f32.mrf.mxu1 }
 0xc1f   :  { %v10897_v61 = vpop.f32.mrf.mxu1 }
 0xc20   :  { %v4724_v21 = vpack.c.bf16 %v10897_v61, %v10893_v60 }
 0xc21   :  { %v10899_v27 = vpop.f32.mrf.mxu1 }
 0xc22   :  { %v4723_v60 = vpack.c.bf16 %v10899_v27, %v10895_v45 }
 0xc23   :  { %v10901_v41 = vpop.f32.mrf.mxu1 }
 0xc25   :  { %v10903_v28 = vpop.f32.mrf.mxu1 }
 0xc27   :  { %v10905_v29 = vpop.f32.mrf.mxu1 }
 0xc28   :  { %v4726_v20 = vpack.c.bf16 %v10905_v29, %v10901_v41 }
 0xc29   :  { %v10907_v40 = vpop.f32.mrf.mxu1 }
 0xc2b   :  { %v10909_v1 = vpop.f32.mrf.mxu1 }
 0xc2d   :  { %v4676_v42 = vpop.f32.mrf.mxu1 }
 0xc2f   :  { %v10911_v12 = vpop.f32.mrf.mxu1 }
 0xc30   :  { %v11010_v63 = vpack.c.bf16 %v10911_v12, %v10909_v1 }
 0xc31   :  { %v4679_v17 = vpop.f32.mrf.mxu1 }
 0xc32   :  { %v10913_v56 = vpack.c.bf16 %v4679_v17, %v4676_v42  ;;  %v12286_v42 = vld [vmem:[#allocation15_spill] sm:$0xff]  ;;  %v12287_v17 = vld [vmem:[#allocation8_spill] sm:$0xff] }
 0xc33   :  { %v2895_v16 = vadd.f32 %v12287_v17, %v12286_v42  ;;  %v8655_v24 = vpop.f32.mrf.mxu1 }
 0xc35   :  { %v11016_v50 = vpop.f32.mrf.mxu1 }
 0xc85   :  { %v8547_v19 = vpop.f32.mrf.mxu0 }
 0xc86   :  { %v10919_v33 = vadd.f32 %v8547_v19, %v2847_v15  ;;  %v12288_v15 = vld [vmem:[#allocation16_spill] sm:$0xff]  ;;  %v12289_v19 = vld [vmem:[#allocation9_spill] sm:$0xff] }
 0xc87   :  { %v4142_v51 = vpop.f32.mrf.mxu0  ;;  %v2887_v39 = vadd.f32 %v12289_v19, %v12288_v15 }
 0xc88   :  { %v10923_v48 = vadd.f32 %v4142_v51, %v2839_v34  ;;  %v12290_v51 = vld [vmem:[#allocation17_spill] sm:$0xff] }
 0xc89   :  { %v8548_v5 = vpop.f32.mrf.mxu0 }
 0xc8a   :  { %v10925_v23 = vadd.f32 %v8548_v5, %v2850_v38  ;;  %v12291_v38 = vld [vmem:[#allocation10_spill] sm:$0xff] }
 0xc8b   :  { %v10927_v14 = vpop.f32.mrf.mxu0  ;;  %v2898_v22 = vadd.f32 %v12291_v38, %v12290_v51 }
 0xc95   :  { %v8551_v31 = vpop.f32.mrf.mxu0 }
 0xc96   :  { %v10933_v6 = vadd.f32 %v8551_v31, %v2863_v43 }
 0xc97   :  { %v4158_v32 = vpop.f32.mrf.mxu0 }
 0xc98   :  { %v10937_v62 = vadd.f32 %v4158_v32, %v2855_v44 }
 0xc99   :  { %v8552_v26 = vpop.f32.mrf.mxu0 }
 0xc9a   :  { %v10939_v4 = vadd.f32 %v8552_v26, %v2866_v9 }
 0xc9b   :  { %v10941_v52 = vpop.f32.mrf.mxu0 }
 0xc9d   :  { %v8555_v47 = vpop.f32.mrf.mxu0 }
 0xc9e   :  { %v10947_v11 = vadd.f32 %v8555_v47, %v2879_v3 }
 0xc9f   :  { %v4174_v18 = vpop.f32.mrf.mxu0 }
 0xca0   :  { %v10951_v7 = vadd.f32 %v4174_v18, %v2871_v58 }
 0xca1   :  { %v8556_v0 = vpop.f32.mrf.mxu0 }
 0xca2   :  { %v10953_v37 = vadd.f32 %v8556_v0, %v2882_v13 }
 0xca3   :  { %v10955_v54 = vpop.f32.mrf.mxu0 }
 0xca5   :  { %v8559_v36 = vpop.f32.mrf.mxu0 }
 0xca6   :  { %v10961_v8 = vadd.f32 %v8559_v36, %v2895_v16 }
 0xca7   :  { %v4190_v34 = vpop.f32.mrf.mxu0 }
 0xca8   :  { %v10965_v30 = vadd.f32 %v4190_v34, %v2887_v39  ;;  %v4709_v34 = vpack.c.bf16 %v10876_v46, %v10868_v57 }
 0xca9   :  { %v8560_v5 = vpop.f32.mrf.mxu0 }
 0xcaa   :  { %v10967_v43 = vadd.f32 %v8560_v5, %v2898_v22 }
 0xcab   :  { %v10969_v31 = vpop.f32.mrf.mxu0 }
 0xcad   :  { %v8611_v44 = vpop.f32.mrf.mxu0 }
 0xcaf   :  { %v4482_v32 = vpop.f32.mrf.mxu0 }
 0xcb1   :  { %v8612_v9 = vpop.f32.mrf.mxu0 }
 0xcb2   :  { %v4716_v26 = vpack.c.bf16 %v8612_v9, %v8611_v44 }
 0xcb3   :  { %v4485_v3 = vpop.f32.mrf.mxu0 }
 0xcb4   :  { %v4741_v47 = vsel %vm803_vm0, %v4716_v26, 0  ;;  %v4715_v58 = vpack.c.bf16 %v4485_v3, %v4482_v32  ;;  %8765 = vmatprep.subr.msk.bf16.mxu0 %vm803_vm0, %v4716_v26  ;;  %v4713_v3 = vpack.c.bf16 %v10891_v10, %v10887_v55  ;;  %v4725_v55 = vpack.c.bf16 %v10907_v40, %v10903_v28  ;;  %v8656_v10 = vpop.f32.mrf.mxu1 }
 0xcb5   :  { %v8615_v18 = vpop.f32.mrf.mxu0  ;;  %8658 = vmatpush3.bf16.xpose.msra.mxu0 %v4741_v47  ;;  %v11023_v45 = vpack.c.bf16 %v8656_v10, %v8655_v24 }
 0xcb6   :  { %8766 = vmatprep.subr.msk.bf16.mxu0 %vm803_vm0, %v4715_v58  ;;  %v4738_v17 = vsel %vm803_vm0, %v4715_v58, 0  ;;  %v11030_v12 = vpop.f32.mrf.mxu1 }
 0xcb7   :  { %v4498_v13 = vpop.f32.mrf.mxu0 }
 0xcb9   :  { %v8616_v0 = vpop.f32.mrf.mxu0 }
 0xcba   :  { %v4718_v16 = vpack.c.bf16 %v8616_v0, %v8615_v18 }
 0xcbb   :  { %v4501_v42 = vpop.f32.mrf.mxu0 }
 0xcbc   :  { %v4802_v38 = vsel %vm803_vm0, %v4718_v16, 0  ;;  %v4717_v22 = vpack.c.bf16 %v4501_v42, %v4498_v13 }
 0xcbd   :  { %v8619_v36 = vpop.f32.mrf.mxu0  ;;  %8660 = vmatpush3.bf16.xpose.msra.mxu0 %v4738_v17 }
 0xcbe   :  { %8767 = vmatprep.subr.msk.bf16.mxu0 %vm803_vm0, %v4718_v16  ;;  %v4799_v9 = vsel %vm803_vm0, %v4717_v22, 0 }
 0xcbf   :  { %v4514_v15 = vpop.f32.mrf.mxu0 }
 0xcc1   :  { %v8620_v19 = vpop.f32.mrf.mxu0 }
 0xcc2   :  { %v4720_v39 = vpack.c.bf16 %v8620_v19, %v8619_v36 }
 0xcc3   :  { %v4517_v51 = vpop.f32.mrf.mxu0 }
 0xcc4   :  { %v4863_v5 = vsel %vm803_vm0, %v4720_v39, 0  ;;  %v4719_v44 = vpack.c.bf16 %v4517_v51, %v4514_v15  ;;  %8662 = vmatmul.mubr.msk.bf16.vlgmr.msra.gmra.mxu0 %vm803_vm0, %v4708_v49  ;;  %8769 = vmatprep.subr.msk.bf16.mxu1 %vm803_vm0, %v4720_v39 }
 0xcc5   :  { %v8623_v32 = vpop.f32.mrf.mxu0  ;;  %8666 = vmatpush3.bf16.xpose.msra.mxu0 %v4802_v38  ;;  %8669 = vmatprep.mubr.msk.bf16.mxu0 %vm803_vm0, %v4709_v34 }
 0xcc6   :  { %8674 = vmatpush3.bf16.xpose.msra.mxu1 %v4863_v5  ;;  %8768 = vmatprep.subr.msk.bf16.mxu0 %vm803_vm0, %v4717_v22  ;;  %v4860_v53 = vsel %vm803_vm0, %v4719_v44, 0 }
 0xcc7   :  { %8770 = vmatprep.subr.msk.bf16.mxu1 %vm803_vm0, %v4719_v44  ;;  %v4530_v57 = vpop.f32.mrf.mxu0 }
 0xcc9   :  { %v8624_v46 = vpop.f32.mrf.mxu0 }
 0xcca   :  { %v4722_v26 = vpack.c.bf16 %v8624_v46, %v8623_v32 }
 0xccb   :  { %v4533_v49 = vpop.f32.mrf.mxu0 }
 0xccc   :  { %v4924_v47 = vsel %vm803_vm0, %v4722_v26, 0  ;;  %v4721_v61 = vpack.c.bf16 %v4533_v49, %v4530_v57 }
 0xccd   :  { %8668 = vmatpush3.bf16.xpose.msra.mxu0 %v4799_v9 }
 0xcce   :  { %8676 = vmatpush3.bf16.xpose.msra.mxu1 %v4860_v53  ;;  %8771 = vmatprep.subr.msk.bf16.mxu0 %vm803_vm0, %v4722_v26 }
 0xccf   :  { %8689 = vmatprep.subr.bf16.mxu1 %v4724_v21 }
 0xcd4   :  { %8670 = vmatmul.mubr.msk.bf16.vlgmr.msra.gmra.mxu0 %vm803_vm0, %v4710_v35  ;;  %v4921_v35 = vsel %vm803_vm0, %v4721_v61, 0 }
 0xcd5   :  { %8678 = vmatmul.mubr.msk.bf16.vlgmr.msra.gmra.mxu1 %vm803_vm0, %v4712_v2  ;;  %8682 = vmatpush3.bf16.xpose.msra.mxu0 %v4924_v47  ;;  %v4714_v2 = vpack.c.bf16 %v10889_v59, %v10884_v25 }
 0xcd6   :  { %8685 = vmatprep.mubr.msk.bf16.mxu0 %vm803_vm0, %v4713_v3  ;;  %8690 = vmatpush3.bf16.msra.mxu1 %v4724_v21 }
 0xcd7   :  { %8772 = vmatprep.subr.msk.bf16.mxu0 %vm803_vm0, %v4721_v61  ;;  %8691 = vmatprep.subr.bf16.mxu1 %v4723_v60 }
 0xcda   :  { %8692 = vmatpush3.bf16.msra.mxu1 %v4723_v60 }
 0xcdb   :  { %8705 = vmatprep.subr.bf16.mxu1 %v11010_v63 }
 0xcdd   :  { %8684 = vmatpush3.bf16.xpose.msra.mxu0 %v4921_v35 }
 0xcde   :  { %8697 = vmatprep.subr.bf16.mxu0 %v4726_v20 }
 0xce4   :  { %8686 = vmatmul.mubr.msk.bf16.vlgmr.msra.gmra.mxu0 %vm803_vm0, %v4714_v2 }
 0xce5   :  { %8698 = vmatpush3.bf16.msra.mxu0 %v4726_v20 }
 0xce6   :  { %8699 = vmatprep.subr.bf16.mxu0 %v4725_v55 }
 0xce9   :  { %8700 = vmatpush3.bf16.msra.mxu0 %v4725_v55 }
 0xcea   :  { %8713 = vmatprep.subr.bf16.mxu0 %v11023_v45 }
 0xd84   :  { %v8663_v27 = vpop.f32.mrf.mxu0 }
 0xd85   :  { %v4981_v59 = vsel %vm803_vm0, %v8663_v27, -inf }
 0xd86   :  { %v4777_v41 = vpop.f32.mrf.mxu0 }
 0xd87   :  { %v4975_v29 = vsel %vm803_vm0, %v4777_v41, -inf }
 0xd88   :  { %4976 = vmax.xlane.f32.xlu0 %v4975_v29  ;;  %v8664_v1 = vpop.f32.mrf.mxu0 }
 0xd89   :  { %v4984_v40 = vsel %vm803_vm0, %v8664_v1, -inf }
 0xd8a   :  { %v4780_v25 = vpop.f32.mrf.mxu0 }
 0xd8b   :  { %v4978_v28 = vsel %vm803_vm0, %v4780_v25, -inf }
 0xd8c   :  { %4982 = vmax.xlane.f32.xlu0 %v4981_v59  ;;  %4979 = vmax.xlane.f32.xlu1 %v4978_v28 }
 0xd90   :  { %4985 = vmax.xlane.f32.xlu1 %v4984_v40 }
 0xd94   :  { %v11032_v58 = vpop.f32.mrf.mxu0 }
 0xd95   :  { %v11034_v18 = vpop.f32.mrf.mxu1  ;;  %v4993_v36 = vsel %vm803_vm0, %v11032_v58, -inf }
 0xd96   :  { %v4838_v13 = vpop.f32.mrf.mxu0  ;;  %v5005_v38 = vsel %vm803_vm0, %v11034_v18, -inf }
 0xd97   :  { %v4987_v0 = vsel %vm803_vm0, %v4838_v13, -inf  ;;  %v11037_v42 = vpop.f32.mrf.mxu1 }
 0xd98   :  { %4988 = vmax.xlane.f32.xlu0 %v4987_v0  ;;  %v11039_v17 = vpop.f32.mrf.mxu0  ;;  %v4999_v39 = vsel %vm803_vm0, %v11037_v42, -inf }
 0xd99   :  { %v11044_v19 = vpop.f32.mrf.mxu1  ;;  %v4996_v34 = vsel %vm803_vm0, %v11039_v17, -inf }
 0xd9a   :  { %v4841_v16 = vpop.f32.mrf.mxu0  ;;  %v5008_v32 = vsel %vm803_vm0, %v11044_v19, -inf }
 0xd9b   :  { %v4990_v15 = vsel %vm803_vm0, %v4841_v16, -inf  ;;  %v11050_v51 = vpop.f32.mrf.mxu1 }
 0xd9c   :  { %4994 = vmax.xlane.f32.xlu0 %v4993_v36  ;;  %4991 = vmax.xlane.f32.xlu1 %v4990_v15  ;;  %v5002_v22 = vsel %vm803_vm0, %v11050_v51, -inf }
 0xda0   :  { %5000 = vmax.xlane.f32.xlu0 %v4999_v39  ;;  %4997 = vmax.xlane.f32.xlu1 %v4996_v34 }
 0xda4   :  { %5006 = vmax.xlane.f32.xlu0 %v5005_v38  ;;  %5003 = vmax.xlane.f32.xlu1 %v5002_v22  ;;  %v11056_v5 = vpop.f32.mrf.mxu0 }
 0xda5   :  { %v5017_v26 = vsel %vm803_vm0, %v11056_v5, -inf }
 0xda6   :  { %v11058_v44 = vpop.f32.mrf.mxu0 }
 0xda7   :  { %v5011_v57 = vsel %vm803_vm0, %v11058_v44, -inf }
 0xda8   :  { %5009 = vmax.xlane.f32.xlu1 %v5008_v32  ;;  %5012 = vmax.xlane.f32.xlu0 %v5011_v57  ;;  %v11064_v46 = vpop.f32.mrf.mxu0 }
 0xda9   :  { %v5020_v53 = vsel %vm803_vm0, %v11064_v46, -inf }
 0xdaa   :  { %v11066_v9 = vpop.f32.mrf.mxu0 }
 0xdab   :  { %v5014_v21 = vsel %vm803_vm0, %v11066_v9, -inf }
 0xdac   :  { %5018 = vmax.xlane.f32.xlu0 %v5017_v26  ;;  %5015 = vmax.xlane.f32.xlu1 %v5014_v21 }
 0xdb0   :  { %5021 = vmax.xlane.f32.xlu1 %v5020_v53 }
 0xe11   :  { %v4977_v49 = vpop.xlane.xlu0 %4976 }
 0xe12   :  { %v5023_v3 = vsub.f32 %v4777_v41, %v4977_v49 }
 0xe14   :  { %v5039_v47 = vmul.f32 1.442695, %v5023_v3 }
 0xe15   :  { %v4983_v60 = vpop.xlane.xlu0 %4982  ;;  %v4980_v61 = vpop.xlane.xlu1 %4979 }
 0xe16   :  { %9185 = vpow2.f32 %v5039_v47  ;;  %v5025_v20 = vsub.f32 %v8663_v27, %v4983_v60  ;;  %v5024_v35 = vsub.f32 %v4780_v25, %v4980_v61 }
 0xe18   :  { %v5043_v24 = vmul.f32 1.442695, %v5025_v20  ;;  %v5041_v2 = vmul.f32 1.442695, %v5024_v35 }
 0xe19   :  { %v4986_v55 = vpop.xlane.xlu1 %4985 }
 0xe1a   :  { %9187 = vpow2.f32 %v5043_v24  ;;  %v5026_v10 = vsub.f32 %v8664_v1, %v4986_v55 }
 0xe1b   :  { %9189 = vpow2.f32 %v5041_v2 }
 0xe1c   :  { %v5045_v29 = vmul.f32 1.442695, %v5026_v10 }
 0xe1e   :  { %9191 = vpow2.f32 %v5045_v29 }
 0xe21   :  { %v4989_v59 = vpop.xlane.xlu0 %4988 }
 0xe22   :  { %v5027_v28 = vsub.f32 %v4838_v13, %v4989_v59 }
 0xe23   :  { %v11074_v40 = vpop.eup %9185 }
 0xe24   :  { %v5047_v0 = vmul.f32 1.442695, %v5027_v28  ;;  %v5071_v41 = vsel %vm803_vm0, %v11074_v40, 0.0 }
 0xe25   :  { %v4995_v36 = vpop.xlane.xlu0 %4994  ;;  %v4992_v15 = vpop.xlane.xlu1 %4991  ;;  %5072 = vadd.xlane.f32.xlu0 %v5071_v41 }
 0xe26   :  { %9193 = vpow2.f32 %v5047_v0  ;;  %v5029_v27 = vsub.f32 %v11032_v58, %v4995_v36  ;;  %v5028_v25 = vsub.f32 %v4841_v16, %v4992_v15 }
 0xe27   :  { %v11079_v39 = vpop.eup %9187 }
 0xe28   :  { %v11081_v1 = vpop.eup %9189  ;;  %v5051_v34 = vmul.f32 1.442695, %v5029_v27  ;;  %v5049_v38 = vmul.f32 1.442695, %v5028_v25  ;;  %v5077_v13 = vsel %vm803_vm0, %v11079_v39, 0.0 }
 0xe29   :  { %v5001_v22 = vpop.xlane.xlu0 %5000  ;;  %v4998_v32 = vpop.xlane.xlu1 %4997  ;;  %5078 = vadd.xlane.f32.xlu0 %v5077_v13  ;;  %v5074_v57 = vsel %vm803_vm0, %v11081_v1, 0.0 }
 0xe2a   :  { %9195 = vpow2.f32 %v5051_v34  ;;  %v5031_v26 = vsub.f32 %v11037_v42, %v5001_v22  ;;  %v5030_v58 = vsub.f32 %v11039_v17, %v4998_v32  ;;  %5075 = vadd.xlane.f32.xlu1 %v5074_v57 }
 0xe2b   :  { %v11089_v16 = vpop.eup %9191  ;;  %9197 = vpow2.f32 %v5049_v38 }
 0xe2c   :  { %v5055_v21 = vmul.f32 1.442695, %v5031_v26  ;;  %v5053_v53 = vmul.f32 1.442695, %v5030_v58  ;;  %v5080_v49 = vsel %vm803_vm0, %v11089_v16, 0.0 }
 0xe2d   :  { %v5007_v3 = vpop.xlane.xlu0 %5006  ;;  %v5004_v47 = vpop.xlane.xlu1 %5003 }
 0xe2e   :  { %9199 = vpow2.f32 %v5055_v21  ;;  %v5033_v60 = vsub.f32 %v11034_v18, %v5007_v3  ;;  %v5032_v61 = vsub.f32 %v11050_v51, %v5004_v47  ;;  %5081 = vadd.xlane.f32.xlu1 %v5080_v49 }
 0xe2f   :  { %9201 = vpow2.f32 %v5053_v53 }
 0xe30   :  { %v5059_v42 = vmul.f32 1.442695, %v5033_v60  ;;  %v5057_v17 = vmul.f32 1.442695, %v5032_v61 }
 0xe31   :  { %v5010_v20 = vpop.xlane.xlu1 %5009  ;;  %v5013_v35 = vpop.xlane.xlu0 %5012 }
 0xe32   :  { %9203 = vpow2.f32 %v5059_v42  ;;  %v5034_v24 = vsub.f32 %v11044_v19, %v5010_v20  ;;  %v5035_v2 = vsub.f32 %v11058_v44, %v5013_v35 }
 0xe33   :  { %v11097_v55 = vpop.eup %9193  ;;  %9205 = vpow2.f32 %v5057_v17 }
 0xe34   :  { %v5061_v10 = vmul.f32 1.442695, %v5034_v24  ;;  %v5063_v29 = vmul.f32 1.442695, %v5035_v2  ;;  %v5083_v18 = vsel %vm803_vm0, %v11097_v55, 0.0 }
 0xe35   :  { %5084 = vadd.xlane.f32.xlu0 %v5083_v18  ;;  %v5019_v51 = vpop.xlane.xlu0 %5018  ;;  %v5016_v59 = vpop.xlane.xlu1 %5015 }
 0xe36   :  { %9207 = vpow2.f32 %v5061_v10  ;;  %v5037_v28 = vsub.f32 %v11056_v5, %v5019_v51  ;;  %v5036_v0 = vsub.f32 %v11066_v9, %v5016_v59 }
 0xe37   :  { %v11103_v41 = vpop.eup %9195  ;;  %9209 = vpow2.f32 %v5063_v29 }
 0xe38   :  { %v11105_v19 = vpop.eup %9197  ;;  %v5067_v44 = vmul.f32 1.442695, %v5037_v28  ;;  %v5065_v36 = vmul.f32 1.442695, %v5036_v0  ;;  %v5089_v15 = vsel %vm803_vm0, %v11103_v41, 0.0 }
 0xe39   :  { %5090 = vadd.xlane.f32.xlu0 %v5089_v15  ;;  %v5086_v27 = vsel %vm803_vm0, %v11105_v19, 0.0  ;;  %v5022_v25 = vpop.xlane.xlu1 %5021 }
 0xe3a   :  { %9211 = vpow2.f32 %v5067_v44  ;;  %5087 = vadd.xlane.f32.xlu1 %v5086_v27  ;;  %v5038_v5 = vsub.f32 %v11064_v46, %v5022_v25 }
 0xe3b   :  { %v11112_v9 = vpop.eup %9199  ;;  %9213 = vpow2.f32 %v5065_v36 }
 0xe3c   :  { %v11114_v34 = vpop.eup %9201  ;;  %v5069_v38 = vmul.f32 1.442695, %v5038_v5  ;;  %v5095_v13 = vsel %vm803_vm0, %v11112_v9, 0.0 }
 0xe3d   :  { %5096 = vadd.xlane.f32.xlu0 %v5095_v13  ;;  %v5092_v22 = vsel %vm803_vm0, %v11114_v34, 0.0 }
 0xe3e   :  { %9215 = vpow2.f32 %v5069_v38  ;;  %5093 = vadd.xlane.f32.xlu1 %v5092_v22 }
 0xe3f   :  { %v11120_v32 = vpop.eup %9203 }
 0xe40   :  { %v11122_v57 = vpop.eup %9205  ;;  %v5101_v46 = vsel %vm803_vm0, %v11120_v32, 0.0 }
 0xe41   :  { %5102 = vadd.xlane.f32.xlu0 %v5101_v46  ;;  %v5098_v26 = vsel %vm803_vm0, %v11122_v57, 0.0 }
 0xe42   :  { %5099 = vadd.xlane.f32.xlu1 %v5098_v26 }
 0xe43   :  { %v11128_v58 = vpop.eup %9207 }
 0xe44   :  { %v11130_v21 = vpop.eup %9209  ;;  %v5104_v53 = vsel %vm803_vm0, %v11128_v58, 0.0 }
 0xe45   :  { %v5107_v49 = vsel %vm803_vm0, %v11130_v21, 0.0 }
 0xe46   :  { %5108 = vadd.xlane.f32.xlu0 %v5107_v49  ;;  %5105 = vadd.xlane.f32.xlu1 %v5104_v53 }
 0xe47   :  { %v11136_v3 = vpop.eup %9211 }
 0xe48   :  { %v11138_v47 = vpop.eup %9213  ;;  %v5113_v60 = vsel %vm803_vm0, %v11136_v3, 0.0 }
 0xe49   :  { %v5110_v61 = vsel %vm803_vm0, %v11138_v47, 0.0 }
 0xe4a   :  { %5114 = vadd.xlane.f32.xlu0 %v5113_v60  ;;  %5111 = vadd.xlane.f32.xlu1 %v5110_v61 }
 0xe4b   :  { %v11144_v42 = vpop.eup %9215 }
 0xe4c   :  { %v5116_v17 = vsel %vm803_vm0, %v11144_v42, 0.0 }
 0xe4e   :  { %5117 = vadd.xlane.f32.xlu1 %v5116_v17 }
 0xeae   :  { %v5073_v20 = vpop.xlane.xlu0 %5072 }
 0xeaf   :  { %9217 = vrcp.f32 %v5073_v20 }
 0xeb2   :  { %v5079_v35 = vpop.xlane.xlu0 %5078 }
 0xeb3   :  { %v5076_v24 = vpop.xlane.xlu1 %5075 }
 0xeb4   :  { %9219 = vrcp.f32 %v5076_v24 }
 0xeb5   :  { %9221 = vrcp.f32 %v5079_v35 }
 0xeb7   :  { %v5082_v2 = vpop.xlane.xlu1 %5081 }
 0xeb8   :  { %9223 = vrcp.f32 %v5082_v2 }
 0xebc   :  { %v9218_v29 = vpop.eup %9217 }
 0xebd   :  { %v5135_v59 = vmul.f32 %v9218_v29, %v11074_v40 }
 0xebe   :  { %v5085_v10 = vpop.xlane.xlu0 %5084 }
 0xebf   :  { %9225 = vrcp.f32 %v5085_v10 }
 0xec1   :  { %v9220_v18 = vpop.eup %9219 }
 0xec2   :  { %v5091_v51 = vpop.xlane.xlu0 %5090  ;;  %v5136_v28 = vmul.f32 %v9220_v18, %v11081_v1  ;;  %v9222_v0 = vpop.eup %9221 }
 0xec3   :  { %v5088_v44 = vpop.xlane.xlu1 %5087  ;;  %v5137_v27 = vmul.f32 %v9222_v0, %v11079_v39 }
 0xec4   :  { %9227 = vrcp.f32 %v5088_v44  ;;  %v5151_v36 = vpack.c.bf16 %v5136_v28, %v5135_v59 }
 0xec5   :  { %v9224_v15 = vpop.eup %9223  ;;  %9229 = vrcp.f32 %v5091_v51 }
 0xec6   :  { %v5138_v25 = vmul.f32 %v9224_v15, %v11089_v16  ;;  %8693 = vmatprep.mubr.msk.bf16.mxu1 %vm803_vm0, %v5151_v36  ;;  %v5097_v5 = vpop.xlane.xlu0 %5096 }
 0xec7   :  { %v5094_v38 = vpop.xlane.xlu1 %5093 }
 0xec8   :  { %v5152_v13 = vpack.c.bf16 %v5138_v25, %v5137_v27  ;;  %9231 = vrcp.f32 %v5094_v38 }
 0xec9   :  { %9233 = vrcp.f32 %v5097_v5 }
 0xeca   :  { %8694 = vmatmul.mubr.msk.bf16.vlgmr.msra.gmra.mxu1 %vm803_vm0, %v5152_v13  ;;  %v5103_v40 = vpop.xlane.xlu0 %5102 }
 0xecb   :  { %8706 = vmatpush3.bf16.msra.mxu1 %v11010_v63  ;;  %v5100_v1 = vpop.xlane.xlu1 %5099 }
 0xecc   :  { %8707 = vmatprep.subr.bf16.mxu1 %v10913_v56  ;;  %9235 = vrcp.f32 %v5100_v1  ;;  %v9226_v39 = vpop.eup %9225 }
 0xecd   :  { %9237 = vrcp.f32 %v5103_v40  ;;  %v5139_v26 = vmul.f32 %v9226_v39, %v11097_v55 }
 0xecf   :  { %8708 = vmatpush3.bf16.msra.mxu1 %v10913_v56  ;;  %v5109_v16 = vpop.xlane.xlu0 %5108  ;;  %v5106_v22 = vpop.xlane.xlu1 %5105 }
 0xed0   :  { %9239 = vrcp.f32 %v5106_v22 }
 0xed1   :  { %v9228_v46 = vpop.eup %9227  ;;  %9241 = vrcp.f32 %v5109_v16 }
 0xed2   :  { %v5140_v53 = vmul.f32 %v9228_v46, %v11105_v19  ;;  %v9230_v49 = vpop.eup %9229  ;;  %v4729_v19 = vpack.c.bf16 %v11030_v12, %v11016_v50 }
 0xed3   :  { %v5115_v60 = vpop.xlane.xlu0 %5114  ;;  %v5112_v63 = vpop.xlane.xlu1 %5111  ;;  %v5141_v20 = vmul.f32 %v9230_v49, %v11103_v41 }
 0xed4   :  { %v5153_v61 = vpack.c.bf16 %v5140_v53, %v5139_v26  ;;  %9243 = vrcp.f32 %v5112_v63 }
 0xed5   :  { %v9232_v17 = vpop.eup %9231  ;;  %9245 = vrcp.f32 %v5115_v60 }
 0xed6   :  { %v5142_v35 = vmul.f32 %v9232_v17, %v11114_v34  ;;  %8701 = vmatprep.mubr.msk.bf16.mxu0 %vm803_vm0, %v5153_v61  ;;  %v9234_v56 = vpop.eup %9233 }
 0xed7   :  { %v5118_v24 = vpop.xlane.xlu1 %5117  ;;  %v5143_v10 = vmul.f32 %v9234_v56, %v11112_v9 }
 0xed8   :  { %v5154_v2 = vpack.c.bf16 %v5142_v35, %v5141_v20  ;;  %9247 = vrcp.f32 %v5118_v24 }
 0xed9   :  { %v9236_v55 = vpop.eup %9235 }
 0xeda   :  { %8702 = vmatmul.mubr.msk.bf16.vlgmr.msra.gmra.mxu0 %vm803_vm0, %v5154_v2  ;;  %v5144_v29 = vmul.f32 %v9236_v55, %v11122_v57  ;;  %v9238_v41 = vpop.eup %9237  ;;  %v12292_v55 = vld [vmem:[#allocation12_spill] sm:$0xff] }
 0xedb   :  { %8714 = vmatpush3.bf16.msra.mxu0 %v11023_v45  ;;  %v5145_v51 = vmul.f32 %v9238_v41, %v11120_v32 }
 0xedc   :  { %8715 = vmatprep.subr.bf16.mxu0 %v4729_v19  ;;  %v5155_v34 = vpack.c.bf16 %v5144_v29, %v5143_v10 }
 0xedd   :  { %v9240_v18 = vpop.eup %9239 }
 0xede   :  { %8709 = vmatprep.mubr.msk.bf16.mxu1 %vm803_vm0, %v5155_v34  ;;  %v5146_v59 = vmul.f32 %v9240_v18, %v11128_v58  ;;  %v9242_v50 = vpop.eup %9241  ;;  %v8879_v58 = vld [vmem:[%s12250_s6 + $0x38] sm:$0xff]  }
 0xedf   :  { %8716 = vmatpush3.bf16.msra.mxu0 %v4729_v19  ;;  %v5147_v9 = vmul.f32 %v9242_v50, %v11130_v21  ;;  %8721 = vmatprep.subr.bf16.mxu1 %v8879_v58  ;;  %v8880_v21 = vld [vmem:[%s12250_s6 + $0x30] sm:$0xff]   ;;  %v12293_v19 = vld [vmem:[#allocation5_spill] sm:$0xff] }
 0xee0   :  { %v5156_v12 = vpack.c.bf16 %v5146_v59, %v5145_v51  ;;  %v2842_v10 = vadd.f32 %v12293_v19, %v12292_v55  ;;  %v9409_v51 = vld [vmem:[%s12244_s0] sm:$0xff] }
 0xee1   :  { %v9244_v28 = vpop.eup %9243 }
 0xee2   :  { %v9246_v0 = vpop.eup %9245  ;;  %8710 = vmatmul.mubr.msk.bf16.vlgmr.msra.gmra.mxu1 %vm803_vm0, %v5156_v12  ;;  %v5148_v45 = vmul.f32 %v9244_v28, %v11138_v47  ;;  %v4206_v18 = vadd.f32 %v10927_v14, %v2842_v10  ;;  %v11203_v12 = vld [vmem:[%s12251_s7] ss:$0 sm:$0xff] }
 0xee3   :  { %v5149_v36 = vmul.f32 %v9246_v0, %v11136_v3  ;;  %8722 = vmatpush3.bf16.msra.mxu1 %v8879_v58 }
 0xee4   :  { %v5157_v44 = vpack.c.bf16 %v5148_v45, %v5147_v9  ;;  %8723 = vmatprep.subr.bf16.mxu1 %v8880_v21  ;;  %v9411_v9 = vld [vmem:[%s12244_s0 + $0x8] sm:$0xff] }
 0xee5   :  { %v9248_v57 = vpop.eup %9247 }
 0xee6   :  { %v5150_v15 = vmul.f32 %v9248_v57, %v11144_v42  ;;  %8717 = vmatprep.mubr.msk.bf16.mxu0 %vm803_vm0, %v5157_v44  ;;  %v9412_v57 = vld [vmem:[%s12244_s0 + $0x18] sm:$0xff] }
 0xee7   :  { %8724 = vmatpush3.bf16.msra.mxu1 %v8880_v21  ;;  %v12294_v21 = vld [vmem:[#allocation13_spill] sm:$0xff] }
 0xee8   :  { %v5158_v32 = vpack.c.bf16 %v5150_v15, %v5149_v36 }
 0xeea   :  { %8718 = vmatmul.mubr.msk.bf16.vlgmr.msra.gmra.mxu0 %vm803_vm0, %v5158_v32 }
 0xf8a   :  { %v8695_v3 = vpop.f32.mrf.mxu1 }
 0xf8c   :  { %v5199_v47 = vpop.f32.mrf.mxu1 }
 0xf8e   :  { %v8696_v42 = vpop.f32.mrf.mxu1 }
 0xf8f   :  { %v5380_v5 = vpack.c.bf16 %v8696_v42, %v8695_v3  ;;  %v12295_v3 = vld [vmem:[#allocation6_spill] sm:$0xff] }
 0xf90   :  { %v5202_v27 = vpop.f32.mrf.mxu1 }
 0xf91   :  { %v5379_v25 = vpack.c.bf16 %v5202_v27, %v5199_v47  ;;  %v2858_v47 = vadd.f32 %v12295_v3, %v12294_v21  ;;  %v9422_v3 = vld [vmem:[%s12244_s0 + $0x70] sm:$0xff] }
 0xf93   :  { %8725 = vmatprep.mubr.msk.bf16.mxu1 %vm803_vm0, %v5379_v25 }
 0xf94   :  { %8726 = vmatmul.mubr.msk.bf16.vlgmr.msra.gmra.mxu1 %vm803_vm0, %v5380_v5  ;;  %v4210_v5 = vadd.f32 %v10941_v52, %v2858_v47 }
 0xf9a   :  { %v8703_v38 = vpop.f32.mrf.mxu0 }
 0xf9c   :  { %v5254_v13 = vpop.f32.mrf.mxu0 }
 0xf9e   :  { %v8704_v40 = vpop.f32.mrf.mxu0 }
 0xf9f   :  { %v5382_v16 = vpack.c.bf16 %v8704_v40, %v8703_v38  ;;  %v9413_v38 = vld [vmem:[%s12244_s0 + $0x20] sm:$0xff] }
 0xfa0   :  { %v5257_v1 = vpop.f32.mrf.mxu0 }
 0xfa1   :  { %v5381_v39 = vpack.c.bf16 %v5257_v1, %v5254_v13  ;;  %v9414_v1 = vld [vmem:[%s12244_s0 + $0x30] sm:$0xff] }
 0xfa2   :  { %v8711_v22 = vpop.f32.mrf.mxu1 }
 0xfa3   :  { %8729 = vmatprep.mubr.msk.bf16.mxu1 %vm803_vm0, %v5381_v39 }
 0xfa4   :  { %8730 = vmatmul.mubr.msk.bf16.gmra.mxu1 %vm803_vm0, %v5382_v16  ;;  %v5309_v46 = vpop.f32.mrf.mxu1 }
 0xfa6   :  { %v8712_v26 = vpop.f32.mrf.mxu1 }
 0xfa7   :  { %v5384_v63 = vpack.c.bf16 %v8712_v26, %v8711_v22  ;;  %v9416_v26 = vld [vmem:[%s12244_s0 + $0x38] sm:$0xff] }
 0xfa8   :  { %v5312_v53 = vpop.f32.mrf.mxu1 }
 0xfa9   :  { %v5383_v49 = vpack.c.bf16 %v5312_v53, %v5309_v46 }
 0xfaa   :  { %v8719_v60 = vpop.f32.mrf.mxu0 }
 0xfab   :  { %8733 = vmatprep.mubr.msk.bf16.mxu1 %vm803_vm0, %v5383_v49 }
 0xfac   :  { %v5364_v61 = vpop.f32.mrf.mxu0  ;;  %8734 = vmatmul.mubr.msk.bf16.gmra.mxu1 %vm803_vm0, %v5384_v63  ;;  %v12298_v63 = vld [vmem:[#allocation14_spill] sm:$0xff] }
 0xfae   :  { %v8720_v17 = vpop.f32.mrf.mxu0 }
 0xfaf   :  { %v5386_v56 = vpack.c.bf16 %v8720_v17, %v8719_v60 }
 0xfb0   :  { %v5367_v20 = vpop.f32.mrf.mxu0 }
 0xfb1   :  { %v5385_v35 = vpack.c.bf16 %v5367_v20, %v5364_v61  ;;  %v12299_v61 = vld [vmem:[#allocation7_spill] sm:$0xff] }
 0xfb2   :  { %v2874_v17 = vadd.f32 %v12299_v61, %v12298_v63 }
 0xfb3   :  { %8737 = vmatprep.mubr.msk.bf16.mxu1 %vm803_vm0, %v5385_v35 }
 0xfb4   :  { %8738 = vmatmul.mubr.msk.bf16.gmra.mxu1 %vm803_vm0, %v5386_v56 }
0x1054   :  { %v8727_v24 = vpop.f32.mrf.mxu1 }
0x1055   :  { %v5527_v29 = vadd.f32 %v8727_v24, %v10919_v33  ;;  %v9410_v33 = vld [vmem:[%s12244_s0 + $0x10] sm:$0xff]  ;;  %v4214_v24 = vadd.f32 %v10955_v54, %v2874_v17 }
0x1056   :  { %v5462_v2 = vpop.f32.mrf.mxu1 }
0x1057   :  { %v5525_v41 = vadd.f32 %v5462_v2, %v10923_v48  ;;  %v5543_v28 = vadd.f32 %v9410_v33, %v5527_v29  ;;  %v9417_v2 = vld [vmem:[%s12244_s0 + $0x40] sm:$0xff]  ;;  %v9420_v33 = vld [vmem:[%s12244_s0 + $0x58] sm:$0xff] }
0x1058   :  { %v8728_v34 = vpop.f32.mrf.mxu1 }
0x1059   :  { %v5541_v59 = vadd.f32 %v9409_v51, %v5525_v41  ;;  %v5528_v48 = vadd.f32 %v8728_v34, %v10925_v23  ;;  %v11220_v36 = vadd.f32 %v11203_v12, %v5543_v28  ;;  %v12302_v51 = vld [vmem:[#allocation18_spill] sm:$0xff] }
0x105a   :  { %v5465_v50 = vpop.f32.mrf.mxu1 }
0x105b   :  { %v5526_v0 = vadd.f32 %v5465_v50, %v4206_v18  ;;  %v11210_v14 = vadd.f32 %v11203_v12, %v5541_v59  ;;  %v5544_v44 = vadd.f32 %v9412_v57, %v5528_v48  ;;  %v12303_v59 = vld [vmem:[#allocation11_spill] sm:$0xff] }
0x105c   :  { %v2890_v50 = vadd.f32 %v12303_v59, %v12302_v51 }
0x105d   :  { %v5542_v45 = vadd.f32 %v9411_v9, %v5526_v0  ;;  %5582 = vadd.xlane.f32.xlu0 %v11210_v14  ;;  %v11228_v15 = vadd.f32 %v11203_v12, %v5544_v44 }
0x105f   :  { %v11223_v23 = vadd.f32 %v11203_v12, %v5542_v45 }
0x1061   :  { %5586 = vadd.xlane.f32.xlu0 %v11220_v36  ;;  %5584 = vadd.xlane.f32.xlu1 %v11223_v23 }
0x1064   :  { %v8731_v32 = vpop.f32.mrf.mxu1 }
0x1065   :  { %5588 = vadd.xlane.f32.xlu1 %v11228_v15  ;;  %v5531_v42 = vadd.f32 %v8731_v32, %v10933_v6  ;;  %v4218_v32 = vadd.f32 %v10969_v31, %v2890_v50 }
0x1066   :  { %v5478_v58 = vpop.f32.mrf.mxu1 }
0x1067   :  { %v5529_v27 = vadd.f32 %v5478_v58, %v10937_v62  ;;  %v5547_v39 = vadd.f32 %v9414_v1, %v5531_v42  ;;  %v9415_v62 = vld [vmem:[%s12244_s0 + $0x28] sm:$0xff]  ;;  %v9421_v58 = vld [vmem:[%s12244_s0 + $0x60] sm:$0xff] }
0x1068   :  { %v8732_v25 = vpop.f32.mrf.mxu1 }
0x1069   :  { %v5545_v13 = vadd.f32 %v9413_v38, %v5529_v27  ;;  %v5532_v16 = vadd.f32 %v8732_v25, %v10939_v4  ;;  %v11254_v4 = vadd.f32 %v11203_v12, %v5547_v39  ;;  %v9423_v25 = vld [vmem:[%s12244_s0 + $0x68] sm:$0xff]  ;;  %v9424_v38 = vld [vmem:[%s12244_s0 + $0x78] sm:$0xff]  ;;  %v8881_v39 = vld [vmem:[%s12254_s10 + $0xe0] ss:$16 sps:$4 sm:$0xff]  }
0x106a   :  { %v5481_v40 = vpop.f32.mrf.mxu1 }
0x106b   :  { %v5530_v22 = vadd.f32 %v5481_v40, %v4210_v5  ;;  %v11244_v6 = vadd.f32 %v11203_v12, %v5545_v13  ;;  %v5548_v53 = vadd.f32 %v9416_v26, %v5532_v16  ;;  %12296 = vst [vmem:[#allocation15_spill] sm:$0xff] %v11254_v4  ;;  %v8883_v16 = vld [vmem:[%s12254_s10 + $0xe4] ss:$16 sps:$4 sm:$0xff]  }
0x106c   :  { %v8735_v46 = vpop.f32.mrf.mxu1  ;;  %6024 = vmatprep.subr.bf16.mxu0 %v8883_v16 }
0x106d   :  { %v5546_v52 = vadd.f32 %v9415_v62, %v5530_v22  ;;  %5590 = vadd.xlane.f32.xlu0 %v11244_v6  ;;  %v5535_v20 = vadd.f32 %v8735_v46, %v10947_v11  ;;  %v11271_v29 = vadd.f32 %v11203_v12, %v5548_v53  ;;  %v9418_v11 = vld [vmem:[%s12244_s0 + $0x50] sm:$0xff]  ;;  %v8884_v22 = vld [vmem:[%s12254_s10 + $0xe8] ss:$16 sps:$4 sm:$0xff]   ;;  %v8886_v62 = vld [vmem:[%s12254_s10 + $0xec] ss:$16 sps:$4 sm:$0xff]   ;;  %6025 = vmatpush1.bf16.msra.mxu0 %v8881_v39 }
0x106e   :  { %v5494_v49 = vpop.f32.mrf.mxu1  ;;  %6137 = vmatprep.subr.bf16.mxu1 %v8886_v62  ;;  %v8902_v39 = vld [vmem:[%s12254_s10 + $0x88] ss:$16 sps:$4 sm:$0xff]  }
0x106f   :  { %v11257_v60 = vadd.f32 %v11203_v12, %v5546_v52  ;;  %v5533_v35 = vadd.f32 %v5494_v49, %v10951_v7  ;;  %12300 = vst [vmem:[#allocation16_spill] sm:$0xff] %v11271_v29  ;;  %v5551_v7 = vadd.f32 %v9418_v11, %v5535_v20  ;;  %6138 = vmatpush1.bf16.msra.mxu1 %v8884_v22 }
0x1070   :  { %v8736_v56 = vpop.f32.mrf.mxu1 }
0x1071   :  { %12297 = vst [vmem:[#allocation8_spill] sm:$0xff] %v11257_v60  ;;  %5594 = vadd.xlane.f32.xlu0 %v11254_v4  ;;  %5592 = vadd.xlane.f32.xlu1 %v11257_v60  ;;  %v5549_v55 = vadd.f32 %v9417_v2, %v5533_v35  ;;  %v5536_v19 = vadd.f32 %v8736_v56, %v10953_v37  ;;  %v9419_v37 = vld [vmem:[%s12244_s0 + $0x48] sm:$0xff] }
0x1072   :  { %v5497_v10 = vpop.f32.mrf.mxu1  ;;  %v11292_v45 = vadd.f32 %v11203_v12, %v5551_v7  ;;  %v8889_v7 = vld [vmem:[%s12254_s10 + $0xc4] ss:$16 sps:$4 sm:$0xff]  }
0x1073   :  { %v5534_v41 = vadd.f32 %v5497_v10, %v4214_v24  ;;  %v11277_v34 = vadd.f32 %v11203_v12, %v5549_v55  ;;  %v5552_v28 = vadd.f32 %v9420_v33, %v5536_v19  ;;  %6026 = vmatprep.subr.bf16.mxu0 %v8889_v7 }
0x1074   :  { %v8739_v54 = vpop.f32.mrf.mxu1  ;;  %12304 = vst [vmem:[#allocation17_spill] sm:$0xff] %v11292_v45 }
0x1075   :  { %12301 = vst [vmem:[#allocation9_spill] sm:$0xff] %v11277_v34  ;;  %5596 = vadd.xlane.f32.xlu1 %v11271_v29  ;;  %v5550_v18 = vadd.f32 %v9419_v37, %v5534_v41  ;;  %5598 = vadd.xlane.f32.xlu0 %v11277_v34  ;;  %v5539_v0 = vadd.f32 %v8739_v54, %v10961_v8  ;;  %v8892_v41 = vld [vmem:[%s12254_s10 + $0xcc] ss:$16 sps:$4 sm:$0xff]   ;;  %v8887_v37 = vld [vmem:[%s12254_s10 + $0xc0] ss:$16 sps:$4 sm:$0xff]  }
0x1076   :  { %v5510_v48 = vpop.f32.mrf.mxu1  ;;  %6139 = vmatprep.subr.bf16.mxu1 %v8892_v41  ;;  %6027 = vmatpush1.bf16.msra.mxu0 %v8887_v37  ;;  %v8913_v37 = vld [vmem:[%s12254_s10 + $0x44] ss:$16 sps:$4 sm:$0xff]  }
0x1077   :  { %v5537_v9 = vadd.f32 %v5510_v48, %v10965_v30  ;;  %v11295_v57 = vadd.f32 %v11203_v12, %v5550_v18  ;;  %v11304_v30 = vadd.f32 %v11203_v12, %v5552_v28  ;;  %v5555_v47 = vadd.f32 %v9422_v3, %v5539_v0  ;;  %v8890_v18 = vld [vmem:[%s12254_s10 + $0xc8] ss:$16 sps:$4 sm:$0xff]   ;;  %v8895_v48 = vld [vmem:[%s12254_s10 + $0xa4] ss:$16 sps:$4 sm:$0xff]   ;;  %v8898_v0 = vld [vmem:[%s12254_s10 + $0xac] ss:$16 sps:$4 sm:$0xff]  }
0x1078   :  { %v8740_v44 = vpop.f32.mrf.mxu1  ;;  %6140 = vmatpush1.bf16.msra.mxu1 %v8890_v18  ;;  %6028 = vmatprep.subr.bf16.mxu0 %v8895_v48  ;;  %v8916_v18 = vld [vmem:[%s12254_s10 + $0x4c] ss:$16 sps:$4 sm:$0xff]  }
0x1079   :  { %12305 = vst [vmem:[#allocation10_spill] sm:$0xff] %v11295_v57  ;;  %v5553_v21 = vadd.f32 %v9421_v58, %v5537_v9  ;;  %5602 = vadd.xlane.f32.xlu0 %v11292_v45  ;;  %5600 = vadd.xlane.f32.xlu1 %v11295_v57  ;;  %12306 = vst [vmem:[#allocation12_spill] sm:$0xff] %v11304_v30  ;;  %v5540_v31 = vadd.f32 %v8740_v44, %v10967_v43  ;;  %v8896_v58 = vld [vmem:[%s12254_s10 + $0xa8] ss:$16 sps:$4 sm:$0xff]  }
0x107a   :  { %v5513_v8 = vpop.f32.mrf.mxu1  ;;  %v11325_v40 = vadd.f32 %v11203_v12, %v5555_v47  ;;  %6141 = vmatprep.subr.bf16.mxu1 %v8898_v0 }
0x107b   :  { %v5538_v42 = vadd.f32 %v5513_v8, %v4218_v32  ;;  %v11311_v27 = vadd.f32 %v11203_v12, %v5553_v21  ;;  %v5556_v13 = vadd.f32 %v9424_v38, %v5540_v31  ;;  %v8893_v32 = vld [vmem:[%s12254_s10 + $0xa0] ss:$16 sps:$4 sm:$0xff]  }
0x107c   :  { %12309 = vst [vmem:[#allocation6_spill] sm:$0xff] %v11325_v40  ;;  %6029 = vmatpush1.bf16.msra.mxu0 %v8893_v32  ;;  %6142 = vmatpush1.bf16.msra.mxu1 %v8896_v58 }
0x107d   :  { %12307 = vst [vmem:[#allocation5_spill] sm:$0xff] %v11311_v27  ;;  %v5554_v5 = vadd.f32 %v9423_v25, %v5538_v42  ;;  %5604 = vadd.xlane.f32.xlu1 %v11304_v30  ;;  %5606 = vadd.xlane.f32.xlu0 %v11311_v27  ;;  %v11330_v1 = vadd.f32 %v11203_v12, %v5556_v13  ;;  %v8901_v25 = vld [vmem:[%s12254_s10 + $0x84] ss:$16 sps:$4 sm:$0xff]   ;;  %v8899_v13 = vld [vmem:[%s12254_s10 + $0x80] ss:$16 sps:$4 sm:$0xff]  }
0x107e   :  { %6030 = vmatprep.subr.bf16.mxu0 %v8901_v25 }
0x107f   :  { %v11322_v43 = vadd.f32 %v11203_v12, %v5554_v5  ;;  %12310 = vst [vmem:[#allocation14_spill] sm:$0xff] %v11330_v1  ;;  %v8904_v5 = vld [vmem:[%s12254_s10 + $0x8c] ss:$16 sps:$4 sm:$0xff]  }
0x1080   :  { %6143 = vmatprep.subr.bf16.mxu1 %v8904_v5  ;;  %6031 = vmatpush1.bf16.msra.mxu0 %v8899_v13 }
0x1081   :  { %12308 = vst [vmem:[#allocation13_spill] sm:$0xff] %v11322_v43  ;;  %5608 = vadd.xlane.f32.xlu1 %v11322_v43  ;;  %5610 = vadd.xlane.f32.xlu0 %v11325_v40 }
0x1082   :  { %6144 = vmatpush1.bf16.msra.mxu1 %v8902_v39 }
0x1085   :  { %5612 = vadd.xlane.f32.xlu1 %v11330_v1 }
0x10e6   :  { %v5583_v12 = vpop.xlane.xlu0 %5582 }
0x10e7   :  { %v5614_v52 = vmul.f32 0.0078125, %v5583_v12 }
0x10e9   :  { %v11346_v46 = vsub.f32 %v11210_v14, %v5614_v52 }
0x10ea   :  { %v5587_v26 = vpop.xlane.xlu0 %5586  ;;  %v5585_v53 = vpop.xlane.xlu1 %5584 }
0x10eb   :  { %v5616_v49 = vmul.f32 0.0078125, %v5587_v26  ;;  %v5615_v63 = vmul.f32 0.0078125, %v5585_v53  ;;  %v5646_v61 = vmul.f32 %v11346_v46, %v11346_v46 }
0x10ed   :  { %v11351_v17 = vsub.f32 %v11220_v36, %v5616_v49  ;;  %v11354_v20 = vsub.f32 %v11223_v23, %v5615_v63  ;;  %5662 = vadd.xlane.f32.xlu0 %v5646_v61  ;;  %v8907_v49 = vld [vmem:[%s12254_s10 + $0x64] ss:$16 sps:$4 sm:$0xff]   ;;  %v8910_v63 = vld [vmem:[%s12254_s10 + $0x6c] ss:$16 sps:$4 sm:$0xff]   ;;  %v8905_v61 = vld [vmem:[%s12254_s10 + $0x60] ss:$16 sps:$4 sm:$0xff]  }
0x10ee   :  { %v5589_v35 = vpop.xlane.xlu1 %5588  ;;  %6032 = vmatprep.subr.bf16.mxu0 %v8907_v49  ;;  %6145 = vmatprep.subr.bf16.mxu1 %v8910_v63  ;;  %v9447_v63 = vmov 0  }
0x10ef   :  { %v5617_v56 = vmul.f32 0.0078125, %v5589_v35  ;;  %v5647_v24 = vmul.f32 %v11354_v20, %v11354_v20  ;;  %v5648_v2 = vmul.f32 %v11351_v17, %v11351_v17  ;;  %v8908_v35 = vld [vmem:[%s12254_s10 + $0x68] ss:$16 sps:$4 sm:$0xff]   ;;  %6033 = vmatpush1.bf16.msra.mxu0 %v8905_v61  ;;  %6056 = vmatprep.mubr.bf16.mxu0 %v9447_v63 }
0x10f0   :  { %6146 = vmatpush1.bf16.msra.mxu1 %v8908_v35  ;;  %6034 = vmatprep.subr.bf16.mxu0 %v8913_v37  ;;  %v8929_v61 = vld [vmem:[%s12256_s12 + $0x78] sm:$0xff]  }
0x10f1   :  { %v11361_v55 = vsub.f32 %v11228_v15, %v5617_v56  ;;  %5664 = vadd.xlane.f32.xlu1 %v5647_v24  ;;  %5666 = vadd.xlane.f32.xlu0 %v5648_v2  ;;  %v8931_v35 = vld [vmem:[%s12256_s12 + $0xf8] sm:$0xff]  }
0x10f2   :  { %6147 = vmatprep.subr.bf16.mxu1 %v8916_v18  ;;  %6169 = vmatprep.mubr.bf16.mxu1 %v9447_v63 }
0x10f3   :  { %v5649_v19 = vmul.f32 %v11361_v55, %v11361_v55 }
0x10f5   :  { %5668 = vadd.xlane.f32.xlu1 %v5649_v19 }
0x10f6   :  { %v5591_v10 = vpop.xlane.xlu0 %5590 }
0x10f7   :  { %v5618_v11 = vmul.f32 0.0078125, %v5591_v10 }
0x10f9   :  { %v11372_v54 = vsub.f32 %v11244_v6, %v5618_v11 }
0x10fa   :  { %v5595_v51 = vpop.xlane.xlu0 %5594  ;;  %v5593_v59 = vpop.xlane.xlu1 %5592 }
0x10fb   :  { %v5620_v50 = vmul.f32 0.0078125, %v5595_v51  ;;  %v5619_v33 = vmul.f32 0.0078125, %v5593_v59  ;;  %v5650_v28 = vmul.f32 %v11372_v54, %v11372_v54  ;;  %v8911_v51 = vld [vmem:[%s12254_s10 + $0x40] ss:$16 sps:$4 sm:$0xff]   ;;  %v8914_v59 = vld [vmem:[%s12254_s10 + $0x48] ss:$16 sps:$4 sm:$0xff]  }
0x10fc   :  { %6035 = vmatpush1.bf16.msra.mxu0 %v8911_v51  ;;  %6148 = vmatpush1.bf16.msra.mxu1 %v8914_v59 }
0x10fd   :  { %v11389_v9 = vsub.f32 %v11254_v4, %v5620_v50  ;;  %v11392_v44 = vsub.f32 %v11257_v60, %v5619_v33  ;;  %5670 = vadd.xlane.f32.xlu0 %v5650_v28 }
0x10fe   :  { %v5597_v21 = vpop.xlane.xlu1 %5596  ;;  %v5599_v8 = vpop.xlane.xlu0 %5598 }
0x10ff   :  { %v5621_v3 = vmul.f32 0.0078125, %v5597_v21  ;;  %v5651_v47 = vmul.f32 %v11392_v44, %v11392_v44  ;;  %v5652_v31 = vmul.f32 %v11389_v9, %v11389_v9  ;;  %v5622_v42 = vmul.f32 0.0078125, %v5599_v8  ;;  %v8919_v8 = vld [vmem:[%s12254_s10 + $0x24] ss:$16 sps:$4 sm:$0xff]  }
0x1100   :  { %6036 = vmatprep.subr.bf16.mxu0 %v8919_v8 }
0x1101   :  { %v11411_v38 = vsub.f32 %v11271_v29, %v5621_v3  ;;  %5672 = vadd.xlane.f32.xlu1 %v5651_v47  ;;  %5674 = vadd.xlane.f32.xlu0 %v5652_v31  ;;  %v11420_v16 = vsub.f32 %v11277_v34, %v5622_v42  ;;  %v8922_v3 = vld [vmem:[%s12254_s10 + $0x2c] ss:$16 sps:$4 sm:$0xff]   ;;  %v8917_v47 = vld [vmem:[%s12254_s10 + $0x20] ss:$16 sps:$4 sm:$0xff]   ;;  %v8920_v31 = vld [vmem:[%s12254_s10 + $0x28] ss:$16 sps:$4 sm:$0xff]  }
0x1102   :  { %v5603_v22 = vpop.xlane.xlu0 %5602  ;;  %v5601_v62 = vpop.xlane.xlu1 %5600  ;;  %6149 = vmatprep.subr.bf16.mxu1 %v8922_v3  ;;  %6037 = vmatpush1.bf16.msra.mxu0 %v8917_v47  ;;  %v11521_v3 = vld [vmem:[%s12252_s8] ss:$0 sm:$0xff] }
0x1103   :  { %v5653_v12 = vmul.f32 %v11411_v38, %v11411_v38  ;;  %v5624_v52 = vmul.f32 0.0078125, %v5603_v22  ;;  %v5623_v26 = vmul.f32 0.0078125, %v5601_v62  ;;  %v5654_v53 = vmul.f32 %v11420_v16, %v11420_v16  ;;  %6150 = vmatpush1.bf16.msra.mxu1 %v8920_v31  ;;  %v8925_v62 = vld [vmem:[%s12254_s10 + $0x4] ss:$16 sps:$4 sm:$0xff]  }
0x1104   :  { %6038 = vmatprep.subr.bf16.mxu0 %v8925_v62 }
0x1105   :  { %5676 = vadd.xlane.f32.xlu1 %v5653_v12  ;;  %v11439_v56 = vsub.f32 %v11292_v45, %v5624_v52  ;;  %v11442_v24 = vsub.f32 %v11295_v57, %v5623_v26  ;;  %5678 = vadd.xlane.f32.xlu0 %v5654_v53  ;;  %v8928_v12 = vld [vmem:[%s12254_s10 + $0xc] ss:$16 sps:$4 sm:$0xff]   ;;  %v8923_v52 = vld [vmem:[%s12254_s10] ss:$16 sps:$4 sm:$0xff]   ;;  %v8926_v26 = vld [vmem:[%s12254_s10 + $0x8] ss:$16 sps:$4 sm:$0xff]  }
0x1106   :  { %v5605_v2 = vpop.xlane.xlu1 %5604  ;;  %v5607_v19 = vpop.xlane.xlu0 %5606  ;;  %6151 = vmatprep.subr.bf16.mxu1 %v8928_v12  ;;  %6039 = vmatpush1.bf16.msra.mxu0 %v8923_v52 }
0x1107   :  { %v5625_v10 = vmul.f32 0.0078125, %v5605_v2  ;;  %v5626_v11 = vmul.f32 0.0078125, %v5607_v19  ;;  %v5655_v7 = vmul.f32 %v11442_v24, %v11442_v24  ;;  %v5656_v41 = vmul.f32 %v11439_v56, %v11439_v56  ;;  %6152 = vmatpush1.bf16.msra.mxu1 %v8926_v26  ;;  %7893 = vmatprep.subr.bf16.mxu0 %v8929_v61 }
0x1108   :  { %7957 = vmatprep.subr.bf16.mxu1 %v8931_v35 }
0x1109   :  { %v11461_v50 = vsub.f32 %v11304_v30, %v5625_v10  ;;  %v11464_v33 = vsub.f32 %v11311_v27, %v5626_v11  ;;  %5680 = vadd.xlane.f32.xlu1 %v5655_v7  ;;  %5682 = vadd.xlane.f32.xlu0 %v5656_v41 }
0x110a   :  { %v5609_v28 = vpop.xlane.xlu1 %5608  ;;  %v5611_v48 = vpop.xlane.xlu0 %5610 }
0x110b   :  { %v5627_v0 = vmul.f32 0.0078125, %v5609_v28  ;;  %v5628_v32 = vmul.f32 0.0078125, %v5611_v48  ;;  %v5657_v58 = vmul.f32 %v11461_v50, %v11461_v50  ;;  %v5658_v21 = vmul.f32 %v11464_v33, %v11464_v33 }
0x110d   :  { %v11483_v42 = vsub.f32 %v11322_v43, %v5627_v0  ;;  %v11486_v25 = vsub.f32 %v11325_v40, %v5628_v32  ;;  %5684 = vadd.xlane.f32.xlu1 %v5657_v58  ;;  %5686 = vadd.xlane.f32.xlu0 %v5658_v21 }
0x110e   :  { %v5613_v5 = vpop.xlane.xlu1 %5612 }
0x110f   :  { %v5629_v13 = vmul.f32 0.0078125, %v5613_v5  ;;  %v5659_v39 = vmul.f32 %v11483_v42, %v11483_v42  ;;  %v5660_v22 = vmul.f32 %v11486_v25, %v11486_v25 }
0x1111   :  { %v11505_v53 = vsub.f32 %v11330_v1, %v5629_v13  ;;  %5688 = vadd.xlane.f32.xlu1 %v5659_v39  ;;  %5690 = vadd.xlane.f32.xlu0 %v5660_v22 }
0x1113   :  { %v5661_v49 = vmul.f32 %v11505_v53, %v11505_v53 }
0x1115   :  { %5692 = vadd.xlane.f32.xlu1 %v5661_v49 }
0x1176   :  { %v5663_v2 = vpop.xlane.xlu0 %5662 }
0x1177   :  { %v5694_v19 = vmul.f32 0.0078125, %v5663_v2 }
0x1179   :  { %v5710_v10 = vadd.f32 1e-05, %v5694_v19 }
0x117a   :  { %v5665_v11 = vpop.xlane.xlu1 %5664  ;;  %v5667_v7 = vpop.xlane.xlu0 %5666 }
0x117b   :  { %9249 = vrsqrt.f32 %v5710_v10  ;;  %v5695_v41 = vmul.f32 0.0078125, %v5665_v11  ;;  %v5696_v37 = vmul.f32 0.0078125, %v5667_v7 }
0x117d   :  { %v5711_v18 = vadd.f32 1e-05, %v5695_v41  ;;  %v5712_v51 = vadd.f32 1e-05, %v5696_v37 }
0x117e   :  { %v5669_v59 = vpop.xlane.xlu1 %5668 }
0x117f   :  { %9251 = vrsqrt.f32 %v5711_v18  ;;  %v5697_v28 = vmul.f32 0.0078125, %v5669_v59 }
0x1180   :  { %9253 = vrsqrt.f32 %v5712_v51 }
0x1181   :  { %v5713_v48 = vadd.f32 1e-05, %v5697_v28  ;;  %v8930_v28 = vld [vmem:[%s12256_s12 + $0x38] sm:$0xff]  }
0x1183   :  { %9255 = vrsqrt.f32 %v5713_v48  ;;  %v8932_v48 = vld [vmem:[%s12256_s12 + $0xb8] sm:$0xff]  }
0x1186   :  { %v5671_v0 = vpop.xlane.xlu0 %5670 }
0x1187   :  { %v5698_v32 = vmul.f32 0.0078125, %v5671_v0  ;;  %v8933_v0 = vld [vmem:[%s12256_s12 + $0x70] sm:$0xff]  }
0x1188   :  { %v9250_v58 = vpop.eup %9249 }
0x1189   :  { %v5742_v21 = vmul.f32 %v9250_v58, %v11346_v46  ;;  %v5714_v8 = vadd.f32 1e-05, %v5698_v32  ;;  %v11528_v46 = vld [vmem:[%s12253_s9] ss:$0 sm:$0xff] }
0x118a   :  { %v5673_v47 = vpop.xlane.xlu1 %5672  ;;  %v5675_v31 = vpop.xlane.xlu0 %5674 }
0x118b   :  { %9257 = vrsqrt.f32 %v5714_v8  ;;  %v5699_v5 = vmul.f32 0.0078125, %v5673_v47  ;;  %v5700_v13 = vmul.f32 0.0078125, %v5675_v31  ;;  %v5764_v22 = vmul.f32 %v11521_v3, %v5742_v21 }
0x118c   :  { %v9252_v39 = vpop.eup %9251 }
0x118d   :  { %v9254_v62 = vpop.eup %9253  ;;  %v5743_v12 = vmul.f32 %v9252_v39, %v11354_v20  ;;  %v5715_v52 = vadd.f32 1e-05, %v5699_v5  ;;  %v5716_v26 = vadd.f32 1e-05, %v5700_v13  ;;  %v5786_v10 = vadd.f32 %v11528_v46, %v5764_v22  ;;  %v8934_v5 = vld [vmem:[%s12256_s12 + $0x30] sm:$0xff]  }
0x118e   :  { %v5677_v49 = vpop.xlane.xlu1 %5676  ;;  %v5679_v35 = vpop.xlane.xlu0 %5678  ;;  %v5744_v11 = vmul.f32 %v9254_v62, %v11351_v17  ;;  %v8936_v13 = vld [vmem:[%s12256_s12 + $0xb0] sm:$0xff]  }
0x118f   :  { %9259 = vrsqrt.f32 %v5715_v52  ;;  %v5701_v61 = vmul.f32 0.0078125, %v5677_v49  ;;  %v5765_v2 = vmul.f32 %v11521_v3, %v5743_v12  ;;  %v5702_v7 = vmul.f32 0.0078125, %v5679_v35 }
0x1190   :  { %v9256_v19 = vpop.eup %9255  ;;  %9261 = vrsqrt.f32 %v5716_v26  ;;  %v5766_v21 = vmul.f32 %v11521_v3, %v5744_v11 }
0x1191   :  { %v5717_v20 = vadd.f32 1e-05, %v5701_v61  ;;  %v5787_v41 = vadd.f32 %v11528_v46, %v5765_v2  ;;  %v5745_v37 = vmul.f32 %v9256_v19, %v11361_v55  ;;  %v8935_v55 = vld [vmem:[%s12256_s12 + $0xf0] sm:$0xff]   ;;  %v5718_v32 = vadd.f32 1e-05, %v5702_v7 }
0x1192   :  { %v5681_v18 = vpop.xlane.xlu1 %5680  ;;  %v5683_v58 = vpop.xlane.xlu0 %5682  ;;  %v5788_v12 = vadd.f32 %v11528_v46, %v5766_v21 }
0x1193   :  { %9263 = vrsqrt.f32 %v5717_v20  ;;  %v5802_v51 = vpack.c.bf16 %v5787_v41, %v5786_v10  ;;  %v5767_v59 = vmul.f32 %v11521_v3, %v5745_v37  ;;  %v5703_v17 = vmul.f32 0.0078125, %v5681_v18 }
0x1194   :  { %v5704_v22 = vmul.f32 0.0078125, %v5683_v58 }
0x1195   :  { %6057 = vmatmul.mubr.bf16.vlgmr.msra.gmra.mxu0 %v5802_v51  ;;  %6170 = vmatmul.mubr.bf16.vlgmr.msra.gmra.mxu1 %v5802_v51  ;;  %v5719_v8 = vadd.f32 1e-05, %v5703_v17  ;;  %v5789_v31 = vadd.f32 %v11528_v46, %v5767_v59 }
0x1196   :  { %6066 = vmatprep.mubr.bf16.mxu0 %v9447_v63  ;;  %6179 = vmatprep.mubr.bf16.mxu1 %v9447_v63  ;;  %v5685_v47 = vpop.xlane.xlu1 %5684  ;;  %v5720_v35 = vadd.f32 1e-05, %v5704_v22  ;;  %v5687_v10 = vpop.xlane.xlu0 %5686 }
0x1197   :  { %7894 = vmatpush3.bf16.msra.mxu0 %v8930_v28  ;;  %7958 = vmatpush3.bf16.msra.mxu1 %v8932_v48  ;;  %9265 = vrsqrt.f32 %v5719_v8  ;;  %v5705_v62 = vmul.f32 0.0078125, %v5685_v47  ;;  %v5803_v49 = vpack.c.bf16 %v5789_v31, %v5788_v12  ;;  %v5706_v37 = vmul.f32 0.0078125, %v5687_v10 }
0x1198   :  { %v9258_v39 = vpop.eup %9257  ;;  %7895 = vmatprep.subr.bf16.mxu0 %v8933_v0  ;;  %7959 = vmatprep.subr.bf16.mxu1 %v8935_v55  ;;  %9267 = vrsqrt.f32 %v5718_v32 }
0x1199   :  { %v5746_v52 = vmul.f32 %v9258_v39, %v11372_v54  ;;  %v5721_v26 = vadd.f32 1e-05, %v5705_v62  ;;  %v5722_v32 = vadd.f32 1e-05, %v5706_v37 }
0x119a   :  { %v5689_v2 = vpop.xlane.xlu1 %5688  ;;  %v5691_v8 = vpop.xlane.xlu0 %5690 }
0x119b   :  { %7896 = vmatpush3.bf16.msra.mxu0 %v8934_v5  ;;  %7960 = vmatpush3.bf16.msra.mxu1 %v8936_v13  ;;  %v5768_v20 = vmul.f32 %v11521_v3, %v5746_v52  ;;  %9269 = vrsqrt.f32 %v5721_v26  ;;  %v5707_v54 = vmul.f32 0.0078125, %v5689_v2  ;;  %v5708_v31 = vmul.f32 0.0078125, %v5691_v8  ;;  %v8942_v8 = vld [vmem:[%s12256_s12 + $0x20] sm:$0xff]  }
0x119c   :  { %v9260_v61 = vpop.eup %9259  ;;  %9271 = vrsqrt.f32 %v5720_v35 }
0x119d   :  { %v9262_v19 = vpop.eup %9261  ;;  %6067 = vmatmul.mubr.bf16.gmra.mxu0 %v5803_v49  ;;  %6180 = vmatmul.mubr.bf16.gmra.mxu1 %v5803_v49  ;;  %v5747_v11 = vmul.f32 %v9260_v61, %v11392_v44  ;;  %v5790_v18 = vadd.f32 %v11528_v46, %v5768_v20  ;;  %v5723_v28 = vadd.f32 1e-05, %v5707_v54  ;;  %v5724_v26 = vadd.f32 1e-05, %v5708_v31  ;;  %v8947_v31 = vld [vmem:[%s12256_s12 + $0x18] sm:$0xff]  }
0x119e   :  { %6076 = vmatprep.mubr.bf16.mxu0 %v9447_v63  ;;  %6189 = vmatprep.mubr.bf16.mxu1 %v9447_v63  ;;  %v5748_v59 = vmul.f32 %v9262_v19, %v11389_v9  ;;  %v5693_v0 = vpop.xlane.xlu1 %5692 }
0x119f   :  { %v5769_v7 = vmul.f32 %v11521_v3, %v5747_v11  ;;  %9273 = vrsqrt.f32 %v5723_v28  ;;  %v5709_v9 = vmul.f32 0.0078125, %v5693_v0 }
0x11a0   :  { %v9264_v41 = vpop.eup %9263  ;;  %v5770_v58 = vmul.f32 %v11521_v3, %v5748_v59  ;;  %9275 = vrsqrt.f32 %v5722_v32 }
0x11a1   :  { %v5791_v51 = vadd.f32 %v11528_v46, %v5769_v7  ;;  %v5749_v44 = vmul.f32 %v9264_v41, %v11411_v38  ;;  %v5725_v39 = vadd.f32 1e-05, %v5709_v9  ;;  %v8944_v9 = vld [vmem:[%s12256_s12 + $0xa0] sm:$0xff]  }
0x11a2   :  { %v5792_v5 = vadd.f32 %v11528_v46, %v5770_v58  ;;  %v8939_v58 = vld [vmem:[%s12256_s12 + $0xe8] sm:$0xff]  }
0x11a3   :  { %v5804_v48 = vpack.c.bf16 %v5791_v51, %v5790_v18  ;;  %v5771_v17 = vmul.f32 %v11521_v3, %v5749_v44  ;;  %9277 = vrsqrt.f32 %v5725_v39  ;;  %7961 = vmatprep.subr.bf16.mxu1 %v8939_v58  ;;  %v8950_v39 = vld [vmem:[%s12256_s12 + $0xd0] sm:$0xff]  }
0x11a4   :  { %v9266_v55 = vpop.eup %9265  ;;  %9279 = vrsqrt.f32 %v5724_v26  ;;  %v8955_v26 = vld [vmem:[%s12256_s12 + $0x8] sm:$0xff]  }
0x11a5   :  { %6077 = vmatmul.mubr.bf16.gmra.mxu0 %v5804_v48  ;;  %6190 = vmatmul.mubr.bf16.gmra.mxu1 %v5804_v48  ;;  %v9268_v21 = vpop.eup %9267  ;;  %v5793_v38 = vadd.f32 %v11528_v46, %v5771_v17  ;;  %v5751_v47 = vmul.f32 %v9266_v55, %v11442_v24 }
0x11a6   :  { %6086 = vmatprep.mubr.bf16.mxu0 %v9447_v63  ;;  %6199 = vmatprep.mubr.bf16.mxu1 %v9447_v63  ;;  %v5750_v13 = vmul.f32 %v9268_v21, %v11420_v16  ;;  %v8943_v21 = vld [vmem:[%s12256_s12 + $0xe0] sm:$0xff]  }
0x11a7   :  { %v5805_v22 = vpack.c.bf16 %v5793_v38, %v5792_v5  ;;  %v5773_v62 = vmul.f32 %v11521_v3, %v5751_v47  ;;  %v8945_v38 = vld [vmem:[%s12256_s12 + $0x58] sm:$0xff]  }
0x11a8   :  { %v9270_v12 = vpop.eup %9269  ;;  %v5772_v49 = vmul.f32 %v11521_v3, %v5750_v13  ;;  %v8946_v47 = vld [vmem:[%s12256_s12 + $0xd8] sm:$0xff]   ;;  %v8949_v13 = vld [vmem:[%s12256_s12 + $0x50] sm:$0xff]  }
0x11a9   :  { %v9272_v52 = vpop.eup %9271  ;;  %v5795_v24 = vadd.f32 %v11528_v46, %v5773_v62  ;;  %v5753_v16 = vmul.f32 %v9270_v12, %v11461_v50  ;;  %v8948_v5 = vld [vmem:[%s12256_s12 + $0x98] sm:$0xff]   ;;  %v8952_v62 = vld [vmem:[%s12256_s12 + $0x90] sm:$0xff]   ;;  %v8953_v12 = vld [vmem:[%s12256_s12 + $0x48] sm:$0xff]  }
0x11aa   :  { %v5794_v61 = vadd.f32 %v11528_v46, %v5772_v49  ;;  %v5752_v35 = vmul.f32 %v9272_v52, %v11439_v56  ;;  %v8954_v52 = vld [vmem:[%s12256_s12 + $0xc8] sm:$0xff]  }
0x11ab   :  { %v5775_v19 = vmul.f32 %v11521_v3, %v5753_v16  ;;  %v8956_v49 = vld [vmem:[%s12256_s12 + $0x88] sm:$0xff]   ;;  %v8958_v16 = vld [vmem:[%s12256_s12 + $0xc0] sm:$0xff]  }
0x11ac   :  { %v5806_v2 = vpack.c.bf16 %v5795_v24, %v5794_v61  ;;  %v9274_v10 = vpop.eup %9273  ;;  %v5774_v11 = vmul.f32 %v11521_v3, %v5752_v35  ;;  %v8957_v24 = vld [vmem:[%s12256_s12 + $0x40] sm:$0xff]  }
0x11ad   :  { %6087 = vmatmul.mubr.bf16.gmra.mxu0 %v5805_v22  ;;  %6200 = vmatmul.mubr.bf16.gmra.mxu1 %v5805_v22  ;;  %v9276_v20 = vpop.eup %9275  ;;  %v5797_v50 = vadd.f32 %v11528_v46, %v5775_v19  ;;  %v5755_v54 = vmul.f32 %v9274_v10, %v11483_v42  ;;  %v8951_v22 = vld [vmem:[%s12256_s12 + $0x10] sm:$0xff]   ;;  %v8959_v61 = vld [vmem:[%s12256_s12] sm:$0xff]  }
0x11ae   :  { %6096 = vmatprep.mubr.bf16.mxu0 %v9447_v63  ;;  %6209 = vmatprep.mubr.bf16.mxu1 %v9447_v63  ;;  %v5796_v7 = vadd.f32 %v11528_v46, %v5774_v11  ;;  %v5754_v56 = vmul.f32 %v9276_v20, %v11464_v33  ;;  %v8960_v35 = vld [vmem:[%s12256_s12 + $0x80] sm:$0xff]  }
0x11af   :  { %v5777_v37 = vmul.f32 %v11521_v3, %v5755_v54  ;;  %v5842_v11 = vld [vmem:[%s12255_s11] sm:$0xf] }
0x11b0   :  { %v5807_v41 = vpack.c.bf16 %v5797_v50, %v5796_v7  ;;  %v9278_v18 = vpop.eup %9277  ;;  %v5776_v51 = vmul.f32 %v11521_v3, %v5754_v56 }
0x11b1   :  { %v9280_v59 = vpop.eup %9279  ;;  %v5799_v44 = vadd.f32 %v11528_v46, %v5777_v37  ;;  %v5757_v42 = vmul.f32 %v9278_v18, %v11505_v53 }
0x11b2   :  { %v5798_v28 = vadd.f32 %v11528_v46, %v5776_v51  ;;  %v5756_v33 = vmul.f32 %v9280_v59, %v11486_v25  ;;  %v8937_v25 = vld [vmem:[%s12256_s12 + $0x68] sm:$0xff]  }
0x11b3   :  { %v5779_v17 = vmul.f32 %v11521_v3, %v5757_v42  ;;  %7897 = vmatprep.subr.bf16.mxu0 %v8937_v25 }
0x11b4   :  { %v5808_v48 = vpack.c.bf16 %v5799_v44, %v5798_v28  ;;  %v5778_v0 = vmul.f32 %v11521_v3, %v5756_v33  ;;  %v8938_v3 = vld [vmem:[%s12256_s12 + $0x28] sm:$0xff]  }
0x11b5   :  { %6097 = vmatmul.mubr.bf16.gmra.mxu0 %v5806_v2  ;;  %6210 = vmatmul.mubr.bf16.gmra.mxu1 %v5806_v2  ;;  %v5801_v55 = vadd.f32 %v11528_v46, %v5779_v17  ;;  %v5844_v2 = vlaneseq }
0x11b6   :  { %6106 = vmatprep.mubr.bf16.mxu0 %v9447_v63  ;;  %6219 = vmatprep.mubr.bf16.mxu1 %v9447_v63  ;;  %v5800_v32 = vadd.f32 %v11528_v46, %v5778_v0  ;;  %v8941_v46 = vld [vmem:[%s12256_s12 + $0x60] sm:$0xff]  }
0x11b7   :  { %7898 = vmatpush3.bf16.msra.mxu0 %v8938_v3  ;;  %v5845_v19 = vshrl.u32 %v5844_v2, 7 }
0x11b8   :  { %v5809_v53 = vpack.c.bf16 %v5801_v55, %v5800_v32  ;;  %7899 = vmatprep.subr.bf16.mxu0 %v8941_v46 }
0x11b9   :  { %v5846_v10 = vsub.s32 0, %v5845_v19  ;;  %v5854_v20 = vsub.s32 2, %v5845_v19  ;;  %v5850_v50 = vsub.s32 1, %v5845_v19  ;;  %v5858_v7 = vsub.s32 3, %v5845_v19 }
0x11bb   :  { %7900 = vmatpush3.bf16.msra.mxu0 %v8942_v8  ;;  %v11682_v54 = vrot.slane %v5842_v11, %v5846_v10  ;;  %v11686_v18 = vrot.slane %v5842_v11, %v5850_v50  ;;  %v11689_v42 = vrot.slane %v5842_v11, %v5858_v7 }
0x11bc   :  { %7901 = vmatprep.subr.bf16.mxu0 %v8945_v38 }
0x11bd   :  { %6107 = vmatmul.mubr.bf16.gmra.mxu0 %v5807_v41  ;;  %6220 = vmatmul.mubr.bf16.gmra.mxu1 %v5807_v41  ;;  %v11684_v41 = vrot.slane %v5842_v11, %v5854_v20 }
0x11be   :  { %6116 = vmatprep.mubr.bf16.mxu0 %v9447_v63  ;;  %6229 = vmatprep.mubr.bf16.mxu1 %v9447_v63 }
0x11bf   :  { %7902 = vmatpush3.bf16.msra.mxu0 %v8947_v31 }
0x11c0   :  { %7903 = vmatprep.subr.bf16.mxu0 %v8949_v13 }
0x11c3   :  { %7904 = vmatpush3.bf16.msra.mxu0 %v8951_v22 }
0x11c4   :  { %7905 = vmatprep.subr.bf16.mxu0 %v8953_v12 }
0x11c5   :  { %6117 = vmatmul.mubr.bf16.gmra.mxu0 %v5808_v48  ;;  %6230 = vmatmul.mubr.bf16.gmra.mxu1 %v5808_v48 }
0x11c6   :  { %6126 = vmatprep.mubr.bf16.mxu0 %v9447_v63  ;;  %6239 = vmatprep.mubr.bf16.mxu1 %v9447_v63  ;;  %v8940_v63 = vld [vmem:[%s12256_s12 + $0xa8] sm:$0xff]  }
0x11c7   :  { %7962 = vmatpush3.bf16.msra.mxu1 %v8940_v63  ;;  %7906 = vmatpush3.bf16.msra.mxu0 %v8955_v26 }
0x11c8   :  { %7963 = vmatprep.subr.bf16.mxu1 %v8943_v21  ;;  %7907 = vmatprep.subr.bf16.mxu0 %v8957_v24 }
0x11cb   :  { %7964 = vmatpush3.bf16.msra.mxu1 %v8944_v9  ;;  %7908 = vmatpush3.bf16.msra.mxu0 %v8959_v61 }
0x11cc   :  { %7965 = vmatprep.subr.bf16.mxu1 %v8946_v47 }
0x11cd   :  { %6127 = vmatmul.mubr.bf16.gmra.mxu0 %v5809_v53  ;;  %6240 = vmatmul.mubr.bf16.gmra.mxu1 %v5809_v53 }
0x11cf   :  { %7966 = vmatpush3.bf16.msra.mxu1 %v8948_v5 }
0x11d0   :  { %7967 = vmatprep.subr.bf16.mxu1 %v8950_v39 }
0x11d3   :  { %7968 = vmatpush3.bf16.msra.mxu1 %v8952_v62 }
0x11d4   :  { %7969 = vmatprep.subr.bf16.mxu1 %v8954_v52 }
0x11d7   :  { %7970 = vmatpush3.bf16.msra.mxu1 %v8956_v49 }
0x11d8   :  { %7971 = vmatprep.subr.bf16.mxu1 %v8958_v16 }
0x11db   :  { %7972 = vmatpush3.bf16.msra.mxu1 %v8960_v35 }
0x1255   :  { %v6058_v56 = vpop.f32.mrf.mxu0  ;;  %v6171_v37 = vpop.f32.mrf.mxu1 }
0x1256   :  { %v6059_v44 = vadd.f32 %v6058_v56, %v11682_v54  ;;  %v6172_v28 = vadd.f32 %v6171_v37, %v11684_v41 }
0x1257   :  { %v6060_v51 = vpop.f32.mrf.mxu0  ;;  %v6173_v59 = vpop.f32.mrf.mxu1 }
0x1258   :  { %v6061_v17 = vadd.f32 %v6060_v51, %v11686_v18  ;;  %v6314_v53 = vmul.f32 0.70710677, %v6059_v44  ;;  %v6174_v25 = vadd.f32 %v6173_v59, %v11689_v42  ;;  %v6316_v58 = vmul.f32 0.70710677, %v6172_v28 }
0x1259   :  { %v6062_v33 = vpop.f32.mrf.mxu0  ;;  %v6175_v48 = vpop.f32.mrf.mxu1  ;;  %v11704_v56 = vmul.f32 0.5, %v6059_v44 }
0x125a   :  { %v6063_v0 = vadd.f32 %v6062_v33, %v11682_v54  ;;  %v6315_v46 = vmul.f32 0.70710677, %v6061_v17  ;;  %v6176_v21 = vadd.f32 %v6175_v48, %v11684_v41  ;;  %9281 = verf.f32 %v6314_v53 }
0x125b   :  { %v6064_v55 = vpop.f32.mrf.mxu0  ;;  %v6177_v32 = vpop.f32.mrf.mxu1  ;;  %v6317_v47 = vmul.f32 0.70710677, %v6174_v25  ;;  %9283 = verf.f32 %v6316_v58  ;;  %v11706_v33 = vmul.f32 0.5, %v6172_v28  ;;  %v11708_v48 = vmul.f32 0.5, %v6061_v17 }
0x125c   :  { %v6318_v8 = vmul.f32 0.70710677, %v6063_v0  ;;  %v6065_v31 = vadd.f32 %v6064_v55, %v11686_v18  ;;  %9285 = verf.f32 %v6315_v46  ;;  %v6320_v39 = vmul.f32 0.70710677, %v6176_v21 }
0x125d   :  { %v6068_v3 = vpop.f32.mrf.mxu0  ;;  %v6181_v63 = vpop.f32.mrf.mxu1  ;;  %v6178_v22 = vadd.f32 %v6177_v32, %v11689_v42  ;;  %v11710_v32 = vmul.f32 0.5, %v6174_v25  ;;  %v11712_v53 = vmul.f32 0.5, %v6063_v0 }
0x125e   :  { %9287 = verf.f32 %v6318_v8  ;;  %v6069_v62 = vadd.f32 %v6068_v3, %v11682_v54  ;;  %v6182_v26 = vadd.f32 %v6181_v63, %v11684_v41  ;;  %v6319_v49 = vmul.f32 0.70710677, %v6065_v31 }
0x125f   :  { %v6070_v9 = vpop.f32.mrf.mxu0  ;;  %v6183_v38 = vpop.f32.mrf.mxu1  ;;  %9289 = verf.f32 %v6317_v47  ;;  %v6321_v35 = vmul.f32 0.70710677, %v6178_v22  ;;  %v11718_v63 = vmul.f32 0.5, %v6176_v21  ;;  %v11721_v8 = vmul.f32 0.5, %v6065_v31 }
0x1260   :  { %v6071_v24 = vadd.f32 %v6070_v9, %v11686_v18  ;;  %9291 = verf.f32 %v6320_v39  ;;  %v6322_v19 = vmul.f32 0.70710677, %v6069_v62  ;;  %v6324_v50 = vmul.f32 0.70710677, %v6182_v26 }
0x1261   :  { %v6072_v5 = vpop.f32.mrf.mxu0  ;;  %v6185_v13 = vpop.f32.mrf.mxu1  ;;  %v6184_v7 = vadd.f32 %v6183_v38, %v11689_v42  ;;  %9293 = verf.f32 %v6319_v49  ;;  %v11723_v9 = vmul.f32 0.5, %v6178_v22  ;;  %v11732_v21 = vmul.f32 0.5, %v6182_v26 }
0x1262   :  { %v6073_v2 = vadd.f32 %v6072_v5, %v11682_v54  ;;  %v6186_v10 = vadd.f32 %v6185_v13, %v11684_v41  ;;  %v6323_v37 = vmul.f32 0.70710677, %v6071_v24  ;;  %9295 = verf.f32 %v6321_v35 }
0x1263   :  { %v6074_v12 = vpop.f32.mrf.mxu0  ;;  %v6187_v52 = vpop.f32.mrf.mxu1  ;;  %9297 = verf.f32 %v6322_v19  ;;  %v6325_v46 = vmul.f32 0.70710677, %v6184_v7  ;;  %v11730_v5 = vmul.f32 0.5, %v6069_v62  ;;  %v11735_v31 = vmul.f32 0.5, %v6071_v24 }
0x1264   :  { %v6326_v55 = vmul.f32 0.70710677, %v6073_v2  ;;  %v6328_v58 = vmul.f32 0.70710677, %v6186_v10  ;;  %9299 = verf.f32 %v6324_v50  ;;  %v6075_v28 = vadd.f32 %v6074_v12, %v11686_v18 }
0x1265   :  { %v6078_v16 = vpop.f32.mrf.mxu0  ;;  %v6191_v61 = vpop.f32.mrf.mxu1  ;;  %9301 = verf.f32 %v6323_v37  ;;  %v6188_v0 = vadd.f32 %v6187_v52, %v11689_v42  ;;  %v11737_v22 = vmul.f32 0.5, %v6184_v7  ;;  %v11744_v62 = vmul.f32 0.5, %v6073_v2 }
0x1266   :  { %9303 = verf.f32 %v6326_v55  ;;  %v6079_v13 = vadd.f32 %v6078_v16, %v11682_v54  ;;  %v6192_v12 = vadd.f32 %v6191_v61, %v11684_v41  ;;  %v11746_v26 = vmul.f32 0.5, %v6186_v10 }
0x1267   :  { %v6080_v11 = vpop.f32.mrf.mxu0  ;;  %v6193_v20 = vpop.f32.mrf.mxu1  ;;  %9305 = verf.f32 %v6328_v58  ;;  %v6327_v19 = vmul.f32 0.70710677, %v6075_v28  ;;  %v11748_v24 = vmul.f32 0.5, %v6075_v28  ;;  %v6329_v7 = vmul.f32 0.70710677, %v6188_v0 }
0x1268   :  { %v9282_v17 = vpop.eup %9281  ;;  %9307 = verf.f32 %v6325_v46  ;;  %v6081_v37 = vadd.f32 %v6080_v11, %v11686_v18  ;;  %v11755_v1 = vmul.f32 0.5, %v6188_v0  ;;  %v6330_v46 = vmul.f32 0.70710677, %v6079_v13 }
0x1269   :  { %v6082_v51 = vpop.f32.mrf.mxu0  ;;  %v6195_v59 = vpop.f32.mrf.mxu1  ;;  %v6442_v50 = vadd.f32 1.0, %v9282_v17  ;;  %v11758_v43 = vmul.f32 0.5, %v6079_v13  ;;  %v6332_v17 = vmul.f32 0.70710677, %v6192_v12  ;;  %v6194_v28 = vadd.f32 %v6193_v20, %v11689_v42 }
0x126a   :  { %v9284_v47 = vpop.eup %9283  ;;  %v6083_v2 = vadd.f32 %v6082_v51, %v11682_v54  ;;  %9309 = verf.f32 %v6327_v19  ;;  %v11766_v0 = vadd.f32 %v6195_v59, %v11684_v41  ;;  %v11771_v51 = vmul.f32 0.5, %v6192_v12 }
0x126b   :  { %v11714_v3 = vpop.f32.mrf.mxu0  ;;  %v11716_v44 = vpop.f32.mrf.mxu1  ;;  %v6444_v58 = vadd.f32 1.0, %v9284_v47  ;;  %v11769_v47 = vmul.f32 %v6442_v50, %v11704_v56  ;;  %9311 = verf.f32 %v6329_v7  ;;  %v6331_v13 = vmul.f32 0.70710677, %v6081_v37 }
0x126c   :  { %v9286_v39 = vpop.eup %9285  ;;  %9313 = verf.f32 %v6330_v46  ;;  %v6334_v34 = vmul.f32 0.70710677, %v6083_v2  ;;  %v6333_v56 = vmul.f32 0.70710677, %v6194_v28  ;;  %v11785_v12 = vadd.f32 %v11714_v3, %v11686_v18 }
0x126d   :  { %v11726_v25 = vpop.f32.mrf.mxu0  ;;  %v11728_v38 = vpop.f32.mrf.mxu1  ;;  %v6443_v30 = vadd.f32 1.0, %v9286_v39  ;;  %v11774_v20 = vmul.f32 %v6444_v58, %v11706_v33  ;;  %9315 = verf.f32 %v6332_v17  ;;  %v6336_v58 = vmul.f32 0.70710677, %v11766_v0 }
0x126e   :  { %v9288_v35 = vpop.eup %9287  ;;  %v11796_v46 = vadd.f32 %v11716_v44, %v11689_v42  ;;  %9317 = verf.f32 %v6331_v13  ;;  %v11800_v3 = vmul.f32 0.5, %v6194_v28  ;;  %v6335_v28 = vmul.f32 0.70710677, %v11785_v12 }
0x126f   :  { %v11740_v52 = vpop.f32.mrf.mxu0  ;;  %v11742_v49 = vpop.f32.mrf.mxu1  ;;  %v6446_v40 = vadd.f32 1.0, %v9288_v35  ;;  %v11788_v33 = vmul.f32 %v6443_v30, %v11708_v48  ;;  %9319 = verf.f32 %v6334_v34  ;;  %v11816_v13 = vadd.f32 %v11726_v25, %v11682_v54 }
0x1270   :  { %v9290_v16 = vpop.eup %9289  ;;  %9321 = verf.f32 %v6333_v56  ;;  %v6337_v34 = vmul.f32 0.70710677, %v11796_v46  ;;  %v11833_v4 = vadd.f32 %v11740_v52, %v11686_v18 }
0x1271   :  { %v11751_v55 = vpop.f32.mrf.mxu0  ;;  %v11753_v61 = vpop.f32.mrf.mxu1  ;;  %v6445_v45 = vadd.f32 1.0, %v9290_v16  ;;  %v11781_v16 = vmul.f32 %v6446_v40, %v11712_v53 }
0x1272   :  { %v9292_v10 = vpop.eup %9291  ;;  %9323 = verf.f32 %v6336_v58  ;;  %v11826_v56 = vadd.f32 %v11751_v55, %v11682_v54  ;;  %v11842_v55 = vadd.f32 %v11742_v49, %v11689_v42  ;;  %v11850_v52 = vadd.f32 %v11753_v61, %v11684_v41 }
0x1273   :  { %v11761_v27 = vpop.f32.mrf.mxu0  ;;  %v11763_v11 = vpop.f32.mrf.mxu1  ;;  %v6448_v57 = vadd.f32 1.0, %v9292_v10  ;;  %v11791_v7 = vmul.f32 %v6445_v45, %v11710_v32  ;;  %v11798_v10 = vmul.f32 0.5, %v6081_v37  ;;  %v11805_v45 = vmul.f32 0.5, %v6083_v2 }
0x1274   :  { %v9294_v35 = vpop.eup %9293  ;;  %v6570_v37 = vpack.c.bf16 %v11781_v16, %v11769_v47  ;;  %v11821_v2 = vadd.f32 %v11728_v38, %v11684_v41  ;;  %9325 = verf.f32 %v6335_v28  ;;  %v6342_v49 = vmul.f32 0.70710677, %v11826_v56 }
0x1275   :  { %v11776_v39 = vpop.f32.mrf.mxu0  ;;  %v11778_v19 = vpop.f32.mrf.mxu1  ;;  %v6447_v53 = vadd.f32 1.0, %v9294_v35  ;;  %v11803_v30 = vmul.f32 %v6448_v57, %v11718_v63  ;;  %v11863_v28 = vmul.f32 0.5, %v11766_v0  ;;  %v6339_v61 = vmul.f32 0.70710677, %v11833_v4 }
0x1276   :  { %v9296_v59 = vpop.eup %9295  ;;  %9327 = verf.f32 %v6337_v34 }
0x1277   :  { %v9298_v50 = vpop.eup %9297  ;;  %v6449_v48 = vadd.f32 1.0, %v9296_v59  ;;  %v11807_v32 = vpop.f32.mrf.mxu0  ;;  %v6511_v59 = vmul.f32 %v6447_v53, %v11721_v8  ;;  %v6572_v25 = vpack.c.bf16 %v11803_v30, %v11774_v20 }
0x1278   :  { %v9300_v40 = vpop.eup %9299  ;;  %v11809_v29 = vpop.f32.mrf.mxu1  ;;  %v6450_v63 = vadd.f32 1.0, %v9298_v50 }
0x1279   :  { %v9302_v17 = vpop.eup %9301  ;;  %v6452_v47 = vadd.f32 1.0, %v9300_v40  ;;  %v6513_v50 = vmul.f32 %v6449_v48, %v11723_v9  ;;  %v11835_v38 = vpop.f32.mrf.mxu0  ;;  %v6338_v40 = vmul.f32 0.70710677, %v11816_v13  ;;  %v6340_v9 = vmul.f32 0.70710677, %v11821_v2 }
0x127a   :  { %v9304_v44 = vpop.eup %9303  ;;  %v6451_v16 = vadd.f32 1.0, %v9302_v17  ;;  %v11837_v60 = vpop.f32.mrf.mxu1  ;;  %v11845_v20 = vmul.f32 %v6450_v63, %v11730_v5 }
0x127b   :  { %v9306_v57 = vpop.eup %9305  ;;  %v6454_v58 = vadd.f32 1.0, %v9304_v44  ;;  %v11853_v17 = vmul.f32 %v6452_v47, %v11732_v21  ;;  %v11867_v63 = vpop.f32.mrf.mxu0  ;;  %9329 = verf.f32 %v6338_v40 }
0x127c   :  { %v9308_v35 = vpop.eup %9307  ;;  %v6456_v8 = vadd.f32 1.0, %v9306_v57  ;;  %v11856_v30 = vmul.f32 %v6451_v16, %v11735_v31  ;;  %v6571_v57 = vpack.c.bf16 %v6511_v59, %v11788_v33  ;;  %v11869_v21 = vpop.f32.mrf.mxu1  ;;  %9331 = verf.f32 %v6340_v9 }
0x127d   :  { %v9310_v53 = vpop.eup %9309  ;;  %v6453_v48 = vadd.f32 1.0, %v9308_v35  ;;  %v11860_v5 = vmul.f32 %v6454_v58, %v11744_v62  ;;  %v6341_v35 = vmul.f32 0.70710677, %v11842_v55  ;;  %v6573_v62 = vpack.c.bf16 %v6513_v50, %v11791_v7 }
0x127e   :  { %v9312_v44 = vpop.eup %9311  ;;  %v11872_v34 = vmul.f32 %v6456_v8, %v11746_v26  ;;  %v6455_v0 = vadd.f32 1.0, %v9310_v53  ;;  %v6344_v16 = vmul.f32 0.70710677, %v11850_v52  ;;  %v11879_v33 = vadd.f32 %v11761_v27, %v11686_v18  ;;  %6897 = vmatprep.mubr.bf16.mxu0 %v6571_v57  ;;  %v11896_v40 = vpop.f32.mrf.mxu1 }
0x127f   :  { %v9314_v31 = vpop.eup %9313  ;;  %v11882_v59 = vmul.f32 %v6453_v48, %v11737_v22  ;;  %v6457_v26 = vadd.f32 1.0, %v9312_v44  ;;  %9333 = verf.f32 %v6342_v49  ;;  %v11886_v58 = vadd.f32 %v11763_v11, %v11689_v42  ;;  %6994 = vmatprep.mubr.bf16.mxu1 %v6573_v62  ;;  %6898 = vmatmul.mubr.bf16.vlgmr.msra.gmra.mxu0 %v6570_v37  ;;  %v11894_v22 = vpop.f32.mrf.mxu0 }
0x1280   :  { %v9316_v47 = vpop.eup %9315  ;;  %v6458_v50 = vadd.f32 1.0, %v9314_v31  ;;  %v11889_v8 = vmul.f32 0.5, %v11785_v12  ;;  %v11892_v27 = vmul.f32 0.5, %v11796_v46  ;;  %9335 = verf.f32 %v6339_v61  ;;  %6995 = vmatmul.mubr.bf16.vlgmr.msra.gmra.mxu1 %v6572_v25  ;;  %v11921_v62 = vpop.f32.mrf.mxu1 }
0x1281   :  { %v9318_v7 = vpop.eup %9317  ;;  %v6574_v11 = vpack.c.bf16 %v11860_v5, %v11845_v20  ;;  %v6576_v37 = vpack.c.bf16 %v11872_v34, %v11853_v17  ;;  %v6460_v53 = vadd.f32 1.0, %v9316_v47  ;;  %9337 = verf.f32 %v6341_v35 }
0x1282   :  { %v9320_v9 = vpop.eup %9319  ;;  %v6519_v48 = vmul.f32 %v6455_v0, %v11748_v24  ;;  %9339 = verf.f32 %v6344_v16  ;;  %v6343_v46 = vmul.f32 0.70710677, %v11879_v33  ;;  %v6099_v25 = vadd.f32 %v11776_v39, %v11682_v54  ;;  %v11919_v39 = vpop.f32.mrf.mxu0 }
0x1283   :  { %v9322_v12 = vpop.eup %9321  ;;  %v6521_v44 = vmul.f32 %v6457_v26, %v11755_v1  ;;  %v11908_v61 = vmul.f32 0.5, %v11816_v13  ;;  %v6345_v20 = vmul.f32 0.70710677, %v11886_v58  ;;  %v6212_v5 = vadd.f32 %v11778_v19, %v11684_v41 }
0x1284   :  { %v9324_v49 = vpop.eup %9323  ;;  %v11914_v57 = vmul.f32 %v6458_v50, %v11758_v43  ;;  %v6459_v24 = vadd.f32 1.0, %v9318_v7  ;;  %v6462_v31 = vadd.f32 1.0, %v9320_v9  ;;  %v11917_v35 = vmul.f32 0.5, %v11821_v2 }
0x1285   :  { %v11924_v1 = vmul.f32 %v6460_v53, %v11771_v51  ;;  %v6461_v13 = vadd.f32 1.0, %v9322_v12  ;;  %v11927_v47 = vmul.f32 0.5, %v11833_v4  ;;  %v6101_v43 = vadd.f32 %v11807_v32, %v11686_v18  ;;  %v9326_v19 = vpop.eup %9325  ;;  %v11950_v53 = vpop.f32.mrf.mxu0 }
0x1286   :  { %v6464_v0 = vadd.f32 1.0, %v9324_v49  ;;  %v11932_v16 = vmul.f32 0.5, %v11842_v55  ;;  %9341 = verf.f32 %v6343_v46  ;;  %v6346_v2 = vmul.f32 0.70710677, %v6099_v25  ;;  %v9328_v26 = vpop.eup %9327 }
0x1287   :  { %v11935_v7 = vmul.f32 0.5, %v11826_v56  ;;  %9343 = verf.f32 %v6345_v20  ;;  %v6348_v51 = vmul.f32 0.70710677, %v6212_v5  ;;  %v6103_v4 = vadd.f32 %v11835_v38, %v11682_v54  ;;  %v11952_v56 = vpop.f32.mrf.mxu1 }
0x1288   :  { %v11940_v50 = vmul.f32 %v6459_v24, %v11798_v10  ;;  %v11943_v32 = vmul.f32 %v6462_v31, %v11805_v45  ;;  %v11946_v55 = vmul.f32 0.5, %v11850_v52  ;;  %v6214_v9 = vadd.f32 %v11809_v29, %v11689_v42  ;;  %v9330_v49 = vpop.eup %9329 }
0x1289   :  { %v6463_v12 = vadd.f32 1.0, %v9326_v19  ;;  %v6347_v46 = vmul.f32 0.70710677, %v6101_v43  ;;  %v6216_v38 = vadd.f32 %v11837_v60, %v11684_v41  ;;  %v6575_v10 = vpack.c.bf16 %v6519_v48, %v11856_v30  ;;  %v9332_v29 = vpop.eup %9331 }
0x128a   :  { %v11958_v45 = vmul.f32 %v6464_v0, %v11863_v28  ;;  %v6465_v52 = vadd.f32 1.0, %v9328_v26  ;;  %9345 = verf.f32 %v6346_v2  ;;  %v6577_v20 = vpack.c.bf16 %v6521_v44, %v11882_v59  ;;  %v6227_v44 = vpop.f32.mrf.mxu1 }
0x128b   :  { %v11962_v24 = vmul.f32 %v6461_v13, %v11800_v3  ;;  %v11965_v31 = vmul.f32 0.5, %v11879_v33  ;;  %9347 = verf.f32 %v6348_v51  ;;  %v6350_v19 = vmul.f32 0.70710677, %v6103_v4  ;;  %6905 = vmatprep.mubr.bf16.mxu0 %v6575_v10  ;;  %v6114_v3 = vpop.f32.mrf.mxu0 }
0x128c   :  { %v9334_v60 = vpop.eup %9333  ;;  %v6578_v30 = vpack.c.bf16 %v11943_v32, %v11914_v57  ;;  %v11970_v28 = vmul.f32 0.5, %v11886_v58  ;;  %v6349_v48 = vmul.f32 0.70710677, %v6214_v9  ;;  %v6105_v59 = vadd.f32 %v11867_v63, %v11686_v18  ;;  %7002 = vmatprep.mubr.bf16.mxu1 %v6577_v20  ;;  %6906 = vmatmul.mubr.bf16.gmra.mxu0 %v6574_v11 }
0x128d   :  { %v9336_v33 = vpop.eup %9335  ;;  %v11974_v13 = vmul.f32 0.5, %v6099_v25  ;;  %v11976_v0 = vmul.f32 0.5, %v6212_v5  ;;  %9349 = verf.f32 %v6347_v46  ;;  %v6352_v2 = vmul.f32 0.70710677, %v6216_v38  ;;  %7003 = vmatmul.mubr.bf16.gmra.mxu1 %v6576_v37  ;;  %v11993_v20 = vpop.f32.mrf.mxu0 }
0x128e   :  { %v9338_v58 = vpop.eup %9337  ;;  %v11984_v63 = vmul.f32 %v6463_v12, %v11889_v8  ;;  %v11987_v11 = vmul.f32 %v6465_v52, %v11892_v27  ;;  %v11989_v25 = vmul.f32 0.5, %v6101_v43  ;;  %v6466_v51 = vadd.f32 1.0, %v9330_v49  ;;  %v11995_v8 = vpop.f32.mrf.mxu1 }
0x128f   :  { %v9340_v5 = vpop.eup %9339  ;;  %v6470_v46 = vadd.f32 1.0, %v9334_v60  ;;  %9351 = verf.f32 %v6350_v19  ;;  %v6218_v17 = vadd.f32 %v11869_v21, %v11689_v42  ;;  %v6468_v34 = vadd.f32 1.0, %v9332_v29 }
0x1290   :  { %v6467_v37 = vadd.f32 1.0, %v9336_v33  ;;  %9353 = verf.f32 %v6349_v48  ;;  %v6351_v10 = vmul.f32 0.70710677, %v6105_v59  ;;  %v6469_v12 = vadd.f32 1.0, %v9338_v58 }
0x1291   :  { %v11997_v27 = vmul.f32 0.5, %v6214_v9  ;;  %9355 = verf.f32 %v6352_v2  ;;  %v6111_v43 = vadd.f32 %v11919_v39, %v11686_v18  ;;  %v6472_v49 = vadd.f32 1.0, %v9340_v5 }
0x1292   :  { %v12001_v52 = vmul.f32 0.5, %v6103_v4  ;;  %v12003_v19 = vmul.f32 0.5, %v6216_v38  ;;  %v12006_v21 = vadd.f32 %v6114_v3, %v11686_v18  ;;  %v12009_v60 = vmul.f32 %v6466_v51, %v11908_v61  ;;  %v6120_v3 = vpop.f32.mrf.mxu0  ;;  %v6233_v61 = vpop.f32.mrf.mxu1 }
0x1293   :  { %v9342_v29 = vpop.eup %9341  ;;  %v12012_v48 = vmul.f32 %v6470_v46, %v11935_v7  ;;  %v12014_v9 = vmul.f32 0.5, %v6105_v59  ;;  %v6353_v33 = vmul.f32 0.70710677, %v6218_v17  ;;  %v12017_v39 = vmul.f32 %v6468_v34, %v11917_v35 }
0x1294   :  { %v9344_v2 = vpop.eup %9343  ;;  %v12020_v4 = vmul.f32 %v6467_v37, %v11927_v47  ;;  %9357 = verf.f32 %v6351_v10  ;;  %v6109_v38 = vadd.f32 %v11894_v22, %v11682_v54  ;;  %v12025_v58 = vmul.f32 %v6469_v12, %v11932_v16  ;;  %v6122_v12 = vpop.f32.mrf.mxu0 }
0x1295   :  { %v12027_v7 = vmul.f32 0.5, %v6218_v17  ;;  %v6355_v59 = vmul.f32 0.70710677, %v6111_v43  ;;  %v6224_v5 = vadd.f32 %v11921_v62, %v11689_v42  ;;  %v12032_v35 = vmul.f32 %v6472_v49, %v11946_v55  ;;  %v6235_v49 = vpop.f32.mrf.mxu1 }
0x1296   :  { %v6471_v47 = vadd.f32 1.0, %v9342_v29  ;;  %v12036_v51 = vadd.f32 %v11896_v40, %v11684_v41  ;;  %v6359_v22 = vmul.f32 0.70710677, %v12006_v21  ;;  %v6473_v17 = vadd.f32 1.0, %v9344_v2 }
0x1297   :  { %v9346_v46 = vpop.eup %9345  ;;  %9359 = verf.f32 %v6353_v33  ;;  %v12042_v34 = vadd.f32 %v6227_v44, %v11689_v42  ;;  %v12044_v37 = vmul.f32 0.5, %v6109_v38  ;;  %v6354_v55 = vmul.f32 0.70710677, %v6109_v38 }
0x1298   :  { %v9348_v62 = vpop.eup %9347  ;;  %v6113_v10 = vadd.f32 %v11950_v53, %v11682_v54  ;;  %v6579_v40 = vpack.c.bf16 %v11984_v63, %v11940_v50  ;;  %9361 = verf.f32 %v6355_v59  ;;  %v6357_v29 = vmul.f32 0.70710677, %v6224_v5 }
0x1299   :  { %v6361_v2 = vmul.f32 0.70710677, %v12042_v34  ;;  %v6581_v44 = vpack.c.bf16 %v11987_v11, %v11962_v24  ;;  %v6584_v16 = vpack.c.bf16 %v12032_v35, %v12017_v39  ;;  %v6474_v38 = vadd.f32 1.0, %v9346_v46 }
0x129a   :  { %v9350_v33 = vpop.eup %9349  ;;  %v6356_v26 = vmul.f32 0.70710677, %v12036_v51  ;;  %9363 = verf.f32 %v6359_v22  ;;  %6913 = vmatprep.mubr.bf16.mxu0 %v6579_v40  ;;  %v6476_v53 = vadd.f32 1.0, %v9348_v62  ;;  %v6226_v50 = vadd.f32 %v11952_v56, %v11684_v41  ;;  %v6124_v56 = vpop.f32.mrf.mxu0 }
0x129b   :  { %9365 = verf.f32 %v6361_v2  ;;  %7010 = vmatprep.mubr.bf16.mxu1 %v6581_v44  ;;  %6914 = vmatmul.mubr.bf16.gmra.mxu0 %v6578_v30  ;;  %v12062_v24 = vadd.f32 %v6120_v3, %v11686_v18  ;;  %v6535_v11 = vmul.f32 %v6471_v47, %v11965_v31  ;;  %v6537_v59 = vmul.f32 %v6473_v17, %v11970_v28  ;;  %v6237_v62 = vpop.f32.mrf.mxu1 }
0x129c   :  { %v9352_v63 = vpop.eup %9351  ;;  %9367 = verf.f32 %v6354_v55  ;;  %v6358_v22 = vmul.f32 0.70710677, %v6113_v10  ;;  %v12311_v46 = vpack.c.bf16 %v11958_v45, %v11924_v1  ;;  %v6475_v2 = vadd.f32 1.0, %v9350_v33 }
0x129d   :  { %v9354_v40 = vpop.eup %9353  ;;  %v12069_v57 = vmul.f32 0.5, %v6111_v43  ;;  %9369 = verf.f32 %v6357_v29  ;;  %v12072_v32 = vadd.f32 %v6233_v61, %v11689_v42  ;;  %v12075_v31 = vmul.f32 %v6474_v38, %v11974_v13 }
0x129e   :  { %7011 = vmatmul.mubr.bf16.gmra.mxu1 %v12311_v46  ;;  %v9356_v30 = vpop.eup %9355  ;;  %9371 = verf.f32 %v6356_v26  ;;  %v12077_v28 = vmul.f32 0.5, %v6224_v5  ;;  %v6363_v1 = vmul.f32 0.70710677, %v12062_v24  ;;  %v12081_v45 = vmul.f32 %v6476_v53, %v11976_v0  ;;  %v6128_v26 = vpop.f32.mrf.mxu0 }
0x129f   :  { %v6478_v3 = vadd.f32 1.0, %v9352_v63  ;;  %v12083_v47 = vmul.f32 0.5, %v6113_v10  ;;  %v6360_v43 = vmul.f32 0.70710677, %v6226_v50  ;;  %9373 = verf.f32 %v6358_v22  ;;  %v12092_v5 = vpop.f32.mrf.mxu1 }
0x12a0   :  { %v12085_v17 = vmul.f32 0.5, %v6226_v50  ;;  %v12089_v61 = vadd.f32 %v11993_v20, %v11682_v54  ;;  %v6365_v13 = vmul.f32 0.70710677, %v12072_v32  ;;  %v12095_v0 = vmul.f32 %v6475_v2, %v11989_v25  ;;  %v6130_v46 = vpop.f32.mrf.mxu0 }
0x12a1   :  { %v9358_v55 = vpop.eup %9357  ;;  %v6477_v29 = vadd.f32 1.0, %v9354_v40  ;;  %v6480_v10 = vadd.f32 1.0, %v9356_v30  ;;  %v12098_v44 = vadd.f32 %v6122_v12, %v11682_v54  ;;  %9375 = verf.f32 %v6363_v1 }
0x12a2   :  { %v12101_v33 = vadd.f32 %v6235_v49, %v11684_v41  ;;  %v12104_v20 = vadd.f32 %v6124_v56, %v11686_v18  ;;  %v12107_v38 = vadd.f32 %v6237_v62, %v11689_v42  ;;  %v12110_v53 = vmul.f32 %v6478_v3, %v12001_v52  ;;  %v6243_v56 = vpop.f32.mrf.mxu1  ;;  %v6132_v39 = vpop.f32.mrf.mxu0 }
0x12a3   :  { %9377 = verf.f32 %v6360_v43  ;;  %v6583_v25 = vpack.c.bf16 %v6535_v11, %v12020_v4  ;;  %v6585_v50 = vpack.c.bf16 %v6537_v59, %v12025_v58  ;;  %v6362_v63 = vmul.f32 0.70710677, %v12089_v61 }
0x12a4   :  { %v9360_v12 = vpop.eup %9359  ;;  %v12117_v49 = vadd.f32 %v11995_v8, %v11684_v41  ;;  %9379 = verf.f32 %v6365_v13  ;;  %v6367_v22 = vmul.f32 0.70710677, %v12104_v20  ;;  %v12121_v52 = vmul.f32 %v6480_v10, %v12003_v19  ;;  %v6245_v35 = vpop.f32.mrf.mxu1 }
0x12a5   :  { %v6479_v62 = vadd.f32 1.0, %v9358_v55  ;;  %v6366_v4 = vmul.f32 0.70710677, %v12098_v44  ;;  %v6369_v58 = vmul.f32 0.70710677, %v12107_v38  ;;  %6921 = vmatprep.mubr.bf16.mxu0 %v6583_v25  ;;  %7018 = vmatprep.mubr.bf16.mxu1 %v6585_v50  ;;  %v9362_v11 = vpop.eup %9361  ;;  %v6295_v59 = vmul.f32 0.5, %v12006_v21 }
0x12a6   :  { %v6368_v8 = vmul.f32 0.70710677, %v12101_v33  ;;  %9381 = verf.f32 %v6367_v22  ;;  %v12128_v40 = vadd.f32 %v6128_v26, %v11682_v54  ;;  %v12312_v19 = vpack.c.bf16 %v12012_v48, %v12009_v60  ;;  %7019 = vmatmul.mubr.bf16.gmra.mxu1 %v6584_v16 }
0x12a7   :  { %v9364_v2 = vpop.eup %9363  ;;  %v12137_v30 = vmul.f32 %v6477_v29, %v11997_v27  ;;  %v6297_v21 = vmul.f32 0.5, %v12042_v34  ;;  %9383 = verf.f32 %v6369_v58  ;;  %v12141_v1 = vadd.f32 %v6130_v46, %v11686_v18  ;;  %v6134_v46 = vpop.f32.mrf.mxu0 }
0x12a8   :  { %6922 = vmatmul.mubr.bf16.gmra.mxu0 %v12312_v19  ;;  %v9366_v3 = vpop.eup %9365  ;;  %v6586_v43 = vpack.c.bf16 %v12110_v53, %v12075_v31  ;;  %v6481_v60 = vadd.f32 1.0, %v9360_v12  ;;  %9385 = verf.f32 %v6362_v63  ;;  %v6364_v48 = vmul.f32 0.70710677, %v12117_v49 }
0x12a9   :  { %v9368_v16 = vpop.eup %9367  ;;  %v6588_v27 = vpack.c.bf16 %v12121_v52, %v12081_v45  ;;  %v6543_v34 = vmul.f32 %v6479_v62, %v12014_v9  ;;  %v6483_v13 = vadd.f32 1.0, %v9362_v11  ;;  %9387 = verf.f32 %v6366_v4  ;;  %v6247_v11 = vpop.f32.mrf.mxu1 }
0x12aa   :  { %v9370_v26 = vpop.eup %9369  ;;  %v6487_v55 = vadd.f32 1.0, %v9364_v2  ;;  %9389 = verf.f32 %v6368_v8  ;;  %v6370_v29 = vmul.f32 0.70710677, %v12128_v40  ;;  %v12151_v31 = vadd.f32 %v6243_v56, %v11689_v42 }
0x12ab   :  { %v9372_v10 = vpop.eup %9371  ;;  %v6489_v53 = vadd.f32 1.0, %v9366_v3  ;;  %v6371_v25 = vmul.f32 0.70710677, %v12141_v1  ;;  %v12155_v50 = vadd.f32 %v6132_v39, %v11682_v54  ;;  %v12158_v12 = vadd.f32 %v6245_v35, %v11684_v41 }
0x12ac   :  { %v6545_v9 = vmul.f32 %v6481_v60, %v12027_v7  ;;  %9391 = verf.f32 %v6364_v48  ;;  %v6299_v63 = vmul.f32 0.5, %v12062_v24  ;;  %v6373_v22 = vmul.f32 0.70710677, %v12151_v31  ;;  %v9374_v56 = vpop.eup %9373 }
0x12ad   :  { %v6482_v62 = vadd.f32 1.0, %v9368_v16  ;;  %v6485_v4 = vadd.f32 1.0, %v9370_v26  ;;  %v12165_v58 = vadd.f32 %v12092_v5, %v11684_v41  ;;  %v6374_v54 = vmul.f32 0.70710677, %v12155_v50 }
0x12ae   :  { %v6484_v8 = vadd.f32 1.0, %v9372_v10  ;;  %v6547_v19 = vmul.f32 %v6483_v13, %v12069_v57  ;;  %9393 = verf.f32 %v6370_v29  ;;  %v6376_v7 = vmul.f32 0.70710677, %v12158_v12  ;;  %v9376_v24 = vpop.eup %9375 }
0x12af   :  { %v6551_v2 = vmul.f32 %v6487_v55, %v6295_v59  ;;  %v6553_v3 = vmul.f32 %v6489_v53, %v6297_v21  ;;  %9395 = verf.f32 %v6371_v25  ;;  %v12171_v60 = vadd.f32 %v6134_v46, %v11686_v18 }
0x12b0   :  { %v9378_v48 = vpop.eup %9377  ;;  %v6486_v39 = vadd.f32 1.0, %v9374_v56  ;;  %9397 = verf.f32 %v6373_v22  ;;  %v12174_v41 = vadd.f32 %v6247_v11, %v11689_v42  ;;  %v6587_v5 = vpack.c.bf16 %v6543_v34, %v12095_v0 }
0x12b1   :  { %v9380_v35 = vpop.eup %9379  ;;  %v6549_v57 = vmul.f32 %v6485_v4, %v12077_v28  ;;  %v6372_v16 = vmul.f32 0.70710677, %v12165_v58  ;;  %9399 = verf.f32 %v6374_v54  ;;  %v6375_v59 = vmul.f32 0.70710677, %v12171_v60 }
0x12b2   :  { %v6491_v21 = vadd.f32 1.0, %v9376_v24  ;;  %9401 = verf.f32 %v6376_v7  ;;  %v6377_v18 = vmul.f32 0.70710677, %v12174_v41  ;;  %6929 = vmatprep.mubr.bf16.mxu0 %v6587_v5  ;;  %v6589_v13 = vpack.c.bf16 %v6545_v9, %v12137_v30 }
0x12b3   :  { %v9382_v26 = vpop.eup %9381  ;;  %v6488_v42 = vadd.f32 1.0, %v9378_v48  ;;  %9403 = verf.f32 %v6375_v59  ;;  %6930 = vmatmul.mubr.bf16.gmra.mxu0 %v6586_v43  ;;  %v6591_v0 = vpack.c.bf16 %v6551_v2, %v6547_v19  ;;  %v6593_v34 = vpack.c.bf16 %v6553_v3, %v6549_v57 }
0x12b4   :  { %v9384_v55 = vpop.eup %9383  ;;  %v6493_v28 = vadd.f32 1.0, %v9380_v35  ;;  %v6303_v29 = vmul.f32 0.5, %v12104_v20  ;;  %v6495_v10 = vadd.f32 1.0, %v9382_v26  ;;  %9405 = verf.f32 %v6377_v18  ;;  %7026 = vmatprep.mubr.bf16.mxu1 %v6589_v13 }
0x12b5   :  { %v9386_v53 = vpop.eup %9385  ;;  %v6550_v25 = vmul.f32 %v6486_v39, %v12083_v47  ;;  %v6305_v22 = vmul.f32 0.5, %v12107_v38  ;;  %v6497_v46 = vadd.f32 1.0, %v9384_v55  ;;  %9407 = verf.f32 %v6372_v16  ;;  %7027 = vmatmul.mubr.bf16.gmra.mxu1 %v6588_v27  ;;  %6937 = vmatprep.mubr.bf16.mxu0 %v6591_v0 }
0x12b6   :  { %v9388_v30 = vpop.eup %9387  ;;  %v6555_v43 = vmul.f32 %v6491_v21, %v6299_v63  ;;  %v6301_v9 = vmul.f32 0.5, %v12072_v32  ;;  %v6559_v20 = vmul.f32 %v6495_v10, %v6303_v29  ;;  %7034 = vmatprep.mubr.bf16.mxu1 %v6593_v34  ;;  %v6546_v4 = vmul.f32 %v6482_v62, %v12044_v37 }
0x12b7   :  { %v9390_v56 = vpop.eup %9389  ;;  %v6292_v47 = vmul.f32 0.5, %v12036_v51  ;;  %v6552_v38 = vmul.f32 %v6488_v42, %v12085_v17  ;;  %v6561_v54 = vmul.f32 %v6497_v46, %v6305_v22  ;;  %v6494_v27 = vadd.f32 1.0, %v9388_v30 }
0x12b8   :  { %v6557_v11 = vmul.f32 %v6493_v28, %v6301_v9  ;;  %v6595_v19 = vpack.c.bf16 %v6559_v20, %v6555_v43  ;;  %v6590_v52 = vpack.c.bf16 %v6550_v25, %v6546_v4  ;;  %v6496_v24 = vadd.f32 1.0, %v9390_v56 }
0x12b9   :  { %v9392_v7 = vpop.eup %9391  ;;  %v6548_v45 = vmul.f32 %v6484_v8, %v6292_v47  ;;  %v6490_v3 = vadd.f32 1.0, %v9386_v53  ;;  %v6302_v48 = vmul.f32 0.5, %v12098_v44  ;;  %v6304_v51 = vmul.f32 0.5, %v12101_v33 }
0x12ba   :  { %v6597_v63 = vpack.c.bf16 %v6561_v54, %v6557_v11  ;;  %v6492_v62 = vadd.f32 1.0, %v9392_v7  ;;  %v6298_v39 = vmul.f32 0.5, %v12089_v61  ;;  %v6300_v35 = vmul.f32 0.5, %v12117_v49 }
0x12bb   :  { %v9394_v2 = vpop.eup %9393  ;;  %v6592_v32 = vpack.c.bf16 %v6552_v38, %v6548_v45  ;;  %6938 = vmatmul.mubr.bf16.gmra.mxu0 %v6590_v52  ;;  %v6558_v5 = vmul.f32 %v6494_v27, %v6302_v48  ;;  %v6560_v57 = vmul.f32 %v6496_v24, %v6304_v51  ;;  %v6307_v13 = vmul.f32 0.5, %v12141_v1 }
0x12bc   :  { %v9396_v37 = vpop.eup %9395  ;;  %6945 = vmatprep.mubr.bf16.mxu0 %v6595_v19  ;;  %v6554_v59 = vmul.f32 %v6490_v3, %v6298_v39  ;;  %v6556_v18 = vmul.f32 %v6492_v62, %v6300_v35  ;;  %v6309_v33 = vmul.f32 0.5, %v12151_v31  ;;  %v6311_v34 = vmul.f32 0.5, %v12171_v60 }
0x12bd   :  { %v9398_v17 = vpop.eup %9397  ;;  %7035 = vmatmul.mubr.bf16.gmra.mxu1 %v6592_v32  ;;  %v6499_v21 = vadd.f32 1.0, %v9396_v37  ;;  %v6310_v29 = vmul.f32 0.5, %v12155_v50  ;;  %v6313_v10 = vmul.f32 0.5, %v12174_v41  ;;  %v6498_v25 = vadd.f32 1.0, %v9394_v2 }
0x12be   :  { %v9400_v8 = vpop.eup %9399  ;;  %7042 = vmatprep.mubr.bf16.mxu1 %v6597_v63  ;;  %v6501_v26 = vadd.f32 1.0, %v9398_v17  ;;  %v6594_v0 = vpack.c.bf16 %v6558_v5, %v6554_v59  ;;  %v6596_v49 = vpack.c.bf16 %v6560_v57, %v6556_v18  ;;  %v6306_v31 = vmul.f32 0.5, %v12128_v40 }
0x12bf   :  { %v9402_v16 = vpop.eup %9401  ;;  %v6502_v61 = vadd.f32 1.0, %v9400_v8  ;;  %v6563_v22 = vmul.f32 %v6499_v21, %v6307_v13  ;;  %v6312_v60 = vmul.f32 0.5, %v12158_v12  ;;  %v6308_v41 = vmul.f32 0.5, %v12165_v58  ;;  %v12207_v12 = vld [vmem:[%s12257_s13] ss:$0 sm:$0xff]  ;;  %s9448_s13 = smov [#allocation2]  }
0x12c0   :  { %v9404_v44 = vpop.eup %9403  ;;  %v6504_v46 = vadd.f32 1.0, %v9402_v16  ;;  %v6565_v30 = vmul.f32 %v6501_v26, %v6309_v33  ;;  %v6562_v50 = vmul.f32 %v6498_v25, %v6306_v31  ;;  %s7096_s2 = sshll.u32 %s9448_s13, 4  ;;  %s7097_s2 = int_to_ptr.vmem [resolvable:$true] %s7096_s2 }
0x12c1   :  { %v9406_v42 = vpop.eup %9405  ;;  %v6503_v55 = vadd.f32 1.0, %v9404_v44  ;;  %v6566_v20 = vmul.f32 %v6502_v61, %v6310_v29  ;;  %s9425_s19 = scalar_lea.vmem %s7097_s2, 2048  ;;  %p9430_p1 = scmp.lt.s32.totalorder %s7097_s2, %s7097_s2 }
0x12c2   :  { %v9408_v28 = vpop.eup %9407  ;;  %v6505_v53 = vadd.f32 1.0, %v9406_v42  ;;  %v6568_v47 = vmul.f32 %v6504_v46, %v6312_v60  ;;  %p9426_p0 = scmp.ne.s32.totalorder %s7097_s2, %s9425_s19  ;;  %p9431_p2 = scmp.lt.s32.totalorder %s9425_s19, %s9425_s19 }
0x12c3   :  { %v6567_v1 = vmul.f32 %v6503_v55, %v6311_v34  ;;  %6946 = vmatmul.mubr.bf16.gmra.mxu0 %v6594_v0  ;;  %v6500_v9 = vadd.f32 1.0, %v9408_v28  ;;  %v6598_v54 = vpack.c.bf16 %v6566_v20, %v6562_v50 }
0x12c4   :  { %v6569_v43 = vmul.f32 %v6505_v53, %v6313_v10  ;;  %p9432_p3 = por %p9431_p2, %p9430_p1 }
0x12c5   :  { %7043 = vmatmul.mubr.bf16.gmra.mxu1 %v6596_v49  ;;  %v6599_v56 = vpack.c.bf16 %v6567_v1, %v6563_v22  ;;  %v6564_v38 = vmul.f32 %v6500_v9, %v6308_v41 }
0x12c6   :  { %v6601_v4 = vpack.c.bf16 %v6569_v43, %v6565_v30  ;;  %p9433_p4 = pnand %p9432_p3, %p9426_p0 }
0x12c7   :  { %6953 = vmatprep.mubr.bf16.mxu0 %v6599_v56  ;;  %v6600_v11 = vpack.c.bf16 %v6568_v47, %v6564_v38 }
0x12c8   :  { %7050 = vmatprep.mubr.bf16.mxu1 %v6601_v4  ;;  %v12313_v4 = vld [vmem:[#allocation8_spill] sm:$0xff] }
0x12cb   :  { %6954 = vmatmul.mubr.bf16.gmra.mxu0 %v6598_v54 }
0x12cd   :  { %7051 = vmatmul.mubr.bf16.gmra.mxu1 %v6600_v11 }
0x133f   :  { %v7909_v40 = vpop.f32.mrf.mxu0 }
0x1340   :  { %v7973_v19 = vpop.f32.mrf.mxu1 }
0x1341   :  { %v7910_v7 = vpop.f32.mrf.mxu0 }
0x1342   :  { %v7911_v45 = vadd.f32 %v7910_v7, %v7909_v40  ;;  %v7974_v52 = vpop.f32.mrf.mxu1 }
0x1343   :  { %v7912_v27 = vpop.f32.mrf.mxu0  ;;  %v7975_v24 = vadd.f32 %v7974_v52, %v7973_v19 }
0x1344   :  { %v6900_v58 = vadd.f32 %v7911_v45, %v12207_v12  ;;  %v7976_v63 = vpop.f32.mrf.mxu1 }
0x1345   :  { %v7913_v2 = vpop.f32.mrf.mxu0 }
0x1346   :  { %v6997_v32 = vadd.f32 %v7975_v24, %v6900_v58  ;;  %v7914_v3 = vadd.f32 %v7913_v2, %v7912_v27  ;;  %v7977_v48 = vpop.f32.mrf.mxu1  ;;  %v12314_v27 = vld [vmem:[#allocation15_spill] sm:$0xff] }
0x1347   :  { %v7978_v51 = vadd.f32 %v7977_v48, %v7976_v63 }
0x1348   :  { %v7059_v37 = vadd.f32 %v6997_v32, %v11210_v14  ;;  %v6903_v62 = vadd.f32 %v7914_v3, %v12207_v12  ;;  %v12315_v32 = vld [vmem:[#allocation16_spill] sm:$0xff] }
0x134a   :  { %7075 = vst [vmem:[#allocation2] sm:$0xff] %v7059_v37  ;;  %v7000_v17 = vadd.f32 %v7978_v51, %v6903_v62 }
0x134c   :  { %v7060_v39 = vadd.f32 %v7000_v17, %v11223_v23  ;;  %v7915_v5 = vpop.f32.mrf.mxu0 }
0x134d   :  { %v7979_v8 = vpop.f32.mrf.mxu1 }
0x134e   :  { %7076 = vst [vmem:[#allocation2 + $0x8] sm:$0xff] %v7060_v39  ;;  %v7916_v35 = vpop.f32.mrf.mxu0 }
0x134f   :  { %v7917_v57 = vadd.f32 %v7916_v35, %v7915_v5  ;;  %v7980_v16 = vpop.f32.mrf.mxu1 }
0x1350   :  { %v7918_v59 = vpop.f32.mrf.mxu0  ;;  %v7981_v44 = vadd.f32 %v7980_v16, %v7979_v8 }
0x1351   :  { %v6908_v21 = vadd.f32 %v7917_v57, %v12207_v12  ;;  %v7982_v18 = vpop.f32.mrf.mxu1 }
0x1352   :  { %v7919_v13 = vpop.f32.mrf.mxu0 }
0x1353   :  { %v7005_v14 = vadd.f32 %v7981_v44, %v6908_v21  ;;  %v7920_v33 = vadd.f32 %v7919_v13, %v7918_v59  ;;  %v7983_v26 = vpop.f32.mrf.mxu1 }
0x1354   :  { %v7984_v23 = vadd.f32 %v7983_v26, %v7982_v18  ;;  %v12316_v18 = vld [vmem:[#allocation9_spill] sm:$0xff] }
0x1355   :  { %v7061_v42 = vadd.f32 %v7005_v14, %v11220_v36  ;;  %v6911_v0 = vadd.f32 %v7920_v33, %v12207_v12 }
0x1357   :  { %7077 = vst [vmem:[#allocation2 + $0x10] sm:$0xff] %v7061_v42  ;;  %v7008_v61 = vadd.f32 %v7984_v23, %v6911_v0 }
0x1359   :  { %v7062_v34 = vadd.f32 %v7008_v61, %v11228_v15 }
0x135b   :  { %7078 = vst [vmem:[#allocation2 + $0x18] sm:$0xff] %v7062_v34  ;;  %v7921_v55 = vpop.f32.mrf.mxu0 }
0x135d   :  { %v7922_v49 = vpop.f32.mrf.mxu0 }
0x135e   :  { %v7985_v28 = vpop.f32.mrf.mxu1  ;;  %v7923_v29 = vadd.f32 %v7922_v49, %v7921_v55  ;;  %v12317_v55 = vld [vmem:[#allocation10_spill] sm:$0xff] }
0x135f   :  { %v7924_v53 = vpop.f32.mrf.mxu0 }
0x1360   :  { %v7986_v10 = vpop.f32.mrf.mxu1  ;;  %v6916_v25 = vadd.f32 %v7923_v29, %v12207_v12 }
0x1361   :  { %v7987_v22 = vadd.f32 %v7986_v10, %v7985_v28  ;;  %v7925_v1 = vpop.f32.mrf.mxu0 }
0x1362   :  { %v7988_v46 = vpop.f32.mrf.mxu1  ;;  %v7926_v31 = vadd.f32 %v7925_v1, %v7924_v53 }
0x1363   :  { %v7013_v36 = vadd.f32 %v7987_v22, %v6916_v25 }
0x1364   :  { %v7989_v30 = vpop.f32.mrf.mxu1  ;;  %v6919_v9 = vadd.f32 %v7926_v31, %v12207_v12 }
0x1365   :  { %v7063_v43 = vadd.f32 %v7013_v36, %v11244_v6  ;;  %v7990_v15 = vadd.f32 %v7989_v30, %v7988_v46  ;;  %v12318_v36 = vld [vmem:[#allocation17_spill] sm:$0xff] }
0x1366   :  { %v7991_v56 = vpop.f32.mrf.mxu1 }
0x1367   :  { %7079 = vst [vmem:[#allocation2 + $0x20] sm:$0xff] %v7063_v43  ;;  %v7016_v20 = vadd.f32 %v7990_v15, %v6919_v9 }
0x1368   :  { %v7927_v60 = vpop.f32.mrf.mxu0  ;;  %v7992_v47 = vpop.f32.mrf.mxu1 }
0x1369   :  { %v7064_v50 = vadd.f32 %v7016_v20, %v12313_v4  ;;  %v7993_v19 = vadd.f32 %v7992_v47, %v7991_v56 }
0x136a   :  { %v7928_v41 = vpop.f32.mrf.mxu0  ;;  %v7994_v11 = vpop.f32.mrf.mxu1 }
0x136b   :  { %v7929_v38 = vadd.f32 %v7928_v41, %v7927_v60  ;;  %7080 = vst [vmem:[#allocation2 + $0x28] sm:$0xff] %v7064_v50  ;;  %v12319_v50 = vld [vmem:[#allocation12_spill] sm:$0xff] }
0x136c   :  { %v7930_v54 = vpop.f32.mrf.mxu0  ;;  %v7995_v6 = vpop.f32.mrf.mxu1 }
0x136d   :  { %v6924_v40 = vadd.f32 %v7929_v38, %v12207_v12  ;;  %v7996_v63 = vadd.f32 %v7995_v6, %v7994_v11 }
0x136e   :  { %v7931_v7 = vpop.f32.mrf.mxu0 }
0x136f   :  { %v7021_v45 = vadd.f32 %v7993_v19, %v6924_v40  ;;  %v7932_v52 = vadd.f32 %v7931_v7, %v7930_v54 }
0x1371   :  { %v7065_v58 = vadd.f32 %v7021_v45, %v12314_v27  ;;  %v6927_v24 = vadd.f32 %v7932_v52, %v12207_v12  ;;  %v12320_v45 = vld [vmem:[#allocation5_spill] sm:$0xff] }
0x1373   :  { %7081 = vst [vmem:[#allocation2 + $0x30] sm:$0xff] %v7065_v58  ;;  %v7024_v2 = vadd.f32 %v7996_v63, %v6927_v24  ;;  %v7933_v48 = vpop.f32.mrf.mxu0 }
0x1375   :  { %v7066_v3 = vadd.f32 %v7024_v2, %v12315_v32  ;;  %v7997_v37 = vpop.f32.mrf.mxu1  ;;  %v7934_v62 = vpop.f32.mrf.mxu0 }
0x1376   :  { %v7935_v51 = vadd.f32 %v7934_v62, %v7933_v48 }
0x1377   :  { %7082 = vst [vmem:[#allocation2 + $0x38] sm:$0xff] %v7066_v3  ;;  %v7998_v17 = vpop.f32.mrf.mxu1  ;;  %v7936_v39 = vpop.f32.mrf.mxu0 }
0x1378   :  { %v6932_v5 = vadd.f32 %v7935_v51, %v12207_v12  ;;  %v7999_v8 = vadd.f32 %v7998_v17, %v7997_v37  ;;  %v12321_v37 = vld [vmem:[#allocation13_spill] sm:$0xff] }
0x1379   :  { %v8000_v35 = vpop.f32.mrf.mxu1  ;;  %v7937_v57 = vpop.f32.mrf.mxu0 }
0x137a   :  { %v7029_v16 = vadd.f32 %v7999_v8, %v6932_v5  ;;  %v7938_v59 = vadd.f32 %v7937_v57, %v7936_v39 }
0x137b   :  { %v8001_v21 = vpop.f32.mrf.mxu1  ;;  %v7939_v44 = vpop.f32.mrf.mxu0 }
0x137c   :  { %v7067_v13 = vadd.f32 %v7029_v16, %v12316_v18  ;;  %v6935_v14 = vadd.f32 %v7938_v59, %v12207_v12  ;;  %v8002_v33 = vadd.f32 %v8001_v21, %v8000_v35  ;;  %v12322_v16 = vld [vmem:[#allocation6_spill] sm:$0xff] }
0x137d   :  { %v8003_v26 = vpop.f32.mrf.mxu1  ;;  %v7940_v42 = vpop.f32.mrf.mxu0 }
0x137e   :  { %7083 = vst [vmem:[#allocation2 + $0x40] sm:$0xff] %v7067_v13  ;;  %v7032_v0 = vadd.f32 %v8002_v33, %v6935_v14  ;;  %v7941_v23 = vadd.f32 %v7940_v42, %v7939_v44  ;;  %v12323_v13 = vld [vmem:[#allocation14_spill] sm:$0xff] }
0x137f   :  { %v8004_v61 = vpop.f32.mrf.mxu1  ;;  %v7942_v34 = vpop.f32.mrf.mxu0 }
0x1380   :  { %v7068_v28 = vadd.f32 %v7032_v0, %v12317_v55  ;;  %v6940_v49 = vadd.f32 %v7941_v23, %v12207_v12  ;;  %v8005_v29 = vadd.f32 %v8004_v61, %v8003_v26 }
0x1381   :  { %v8006_v10 = vpop.f32.mrf.mxu1  ;;  %v7943_v53 = vpop.f32.mrf.mxu0 }
0x1382   :  { %7084 = vst [vmem:[#allocation2 + $0x48] sm:$0xff] %v7068_v28  ;;  %v7037_v25 = vadd.f32 %v8005_v29, %v6940_v49  ;;  %v7944_v22 = vadd.f32 %v7943_v53, %v7942_v34 }
0x1383   :  { %v8007_v46 = vpop.f32.mrf.mxu1  ;;  %v7945_v1 = vpop.f32.mrf.mxu0 }
0x1384   :  { %v7069_v31 = vadd.f32 %v7037_v25, %v12318_v36  ;;  %v6943_v30 = vadd.f32 %v7944_v22, %v12207_v12  ;;  %v8008_v43 = vadd.f32 %v8007_v46, %v8006_v10 }
0x1385   :  { %v8009_v9 = vpop.f32.mrf.mxu1  ;;  %v7946_v15 = vpop.f32.mrf.mxu0 }
0x1386   :  { %7085 = vst [vmem:[#allocation2 + $0x50] sm:$0xff] %v7069_v31  ;;  %v7040_v20 = vadd.f32 %v8008_v43, %v6943_v30  ;;  %v7947_v60 = vadd.f32 %v7946_v15, %v7945_v1 }
0x1387   :  { %v8010_v56 = vpop.f32.mrf.mxu1  ;;  %v7948_v4 = vpop.f32.mrf.mxu0 }
0x1388   :  { %v7070_v41 = vadd.f32 %v7040_v20, %v12319_v50  ;;  %v6948_v47 = vadd.f32 %v7947_v60, %v12207_v12  ;;  %v8011_v38 = vadd.f32 %v8010_v56, %v8009_v9 }
0x1389   :  { %v8012_v54 = vpop.f32.mrf.mxu1  ;;  %v7949_v11 = vpop.f32.mrf.mxu0 }
0x138a   :  { %7086 = vst [vmem:[#allocation2 + $0x58] sm:$0xff] %v7070_v41  ;;  %v7045_v40 = vadd.f32 %v8011_v38, %v6948_v47  ;;  %v7950_v19 = vadd.f32 %v7949_v11, %v7948_v4 }
0x138b   :  { %v8013_v7 = vpop.f32.mrf.mxu1  ;;  %v7951_v6 = vpop.f32.mrf.mxu0 }
0x138c   :  { %v7071_v52 = vadd.f32 %v7045_v40, %v12320_v45  ;;  %v6951_v27 = vadd.f32 %v7950_v19, %v12207_v12  ;;  %v8014_v58 = vadd.f32 %v8013_v7, %v8012_v54 }
0x138d   :  { %v8015_v24 = vpop.f32.mrf.mxu1  ;;  %v7952_v63 = vpop.f32.mrf.mxu0 }
0x138e   :  { %7087 = vst [vmem:[#allocation2 + $0x60] sm:$0xff] %v7071_v52  ;;  %v7048_v2 = vadd.f32 %v8014_v58, %v6951_v27  ;;  %v7953_v32 = vadd.f32 %v7952_v63, %v7951_v6 }
0x138f   :  { %v8016_v3 = vpop.f32.mrf.mxu1  ;;  %v7954_v48 = vpop.f32.mrf.mxu0 }
0x1390   :  { %v7072_v62 = vadd.f32 %v7048_v2, %v12321_v37  ;;  %v6956_v51 = vadd.f32 %v7953_v32, %v12207_v12  ;;  %v8017_v17 = vadd.f32 %v8016_v3, %v8015_v24 }
0x1391   :  { %v8018_v39 = vpop.f32.mrf.mxu1  ;;  %v7955_v5 = vpop.f32.mrf.mxu0 }
0x1392   :  { %7088 = vst [vmem:[#allocation2 + $0x68] sm:$0xff] %v7072_v62  ;;  %v7053_v8 = vadd.f32 %v8017_v17, %v6956_v51  ;;  %v7956_v35 = vadd.f32 %v7955_v5, %v7954_v48 }
0x1393   :  { %v8019_v57 = vpop.f32.mrf.mxu1 }
0x1394   :  { %v7073_v59 = vadd.f32 %v7053_v8, %v12322_v16  ;;  %v6959_v21 = vadd.f32 %v7956_v35, %v12207_v12  ;;  %v8020_v44 = vadd.f32 %v8019_v57, %v8018_v39 }
0x1396   :  { %7089 = vst [vmem:[#allocation2 + $0x70] sm:$0xff] %v7073_v59  ;;  %v7056_v18 = vadd.f32 %v8020_v44, %v6959_v21 }
0x1398   :  { %v7074_v14 = vadd.f32 %v7056_v18, %v12323_v13 }
0x139a   :  { %7090 = vst [vmem:[#allocation2 + $0x78] sm:$0xff] %v7074_v14 }
0x139b   :  { %9436 = shalt.err (!%p9433_p4)
}
0x139c   :  { %s9449_s20 = smov 128   ;;  %s9450_s21 = smov 8  }
0x139d   :  { %7102 = dma.vmem_to_hbm [thread:$0]  %s7097_s2, 2048, %s12258_s14, [#allocation3], %s9449_s20, %s9449_s20, %s9450_s21  }
0x139e   :  { %9445 = dma.done.wait [#allocation3], 2048  }
0x139f   :  { %9446 = vsyncadd [#allocation3], 4294965248 }
0x13a0   :  { %7106 = vsyncpa [#allocation3], 1 }

</bundles_post_ra>
